<compile_context>
chip_gen: v7x
topology: tpu7x:2x2x1
jax: 0.10.0
libtpu: 0.0.40
codegen_flags: <defaults>
</compile_context>

<pallas_src>
import functools

import numpy as np
import jax
import jax.numpy as jnp
from jax import lax
from jax.experimental import pallas as pl
from jax.experimental.pallas import tpu as pltpu

_DOT_DTYPE = jnp.bfloat16            # MXU input dtype (accumulation is f32)
_VMEM_LIMIT = 64 * 1024 * 1024       # explicit scoped-VMEM budget (fits v5e..v7x)


def _round_up(v, m):
    return (v + m - 1) // m * m


# ----------------------------------------------------------------------------
# Pallas kernels
# ----------------------------------------------------------------------------
def _matmul_bias_kernel(x_ref, w_ref, b_ref, o_ref, *, relu):
    """out = relu(x @ w + b).  x:(TM,K) f32, w:(K,N) bf16 resident, b:(1,N) f32."""
    x = x_ref[...].astype(_DOT_DTYPE)
    acc = jnp.dot(x, w_ref[...], preferred_element_type=jnp.float32)
    acc = acc + b_ref[...]
    if relu:
        acc = jnp.maximum(acc, 0.0)
    o_ref[...] = acc.astype(o_ref.dtype)


def _fused_noisy_fc_kernel(x_ref, w1_ref, s1_ref, fin1_ref, fout1_ref, b1_ref,
                           w2_ref, s2_ref, fin2_ref, fout2_ref, b2_ref, o_ref):
    """q = noisy_fc2(relu(noisy_fc1(x))) via the rank-1 noise identity.

    noisy(x) = x @ W^T + fout * ((x * fin) @ S^T) + (b + sb*fout)
    Weights arrive pre-transposed as (K, N). All accumulation in f32; the
    hidden (TM, 512) activation never leaves VMEM/vregs.
    """
    x = x_ref[...]                                           # (TM, K1) f32
    h = jnp.dot(x.astype(_DOT_DTYPE), w1_ref[...],
                preferred_element_type=jnp.float32)
    xs = (x * fin1_ref[...]).astype(_DOT_DTYPE)              # row-scale by f(eps_in)
    h = h + jnp.dot(xs, s1_ref[...],
                    preferred_element_type=jnp.float32) * fout1_ref[...]
    h = h + b1_ref[...]
    h = jnp.maximum(h, 0.0)                                  # (TM, 512) f32

    q = jnp.dot(h.astype(_DOT_DTYPE), w2_ref[...],
                preferred_element_type=jnp.float32)
    hs = (h * fin2_ref[...]).astype(_DOT_DTYPE)
    q = q + jnp.dot(hs, s2_ref[...],
                    preferred_element_type=jnp.float32) * fout2_ref[...]
    q = q + b2_ref[...]
    o_ref[...] = q.astype(o_ref.dtype)


# ----------------------------------------------------------------------------
# Wrappers
# ----------------------------------------------------------------------------
def matmul_bias(x, w_t, b_row, *, relu, tile_m=256):
    """Tiled (over M) matmul + bias (+ReLU). Weights stay VMEM-resident."""
    M, K = x.shape
    K2, N = w_t.shape
    assert K == K2
    M_pad = _round_up(M, 8)                      # sublane-align rows
    if M_pad != M:
        x = jnp.pad(x, ((0, M_pad - M), (0, 0)))
    TM = min(tile_m, M_pad)
    grid = (pl.cdiv(M_pad, TM),)
    flops = 2 * M_pad * K * N
    bytes_accessed = (M_pad * K * x.dtype.itemsize
                      + K * N * w_t.dtype.itemsize
                      + M_pad * N * 4)
    out = pl.pallas_call(
        functools.partial(_matmul_bias_kernel, relu=relu),
        out_shape=jax.ShapeDtypeStruct((M_pad, N), jnp.float32),
        grid=grid,
        in_specs=[
            pl.BlockSpec((TM, K), lambda i: (i, 0)),    # x tile, pipelined over M
            pl.BlockSpec((K, N), lambda i: (0, 0)),     # weight, resident
            pl.BlockSpec((1, N), lambda i: (0, 0)),     # bias row, resident
        ],
        out_specs=pl.BlockSpec((TM, N), lambda i: (i, 0)),
        compiler_params=pltpu.CompilerParams(
            dimension_semantics=("parallel",),
            vmem_limit_bytes=_VMEM_LIMIT),
        cost_estimate=pl.CostEstimate(flops=flops, transcendentals=0,
                                      bytes_accessed=bytes_accessed),
    )(x, w_t, b_row)
    return out[:M] if M_pad != M else out


def fused_noisy_fc(x, fc1, fc2, n_actions, *, tile_m=256):
    """Fused noisy-fc1 -> ReLU -> noisy-fc2, tiled over rows of x."""
    M, K1 = x.shape
    H1 = fc1["w_t"].shape[1]
    NP = fc2["w_t"].shape[1]                     # n_actions padded to 128 lanes
    M_pad = _round_up(M, 8)
    if M_pad != M:
        x = jnp.pad(x, ((0, M_pad - M), (0, 0)))
    TM = min(tile_m, M_pad)
    grid = (pl.cdiv(M_pad, TM),)
    flops = 4 * M_pad * K1 * H1 + 4 * M_pad * H1 * NP
    bytes_accessed = (M_pad * K1 * 4
                      + 2 * K1 * H1 * fc1["w_t"].dtype.itemsize
                      + 2 * H1 * NP * fc2["w_t"].dtype.itemsize
                      + M_pad * NP * 4)
    out = pl.pallas_call(
        _fused_noisy_fc_kernel,
        out_shape=jax.ShapeDtypeStruct((M_pad, NP), jnp.float32),
        grid=grid,
        in_specs=[
            pl.BlockSpec((TM, K1), lambda i: (i, 0)),   # x tile
            pl.BlockSpec((K1, H1), lambda i: (0, 0)),   # W1^T (resident)
            pl.BlockSpec((K1, H1), lambda i: (0, 0)),   # sigma1^T (resident)
            pl.BlockSpec((1, K1), lambda i: (0, 0)),    # f(eps_in1)
            pl.BlockSpec((1, H1), lambda i: (0, 0)),    # f(eps_out1)
            pl.BlockSpec((1, H1), lambda i: (0, 0)),    # bias1 + sb1*f(eps_out1)
            pl.BlockSpec((H1, NP), lambda i: (0, 0)),   # W2^T (padded, resident)
            pl.BlockSpec((H1, NP), lambda i: (0, 0)),   # sigma2^T (padded)
            pl.BlockSpec((1, H1), lambda i: (0, 0)),    # f(eps_in2)
            pl.BlockSpec((1, NP), lambda i: (0, 0)),    # f(eps_out2) (padded)
            pl.BlockSpec((1, NP), lambda i: (0, 0)),    # bias2_eff (padded)
        ],
        out_specs=pl.BlockSpec((TM, NP), lambda i: (i, 0)),
        compiler_params=pltpu.CompilerParams(
            dimension_semantics=("parallel",),
            vmem_limit_bytes=_VMEM_LIMIT),
        cost_estimate=pl.CostEstimate(flops=flops, transcendentals=0,
                                      bytes_accessed=bytes_accessed),
    )(x, fc1["w_t"], fc1["s_t"], fc1["f_eps_in"], fc1["f_eps_out"], fc1["b_eff"],
      fc2["w_t"], fc2["s_t"], fc2["f_eps_in"], fc2["f_eps_out"], fc2["b_eff"])
    return out[:M, :n_actions]


def im2col_nhwc(x, K, S):
    """x: (N,H,W,C) -> patches (N*OH*OW, K*K*C) in (kh, kw, c) column order.

    Built directly in gather order: a strided-slice stack, no 6-D transpose.
    """
    N, H, W, C = x.shape
    OH = (H - K) // S + 1
    OW = (W - K) // S + 1
    cols = [x[:, kh:kh + S * OH:S, kw:kw + S * OW:S, :]
            for kh in range(K) for kw in range(K)]        # each (N,OH,OW,C)
    p = jnp.stack(cols, axis=3)                           # (N,OH,OW,K*K,C)
    return p.reshape(N * OH * OW, K * K * C), OH, OW


def conv2d_relu(x_nhwc, w_t, b_row, ksize, stride, tile_m=256):
    """NHWC conv via im2col + tiled Pallas matmul; output stays NHWC."""
    N = x_nhwc.shape[0]
    Cout = w_t.shape[1]
    patches, OH, OW = im2col_nhwc(x_nhwc, ksize, stride)
    out = matmul_bias(patches, w_t, b_row, relu=True, tile_m=tile_m)
    return out.reshape(N, OH, OW, Cout)


# ----------------------------------------------------------------------------
# Parameter init (PyTorch layout) and one-time kernel-layout preparation
# ----------------------------------------------------------------------------
def _conv_init(key, cout, cin, ksz):
    fan_in = cin * ksz * ksz
    bound = 1.0 / np.sqrt(fan_in)
    kw, kb = jax.random.split(key)
    w = jax.random.uniform(kw, (cout, cin, ksz, ksz), jnp.float32, -bound, bound)
    b = jax.random.uniform(kb, (cout,), jnp.float32, -bound, bound)
    return w, b


def _noisy_init(key, in_f, out_f, sigma=0.5):
    std = np.sqrt(1.0 / in_f)
    sigma_init = sigma / np.sqrt(in_f)
    kw, kb, ki, ko = jax.random.split(key, 4)
    return dict(
        weight=jax.random.uniform(kw, (out_f, in_f), jnp.float32, -std, std),
        bias=jax.random.uniform(kb, (out_f,), jnp.float32, -std, std),
        sigma_weight=jnp.full((out_f, in_f), sigma_init, jnp.float32),
        sigma_bias=jnp.full((out_f,), sigma_init, jnp.float32),
        # TODO(synk): PyTorch resamples these with normal_() every forward;
        # here they are sampled once, deterministically.
        eps_in=jax.random.normal(ki, (in_f,), jnp.float32),
        eps_out=jax.random.normal(ko, (out_f,), jnp.float32),
    )


def _conv_out_hw(input_shape):
    _, H, W = input_shape
    o1h, o1w = (H - 8) // 4 + 1, (W - 8) // 4 + 1
    o2h, o2w = (o1h - 4) // 2 + 1, (o1w - 4) // 2 + 1
    o3h, o3w = (o2h - 3) // 1 + 1, (o2w - 3) // 1 + 1
    return o3h, o3w


def init_params(key, input_shape, n_actions):
    C, _, _ = input_shape
    k1, k2, k3, k4, k5 = jax.random.split(key, 5)
    conv1_w, conv1_b = _conv_init(k1, 32, C, 8)
    conv2_w, conv2_b = _conv_init(k2, 64, 32, 4)
    conv3_w, conv3_b = _conv_init(k3, 64, 64, 3)
    o3h, o3w = _conv_out_hw(input_shape)
    conv_out_size = 64 * o3h * o3w
    return dict(
        conv1_w=conv1_w, conv1_b=conv1_b,
        conv2_w=conv2_w, conv2_b=conv2_b,
        conv3_w=conv3_w, conv3_b=conv3_b,
        fc1=_noisy_init(k4, conv_out_size, 512),
        fc2=_noisy_init(k5, 512, n_actions),
    )


def prepare_params(params, input_shape, n_actions):
    """One-time re-layout: NHWC-ordered conv weights, permuted fc1 columns,
    precomputed f(eps), effective biases, bf16 matmul operands, fc2 N padding."""
    o3h, o3w = _conv_out_hw(input_shape)
    f = lambda v: jnp.sign(v) * jnp.sqrt(jnp.abs(v))

    def conv_w(w):  # (Cout,Cin,KH,KW) -> (KH*KW*Cin, Cout), (kh,kw,c) row order
        cout = w.shape[0]
        return w.transpose(0, 2, 3, 1).reshape(cout, -1).T.astype(_DOT_DTYPE)

    def noisy_prep(p, perm_chw=None, pad_out_to=None):
        w, s = p["weight"], p["sigma_weight"]          # (out, in)
        b, sb = p["bias"], p["sigma_bias"]
        ein, eout = p["eps_in"], p["eps_out"]
        if perm_chw is not None:                       # (C,H,W) cols -> (H,W,C)
            c, h, wd = perm_chw
            out_f = w.shape[0]
            w = w.reshape(out_f, c, h, wd).transpose(0, 2, 3, 1).reshape(out_f, -1)
            s = s.reshape(out_f, c, h, wd).transpose(0, 2, 3, 1).reshape(out_f, -1)
            ein = ein.reshape(c, h, wd).transpose(1, 2, 0).reshape(-1)
        fin, fout = f(ein), f(eout)
        b_eff = b + sb * fout
        if pad_out_to is not None and pad_out_to > w.shape[0]:
            pad = pad_out_to - w.shape[0]
            w = jnp.pad(w, ((0, pad), (0, 0)))
            s = jnp.pad(s, ((0, pad), (0, 0)))
            fout = jnp.pad(fout, (0, pad))
            b_eff = jnp.pad(b_eff, (0, pad))
        return dict(
            w_t=w.T.astype(_DOT_DTYPE),
            s_t=s.T.astype(_DOT_DTYPE),
            f_eps_in=fin.reshape(1, -1).astype(jnp.float32),
            f_eps_out=fout.reshape(1, -1).astype(jnp.float32),
            b_eff=b_eff.reshape(1, -1).astype(jnp.float32),
        )

    n_pad = _round_up(max(n_actions, 128), 128)        # lane-dense fc2 output
    return dict(
        conv1_w_t=conv_w(params["conv1_w"]), conv1_b=params["conv1_b"].reshape(1, -1),
        conv2_w_t=conv_w(params["conv2_w"]), conv2_b=params["conv2_b"].reshape(1, -1),
        conv3_w_t=conv_w(params["conv3_w"]), conv3_b=params["conv3_b"].reshape(1, -1),
        fc1=noisy_prep(params["fc1"], perm_chw=(64, o3h, o3w)),
        fc2=noisy_prep(params["fc2"], pad_out_to=n_pad),
    )


# ----------------------------------------------------------------------------
# Forward pass (== DQNNoisyModel.forward)
# ----------------------------------------------------------------------------
def dqn_noisy_forward(prep, state_nchw, *, n_actions):
    x = jnp.transpose(state_nchw, (0, 2, 3, 1))        # single NCHW -> NHWC
    x = conv2d_relu(x, prep["conv1_w_t"], prep["conv1_b"], ksize=8, stride=4)
    x = conv2d_relu(x, prep["conv2_w_t"], prep["conv2_b"], ksize=4, stride=2)
    x = conv2d_relu(x, prep["conv3_w_t"], prep["conv3_b"], ksize=3, stride=1)
    n = x.shape[0]
    flat = x.reshape(n, -1)            # NHWC flatten; fc1 columns pre-permuted
    return fused_noisy_fc(flat, prep["fc1"], prep["fc2"], n_actions)


# ----------------------------------------------------------------------------
# Pure-JAX reference (f32, PyTorch layout) for a sanity check
# ----------------------------------------------------------------------------
def _reference_forward(params, state):
    def conv(x, w, b, stride):
        y = lax.conv_general_dilated(
            x, w, window_strides=(stride, stride), padding="VALID",
            dimension_numbers=("NCHW", "OIHW", "NCHW"))
        return jax.nn.relu(y + b[None, :, None, None])

    f = lambda v: jnp.sign(v) * jnp.sqrt(jnp.abs(v))

    def noisy(x, p):
        ein, eout = f(p["eps_in"]), f(p["eps_out"])
        w_eff = p["weight"] + p["sigma_weight"] * (eout[:, None] * ein[None, :])
        b_eff = p["bias"] + p["sigma_bias"] * eout
        return x @ w_eff.T + b_eff

    x = conv(state, params["conv1_w"], params["conv1_b"], 4)
    x = conv(x, params["conv2_w"], params["conv2_b"], 2)
    x = conv(x, params["conv3_w"], params["conv3_b"], 1)
    flat = x.reshape(x.shape[0], -1)
    h = jax.nn.relu(noisy(flat, params["fc1"]))
    return noisy(h, params["fc2"])


if __name__ == "__main__":
    key = jax.random.PRNGKey(0)
    batch, n_actions = 2, 6
    input_shape = (4, 52, 52)          # small Atari-like frame stack -> conv_out = 576

    pkey, xkey = jax.random.split(key)
    params = init_params(pkey, input_shape, n_actions)
    prep = prepare_params(params, input_shape, n_actions)
    x = jax.random.normal(xkey, (batch,) + input_shape, jnp.float32)

    fwd = jax.jit(functools.partial(dqn_noisy_forward, n_actions=n_actions))
    q = jax.block_until_ready(fwd(prep, x))
    assert q.shape == (batch, n_actions) and q.dtype == jnp.float32

    # Loose-tolerance sanity check vs. pure-JAX f32 reference (bf16 MXU inputs).
    q_ref = jax.block_until_ready(_reference_forward(params, x))
    scale = max(1.0, float(jnp.max(jnp.abs(q_ref))))
    err = float(jnp.max(jnp.abs(q - q_ref)))
    assert err <= 5e-2 * scale, f"mismatch: max|err|={err}, scale={scale}"

    print("KERNEL_OK")
</pallas_src>

<mosaic_0001>
module attributes {stable_mosaic.version = 11 : i64} {
  func.func @_matmul_bias_kernel(%arg0: i32, %arg1: memref<256x256xf32, #tpu.memory_space<vmem>>, %arg2: memref<256x32xbf16, #tpu.memory_space<vmem>>, %arg3: memref<1x32xf32, #tpu.memory_space<vmem>>, %arg4: memref<256x32xf32, #tpu.memory_space<vmem>>) attributes {dimension_semantics = [#tpu.dimension_semantics<parallel>], iteration_bounds = array<i64: 2>, scalar_prefetch = 0 : i64, scratch_operands = 0 : i64, tpu.core_type = #tpu.core_type<tc>, window_params = [{transform_indices = @transform_0, window_bounds = array<i64: 256, 256>}, {pipeline_mode = #tpu.pipeline_mode<synchronous>, transform_indices = @transform_1, window_bounds = array<i64: 256, 32>}, {pipeline_mode = #tpu.pipeline_mode<synchronous>, transform_indices = @transform_2, window_bounds = array<i64: 1, 32>}, {transform_indices = @transform_3, window_bounds = array<i64: 256, 32>}]} {
    %c0 = arith.constant 0 : index
    %c0_0 = arith.constant 0 : index
    %0 = vector.load %arg1[%c0, %c0_0] : memref<256x256xf32, #tpu.memory_space<vmem>>, vector<256x256xf32>
    %1 = arith.truncf %0 : vector<256x256xf32> to vector<256x256xbf16>
    %c0_1 = arith.constant 0 : index
    %c0_2 = arith.constant 0 : index
    %2 = vector.load %arg2[%c0_1, %c0_2] : memref<256x32xbf16, #tpu.memory_space<vmem>>, vector<256x32xbf16>
    %cst = arith.constant dense<0.000000e+00> : vector<256x32xf32>
    %3 = tpu.matmul %1, %2, %cst {dimension_numbers = #tpu.dot_dimension_numbers<[1], [0], [0], [1], [0, 0, 1, 1], [], []>} : vector<256x256xbf16>, vector<256x32xbf16>, vector<256x32xf32> -> vector<256x32xf32>
    %c0_3 = arith.constant 0 : index
    %c0_4 = arith.constant 0 : index
    %4 = vector.load %arg3[%c0_3, %c0_4] : memref<1x32xf32, #tpu.memory_space<vmem>>, vector<1x32xf32>
    %5 = vector.broadcast %4 : vector<1x32xf32> to vector<256x32xf32>
    %6 = arith.addf %3, %5 : vector<256x32xf32>
    %cst_5 = arith.constant 0.000000e+00 : f32
    %7 = vector.broadcast %cst_5 : f32 to vector<256x32xf32>
    %8 = arith.maximumf %6, %7 : vector<256x32xf32>
    %c0_6 = arith.constant 0 : index
    %c0_7 = arith.constant 0 : index
    %9 = vector.load %arg4[%c0_6, %c0_7] : memref<256x32xf32, #tpu.memory_space<vmem>>, vector<256x32xf32>
    tpu.vector_store %arg4[%c0_6, %c0_7], %8 {strides = array<i32>} : memref<256x32xf32, #tpu.memory_space<vmem>>, vector<256x32xf32>,
    return
  }
  func.func @transform_0(%arg0: i32) -> (i32, i32) {
    %c0_i32 = arith.constant 0 : i32
    %c0_i32_0 = arith.constant 0 : i32
    return %arg0, %c0_i32 : i32, i32
  }
  func.func @transform_1(%arg0: i32) -> (i32, i32) {
    %c0_i32 = arith.constant 0 : i32
    %c0_i32_0 = arith.constant 0 : i32
    %c0_i32_1 = arith.constant 0 : i32
    return %c0_i32, %c0_i32_0 : i32, i32
  }
  func.func @transform_2(%arg0: i32) -> (i32, i32) {
    %c0_i32 = arith.constant 0 : i32
    %c0_i32_0 = arith.constant 0 : i32
    %c0_i32_1 = arith.constant 0 : i32
    return %c0_i32, %c0_i32_0 : i32, i32
  }
  func.func @transform_3(%arg0: i32) -> (i32, i32) {
    %c0_i32 = arith.constant 0 : i32
    %c0_i32_0 = arith.constant 0 : i32
    return %arg0, %c0_i32 : i32, i32
  }
}

module attributes {stable_mosaic.version = 11 : i64} {
  func.func @_matmul_bias_kernel(%arg0: i32, %arg1: memref<56x512xf32, #tpu.memory_space<vmem>>, %arg2: memref<512x64xbf16, #tpu.memory_space<vmem>>, %arg3: memref<1x64xf32, #tpu.memory_space<vmem>>, %arg4: memref<56x64xf32, #tpu.memory_space<vmem>>) attributes {dimension_semantics = [#tpu.dimension_semantics<parallel>], iteration_bounds = array<i64: 1>, scalar_prefetch = 0 : i64, scratch_operands = 0 : i64, tpu.core_type = #tpu.core_type<tc>, window_params = [{transform_indices = @transform_0, window_bounds = array<i64: 56, 512>}, {pipeline_mode = #tpu.pipeline_mode<synchronous>, transform_indices = @transform_1, window_bounds = array<i64: 512, 64>}, {pipeline_mode = #tpu.pipeline_mode<synchronous>, transform_indices = @transform_2, window_bounds = array<i64: 1, 64>}, {transform_indices = @transform_3, window_bounds = array<i64: 56, 64>}]} {
    %c0 = arith.constant 0 : index
    %c0_0 = arith.constant 0 : index
    %0 = vector.load %arg1[%c0, %c0_0] : memref<56x512xf32, #tpu.memory_space<vmem>>, vector<56x512xf32>
    %1 = arith.truncf %0 : vector<56x512xf32> to vector<56x512xbf16>
    %c0_1 = arith.constant 0 : index
    %c0_2 = arith.constant 0 : index
    %2 = vector.load %arg2[%c0_1, %c0_2] : memref<512x64xbf16, #tpu.memory_space<vmem>>, vector<512x64xbf16>
    %cst = arith.constant dense<0.000000e+00> : vector<56x64xf32>
    %3 = tpu.matmul %1, %2, %cst {dimension_numbers = #tpu.dot_dimension_numbers<[1], [0], [0], [1], [0, 0, 1, 1], [], []>} : vector<56x512xbf16>, vector<512x64xbf16>, vector<56x64xf32> -> vector<56x64xf32>
    %c0_3 = arith.constant 0 : index
    %c0_4 = arith.constant 0 : index
    %4 = vector.load %arg3[%c0_3, %c0_4] : memref<1x64xf32, #tpu.memory_space<vmem>>, vector<1x64xf32>
    %5 = vector.broadcast %4 : vector<1x64xf32> to vector<56x64xf32>
    %6 = arith.addf %3, %5 : vector<56x64xf32>
    %cst_5 = arith.constant 0.000000e+00 : f32
    %7 = vector.broadcast %cst_5 : f32 to vector<56x64xf32>
    %8 = arith.maximumf %6, %7 : vector<56x64xf32>
    %c0_6 = arith.constant 0 : index
    %c0_7 = arith.constant 0 : index
    %9 = vector.load %arg4[%c0_6, %c0_7] : memref<56x64xf32, #tpu.memory_space<vmem>>, vector<56x64xf32>
    tpu.vector_store %arg4[%c0_6, %c0_7], %8 {strides = array<i32>} : memref<56x64xf32, #tpu.memory_space<vmem>>, vector<56x64xf32>,
    return
  }
  func.func @transform_0(%arg0: i32) -> (i32, i32) {
    %c0_i32 = arith.constant 0 : i32
    %c0_i32_0 = arith.constant 0 : i32
    return %arg0, %c0_i32 : i32, i32
  }
  func.func @transform_1(%arg0: i32) -> (i32, i32) {
    %c0_i32 = arith.constant 0 : i32
    %c0_i32_0 = arith.constant 0 : i32
    %c0_i32_1 = arith.constant 0 : i32
    return %c0_i32, %c0_i32_0 : i32, i32
  }
  func.func @transform_2(%arg0: i32) -> (i32, i32) {
    %c0_i32 = arith.constant 0 : i32
    %c0_i32_0 = arith.constant 0 : i32
    %c0_i32_1 = arith.constant 0 : i32
    return %c0_i32, %c0_i32_0 : i32, i32
  }
  func.func @transform_3(%arg0: i32) -> (i32, i32) {
    %c0_i32 = arith.constant 0 : i32
    %c0_i32_0 = arith.constant 0 : i32
    return %arg0, %c0_i32 : i32, i32
  }
}

module attributes {stable_mosaic.version = 11 : i64} {
  func.func @_matmul_bias_kernel(%arg0: i32, %arg1: memref<24x576xf32, #tpu.memory_space<vmem>>, %arg2: memref<576x64xbf16, #tpu.memory_space<vmem>>, %arg3: memref<1x64xf32, #tpu.memory_space<vmem>>, %arg4: memref<24x64xf32, #tpu.memory_space<vmem>>) attributes {dimension_semantics = [#tpu.dimension_semantics<parallel>], iteration_bounds = array<i64: 1>, scalar_prefetch = 0 : i64, scratch_operands = 0 : i64, tpu.core_type = #tpu.core_type<tc>, window_params = [{transform_indices = @transform_0, window_bounds = array<i64: 24, 576>}, {pipeline_mode = #tpu.pipeline_mode<synchronous>, transform_indices = @transform_1, window_bounds = array<i64: 576, 64>}, {pipeline_mode = #tpu.pipeline_mode<synchronous>, transform_indices = @transform_2, window_bounds = array<i64: 1, 64>}, {transform_indices = @transform_3, window_bounds = array<i64: 24, 64>}]} {
    %c0 = arith.constant 0 : index
    %c0_0 = arith.constant 0 : index
    %0 = vector.load %arg1[%c0, %c0_0] : memref<24x576xf32, #tpu.memory_space<vmem>>, vector<24x576xf32>
    %1 = arith.truncf %0 : vector<24x576xf32> to vector<24x576xbf16>
    %c0_1 = arith.constant 0 : index
    %c0_2 = arith.constant 0 : index
    %2 = vector.load %arg2[%c0_1, %c0_2] : memref<576x64xbf16, #tpu.memory_space<vmem>>, vector<576x64xbf16>
    %cst = arith.constant dense<0.000000e+00> : vector<24x64xf32>
    %3 = tpu.matmul %1, %2, %cst {dimension_numbers = #tpu.dot_dimension_numbers<[1], [0], [0], [1], [0, 0, 1, 1], [], []>} : vector<24x576xbf16>, vector<576x64xbf16>, vector<24x64xf32> -> vector<24x64xf32>
    %c0_3 = arith.constant 0 : index
    %c0_4 = arith.constant 0 : index
    %4 = vector.load %arg3[%c0_3, %c0_4] : memref<1x64xf32, #tpu.memory_space<vmem>>, vector<1x64xf32>
    %5 = vector.broadcast %4 : vector<1x64xf32> to vector<24x64xf32>
    %6 = arith.addf %3, %5 : vector<24x64xf32>
    %cst_5 = arith.constant 0.000000e+00 : f32
    %7 = vector.broadcast %cst_5 : f32 to vector<24x64xf32>
    %8 = arith.maximumf %6, %7 : vector<24x64xf32>
    %c0_6 = arith.constant 0 : index
    %c0_7 = arith.constant 0 : index
    %9 = vector.load %arg4[%c0_6, %c0_7] : memref<24x64xf32, #tpu.memory_space<vmem>>, vector<24x64xf32>
    tpu.vector_store %arg4[%c0_6, %c0_7], %8 {strides = array<i32>} : memref<24x64xf32, #tpu.memory_space<vmem>>, vector<24x64xf32>,
    return
  }
  func.func @transform_0(%arg0: i32) -> (i32, i32) {
    %c0_i32 = arith.constant 0 : i32
    %c0_i32_0 = arith.constant 0 : i32
    return %arg0, %c0_i32 : i32, i32
  }
  func.func @transform_1(%arg0: i32) -> (i32, i32) {
    %c0_i32 = arith.constant 0 : i32
    %c0_i32_0 = arith.constant 0 : i32
    %c0_i32_1 = arith.constant 0 : i32
    return %c0_i32, %c0_i32_0 : i32, i32
  }
  func.func @transform_2(%arg0: i32) -> (i32, i32) {
    %c0_i32 = arith.constant 0 : i32
    %c0_i32_0 = arith.constant 0 : i32
    %c0_i32_1 = arith.constant 0 : i32
    return %c0_i32, %c0_i32_0 : i32, i32
  }
  func.func @transform_3(%arg0: i32) -> (i32, i32) {
    %c0_i32 = arith.constant 0 : i32
    %c0_i32_0 = arith.constant 0 : i32
    return %arg0, %c0_i32 : i32, i32
  }
}

module attributes {stable_mosaic.version = 11 : i64} {
  func.func @_fused_noisy_fc_kernel(%arg0: i32, %arg1: memref<8x576xf32, #tpu.memory_space<vmem>>, %arg2: memref<576x512xbf16, #tpu.memory_space<vmem>>, %arg3: memref<576x512xbf16, #tpu.memory_space<vmem>>, %arg4: memref<1x576xf32, #tpu.memory_space<vmem>>, %arg5: memref<1x512xf32, #tpu.memory_space<vmem>>, %arg6: memref<1x512xf32, #tpu.memory_space<vmem>>, %arg7: memref<512x128xbf16, #tpu.memory_space<vmem>>, %arg8: memref<512x128xbf16, #tpu.memory_space<vmem>>, %arg9: memref<1x512xf32, #tpu.memory_space<vmem>>, %arg10: memref<1x128xf32, #tpu.memory_space<vmem>>, %arg11: memref<1x128xf32, #tpu.memory_space<vmem>>, %arg12: memref<8x128xf32, #tpu.memory_space<vmem>>) attributes {dimension_semantics = [#tpu.dimension_semantics<parallel>], iteration_bounds = array<i64: 1>, scalar_prefetch = 0 : i64, scratch_operands = 0 : i64, tpu.core_type = #tpu.core_type<tc>, window_params = [{transform_indices = @transform_0, window_bounds = array<i64: 8, 576>}, {pipeline_mode = #tpu.pipeline_mode<synchronous>, transform_indices = @transform_1, window_bounds = array<i64: 576, 512>}, {pipeline_mode = #tpu.pipeline_mode<synchronous>, transform_indices = @transform_2, window_bounds = array<i64: 576, 512>}, {pipeline_mode = #tpu.pipeline_mode<synchronous>, transform_indices = @transform_3, window_bounds = array<i64: 1, 576>}, {pipeline_mode = #tpu.pipeline_mode<synchronous>, transform_indices = @transform_4, window_bounds = array<i64: 1, 512>}, {pipeline_mode = #tpu.pipeline_mode<synchronous>, transform_indices = @transform_5, window_bounds = array<i64: 1, 512>}, {pipeline_mode = #tpu.pipeline_mode<synchronous>, transform_indices = @transform_6, window_bounds = array<i64: 512, 128>}, {pipeline_mode = #tpu.pipeline_mode<synchronous>, transform_indices = @transform_7, window_bounds = array<i64: 512, 128>}, {pipeline_mode = #tpu.pipeline_mode<synchronous>, transform_indices = @transform_8, window_bounds = array<i64: 1, 512>}, {pipeline_mode = #tpu.pipeline_mode<synchronous>, transform_indices = @transform_9, window_bounds = array<i64: 1, 128>}, {pipeline_mode = #tpu.pipeline_mode<synchronous>, transform_indices = @transform_10, window_bounds = array<i64: 1, 128>}, {transform_indices = @transform_11, window_bounds = array<i64: 8, 128>}]} {
    %c0 = arith.constant 0 : index
    %c0_0 = arith.constant 0 : index
    %0 = vector.load %arg1[%c0, %c0_0] : memref<8x576xf32, #tpu.memory_space<vmem>>, vector<8x576xf32>
    %1 = arith.truncf %0 : vector<8x576xf32> to vector<8x576xbf16>
    %c0_1 = arith.constant 0 : index
    %c0_2 = arith.constant 0 : index
    %2 = vector.load %arg2[%c0_1, %c0_2] : memref<576x512xbf16, #tpu.memory_space<vmem>>, vector<576x512xbf16>
    %cst = arith.constant dense<0.000000e+00> : vector<8x512xf32>
    %3 = tpu.matmul %1, %2, %cst {dimension_numbers = #tpu.dot_dimension_numbers<[1], [0], [0], [1], [0, 0, 1, 1], [], []>} : vector<8x576xbf16>, vector<576x512xbf16>, vector<8x512xf32> -> vector<8x512xf32>
    %c0_3 = arith.constant 0 : index
    %c0_4 = arith.constant 0 : index
    %4 = vector.load %arg4[%c0_3, %c0_4] : memref<1x576xf32, #tpu.memory_space<vmem>>, vector<1x576xf32>
    %5 = vector.broadcast %4 : vector<1x576xf32> to vector<8x576xf32>
    %6 = arith.mulf %0, %5 : vector<8x576xf32>
    %7 = arith.truncf %6 : vector<8x576xf32> to vector<8x576xbf16>
    %c0_5 = arith.constant 0 : index
    %c0_6 = arith.constant 0 : index
    %8 = vector.load %arg3[%c0_5, %c0_6] : memref<576x512xbf16, #tpu.memory_space<vmem>>, vector<576x512xbf16>
    %cst_7 = arith.constant dense<0.000000e+00> : vector<8x512xf32>
    %9 = tpu.matmul %7, %8, %cst_7 {dimension_numbers = #tpu.dot_dimension_numbers<[1], [0], [0], [1], [0, 0, 1, 1], [], []>} : vector<8x576xbf16>, vector<576x512xbf16>, vector<8x512xf32> -> vector<8x512xf32>
    %c0_8 = arith.constant 0 : index
    %c0_9 = arith.constant 0 : index
    %10 = vector.load %arg5[%c0_8, %c0_9] : memref<1x512xf32, #tpu.memory_space<vmem>>, vector<1x512xf32>
    %11 = vector.broadcast %10 : vector<1x512xf32> to vector<8x512xf32>
    %12 = arith.mulf %9, %11 : vector<8x512xf32>
    %13 = arith.addf %3, %12 : vector<8x512xf32>
    %c0_10 = arith.constant 0 : index
    %c0_11 = arith.constant 0 : index
    %14 = vector.load %arg6[%c0_10, %c0_11] : memref<1x512xf32, #tpu.memory_space<vmem>>, vector<1x512xf32>
    %15 = vector.broadcast %14 : vector<1x512xf32> to vector<8x512xf32>
    %16 = arith.addf %13, %15 : vector<8x512xf32>
    %cst_12 = arith.constant 0.000000e+00 : f32
    %17 = vector.broadcast %cst_12 : f32 to vector<8x512xf32>
    %18 = arith.maximumf %16, %17 : vector<8x512xf32>
    %19 = arith.truncf %18 : vector<8x512xf32> to vector<8x512xbf16>
    %c0_13 = arith.constant 0 : index
    %c0_14 = arith.constant 0 : index
    %20 = vector.load %arg7[%c0_13, %c0_14] : memref<512x128xbf16, #tpu.memory_space<vmem>>, vector<512x128xbf16>
    %cst_15 = arith.constant dense<0.000000e+00> : vector<8x128xf32>
    %21 = tpu.matmul %19, %20, %cst_15 {dimension_numbers = #tpu.dot_dimension_numbers<[1], [0], [0], [1], [0, 0, 1, 1], [], []>} : vector<8x512xbf16>, vector<512x128xbf16>, vector<8x128xf32> -> vector<8x128xf32>
    %c0_16 = arith.constant 0 : index
    %c0_17 = arith.constant 0 : index
    %22 = vector.load %arg9[%c0_16, %c0_17] : memref<1x512xf32, #tpu.memory_space<vmem>>, vector<1x512xf32>
    %23 = vector.broadcast %22 : vector<1x512xf32> to vector<8x512xf32>
    %24 = arith.mulf %18, %23 : vector<8x512xf32>
    %25 = arith.truncf %24 : vector<8x512xf32> to vector<8x512xbf16>
    %c0_18 = arith.constant 0 : index
    %c0_19 = arith.constant 0 : index
    %26 = vector.load %arg8[%c0_18, %c0_19] : memref<512x128xbf16, #tpu.memory_space<vmem>>, vector<512x128xbf16>
    %cst_20 = arith.constant dense<0.000000e+00> : vector<8x128xf32>
    %27 = tpu.matmul %25, %26, %cst_20 {dimension_numbers = #tpu.dot_dimension_numbers<[1], [0], [0], [1], [0, 0, 1, 1], [], []>} : vector<8x512xbf16>, vector<512x128xbf16>, vector<8x128xf32> -> vector<8x128xf32>
    %c0_21 = arith.constant 0 : index
    %c0_22 = arith.constant 0 : index
    %28 = vector.load %arg10[%c0_21, %c0_22] : memref<1x128xf32, #tpu.memory_space<vmem>>, vector<1x128xf32>
    %29 = vector.broadcast %28 : vector<1x128xf32> to vector<8x128xf32>
    %30 = arith.mulf %27, %29 : vector<8x128xf32>
    %31 = arith.addf %21, %30 : vector<8x128xf32>
    %c0_23 = arith.constant 0 : index
    %c0_24 = arith.constant 0 : index
    %32 = vector.load %arg11[%c0_23, %c0_24] : memref<1x128xf32, #tpu.memory_space<vmem>>, vector<1x128xf32>
    %33 = vector.broadcast %32 : vector<1x128xf32> to vector<8x128xf32>
    %34 = arith.addf %31, %33 : vector<8x128xf32>
    %c0_25 = arith.constant 0 : index
    %c0_26 = arith.constant 0 : index
    %35 = vector.load %arg12[%c0_25, %c0_26] : memref<8x128xf32, #tpu.memory_space<vmem>>, vector<8x128xf32>
    tpu.vector_store %arg12[%c0_25, %c0_26], %34 {strides = array<i32>} : memref<8x128xf32, #tpu.memory_space<vmem>>, vector<8x128xf32>,
    return
  }
  func.func @transform_0(%arg0: i32) -> (i32, i32) {
    %c0_i32 = arith.constant 0 : i32
    %c0_i32_0 = arith.constant 0 : i32
    return %arg0, %c0_i32 : i32, i32
  }
  func.func @transform_1(%arg0: i32) -> (i32, i32) {
    %c0_i32 = arith.constant 0 : i32
    %c0_i32_0 = arith.constant 0 : i32
    %c0_i32_1 = arith.constant 0 : i32
    return %c0_i32, %c0_i32_0 : i32, i32
  }
  func.func @transform_2(%arg0: i32) -> (i32, i32) {
    %c0_i32 = arith.constant 0 : i32
    %c0_i32_0 = arith.constant 0 : i32
    %c0_i32_1 = arith.constant 0 : i32
    return %c0_i32, %c0_i32_0 : i32, i32
  }
  func.func @transform_3(%arg0: i32) -> (i32, i32) {
    %c0_i32 = arith.constant 0 : i32
    %c0_i32_0 = arith.constant 0 : i32
    %c0_i32_1 = arith.constant 0 : i32
    return %c0_i32, %c0_i32_0 : i32, i32
  }
  func.func @transform_4(%arg0: i32) -> (i32, i32) {
    %c0_i32 = arith.constant 0 : i32
    %c0_i32_0 = arith.constant 0 : i32
    %c0_i32_1 = arith.constant 0 : i32
    return %c0_i32, %c0_i32_0 : i32, i32
  }
  func.func @transform_5(%arg0: i32) -> (i32, i32) {
    %c0_i32 = arith.constant 0 : i32
    %c0_i32_0 = arith.constant 0 : i32
    %c0_i32_1 = arith.constant 0 : i32
    return %c0_i32, %c0_i32_0 : i32, i32
  }
  func.func @transform_6(%arg0: i32) -> (i32, i32) {
    %c0_i32 = arith.constant 0 : i32
    %c0_i32_0 = arith.constant 0 : i32
    %c0_i32_1 = arith.constant 0 : i32
    return %c0_i32, %c0_i32_0 : i32, i32
  }
  func.func @transform_7(%arg0: i32) -> (i32, i32) {
    %c0_i32 = arith.constant 0 : i32
    %c0_i32_0 = arith.constant 0 : i32
    %c0_i32_1 = arith.constant 0 : i32
    return %c0_i32, %c0_i32_0 : i32, i32
  }
  func.func @transform_8(%arg0: i32) -> (i32, i32) {
    %c0_i32 = arith.constant 0 : i32
    %c0_i32_0 = arith.constant 0 : i32
    %c0_i32_1 = arith.constant 0 : i32
    return %c0_i32, %c0_i32_0 : i32, i32
  }
  func.func @transform_9(%arg0: i32) -> (i32, i32) {
    %c0_i32 = arith.constant 0 : i32
    %c0_i32_0 = arith.constant 0 : i32
    %c0_i32_1 = arith.constant 0 : i32
    return %c0_i32, %c0_i32_0 : i32, i32
  }
  func.func @transform_10(%arg0: i32) -> (i32, i32) {
    %c0_i32 = arith.constant 0 : i32
    %c0_i32_0 = arith.constant 0 : i32
    %c0_i32_1 = arith.constant 0 : i32
    return %c0_i32, %c0_i32_0 : i32, i32
  }
  func.func @transform_11(%arg0: i32) -> (i32, i32) {
    %c0_i32 = arith.constant 0 : i32
    %c0_i32_0 = arith.constant 0 : i32
    return %arg0, %c0_i32 : i32, i32
  }
}

</mosaic_0001>

<bundles_post_ra>
// kernel: dqn_noisy_forward.4
= control target key start
LH: loop header
LB: loop body
LE: loop exit
PB: predicated region body
PF: predicated region fallthrough
CT: control target
= control target key end

     0   :  { %8 = vsyncpa [#allocation3], 0  ;;  %s1664_s0 = inlined_call_operand.hbm [shape: f32[288,256], index: 0, kind: input, shape index: {}]   ;;  %s1665_s1 = inlined_call_operand.hbm [shape: bf16[256,32], index: 1, kind: input, shape index: {}]   ;;  %s1666_s2 = inlined_call_operand.hbm [shape: f32[1,32], index: 2, kind: input, shape index: {}]   ;;  %s1667_s3 = inlined_call_operand.hbm [shape: f32[288,32], index: 3, kind: output, shape index: {}]  }
   0x1   :  { %10 = vsyncpa [#allocation3 + $0x1], 0 }
   0x2   :  { %11 = vsyncpa [#allocation6], 0 }
   0x3   :  { %12 = vsyncpa [#allocation4], 0 }
   0x4   :  { %14 = vsyncpa [#allocation4 + $0x1], 0  ;;  %s1250_s12 = smov 0   ;;  %s1252_s13 = smov 0  }
   0x5   :  { %s1254_s14 = smov 0   ;;  %s1256_s15 = smov 0  }
   0x6 LB: > { %s1271_s16 = sadd.s32 4294967295, %s1218_s15   ;;  %s805_s17 = sadd.s32 4294967294, %s1218_s15   ;;  %s1218_s15 = sphi %s1256_s15, %s1687_s15   ;;  %s1214_s14 = sphi %s1254_s14, %s1686_s14   ;;  %s1210_s13 = sphi %s1252_s13, %s1685_s13   ;;  %s1206_s12 = sphi %s1250_s12, %s1684_s12  }
   0x7   : > { %s1275_s18 = sadd.s32 1, %s1218_s15   ;;  %s27_s19 = sadd.s32 1, %s1214_s14 }
   0x8   : > { %s24_s20 = ssub.s32 %s1218_s15, %s1275_s18  ;;  %p34_p0 = scmp.ne.s32.totalorder %s1214_s14, %s1210_s13 }
   0x9   : > { %p25_p1 = scmp.eq.s32.totalorder %s24_s20, 0  ;;  %p35_p2 = scmp.eq.s32.totalorder %s1218_s15, 0 }
   0xa   : > { %p40_p3 = scmp.ne.s32.totalorder %s1210_s13, %s1206_s12  ;;  %p1668_p4 = scmp.eq.s32.totalorder %s1271_s16, 0 }
   0xb   : > { %s1287_s21 = scalar_select %p25_p1, %s1214_s14, %s27_s19  }
   0xc   : > { %p1289_p5 = por %p35_p2, %p34_p0  ;;  %p1295_p6 = por %p1668_p4, %p40_p3 }
   0xd   : > { %p106_p7 = scmp.eq.s32.totalorder %s1271_s16, 1  ;;  %p112_p8 = scmp.eq.s32.totalorder %s805_s17, 1 }
   0xe   : > { %s1671_s22 = scalar_select %p1289_p5, 1, 0 }
   0xf   : > { %s1672_s23 = scalar_select %p1295_p6, 1, 0 }
  0x10   : > { %p806_p9 = scmp.ge.s32.totalorder %s1218_s15, 1  ;;  %p119_p10 = scmp.lt.s32.totalorder %s1218_s15, 3 }
  0x11   : > { %p1302_p11 = por %p106_p7, %p34_p0  ;;  %p1306_p12 = por %p112_p8, %p40_p3 }
  0x12   : > { %p1310_p13 = pnand %p806_p9, %p119_p10  ;;  %s1220_s27 = smov [#allocation5]  }
  0x13   : > { %s1673_s24 = scalar_select %p1302_p11, 1, 0 }
  0x14   : > { %s1674_s25 = scalar_select %p1306_p12, 1, 0 }
  0x15   : > { %s1675_s26 = scalar_select %p1310_p13, 1, 0 }
  0x16   : > { %p992_p1 = pneg %p1310_p13  ;;  %s131_s28 = sshll.u32 %s1220_s27, 4  ;;  %s132_s28 = int_to_ptr.vmem [resolvable:$true] %s131_s28 }
  0x17   : > { %s1221_s30 = smov [#allocation7]   ;;  %s1064_s7 = scalar_lea.hbm %s1665_s1, 2048 }
  0x18   : > { %p1318_p2 = pnand %p992_p1, %p1668_p4  ;;  %s145_s4 = sshll.u32 %s1221_s30, 4  ;;  %s1322_s4 = int_to_ptr.vmem [resolvable:$true] %s145_s4 }
  0x19   : > { %p1065_p0 = scmp.ne.s32.totalorder %s1665_s1, %s1064_s7  ;;  %p1071_p9 = scmp.lt.u32.totalorder %s1064_s7, %s1665_s1 }
  0x1a   : > { %p1066_p3 = pneg %p1318_p2 }
  0x1c   : > { %p1067_p7 = pnand %p1066_p3, %p1065_p0 }
  0x1e   : > { %p1068_p8 = pneg %p1067_p7 }
  0x20   : > { %p1073_p10 = pnand %p1071_p9, %p1068_p8 }
  0x22   : > { %1076 = shalt.err (!%p1073_p10)
}
  0x23   : > { %s1077_s17 = scalar_lea.vmem %s132_s28, 2048  ;;  %p1085_p11 = scmp.lt.s32.totalorder %s132_s28, %s132_s28 }
  0x24   : > { %p1078_p1 = scmp.ne.s32.totalorder %s132_s28, %s1077_s17  ;;  %p1086_p6 = scmp.lt.s32.totalorder %s1077_s17, %s1077_s17 }
  0x26   : > { %p1080_p4 = pnand %p1078_p1, %p1066_p3  ;;  %p1087_p13 = por %p1086_p6, %p1085_p11 }
  0x28   : > { %p1081_p12 = pneg %p1080_p4 }
  0x2a   : > { %p1088_p5 = pnand %p1087_p13, %p1081_p12 }
  0x2c   : > { %1091 = shalt.err (!%p1088_p5)
}
  0x2d   : > { %s1222_s19 = smov 64   ;;  %s1223_s20 = smov 4  }
  0x2e   : > { %995 = dma.hbm_to_vmem [thread:$0]  (!%p1318_p2), %s1665_s1, 2048, %s132_s28, [#allocation6], %s1222_s19, %s1222_s19, %s1223_s20  }
  0x2f   : > { %s1092_s7 = scalar_lea.hbm %s1666_s2, 16 }
  0x30   : > { %p1093_p4 = scmp.ne.s32.totalorder %s1666_s2, %s1092_s7  ;;  %p1099_p11 = scmp.lt.u32.totalorder %s1092_s7, %s1666_s2 }
  0x32   : > { %p1095_p5 = pnand %p1093_p4, %p1066_p3 }
  0x34   : > { %p1096_p6 = pneg %p1095_p5 }
  0x36   : > { %p1101_p12 = pnand %p1099_p11, %p1096_p6 }
  0x38   : > { %1104 = shalt.err (!%p1101_p12)
}
  0x39   : > { %s1105_s28 = scalar_lea.vmem %s1322_s4, 16  ;;  %s1112_s17 = scalar_lea.vmem %s1322_s4, 32 }
  0x3a   : > { %p1106_p13 = scmp.ne.s32.totalorder %s1322_s4, %s1105_s28  ;;  %p1113_p8 = scmp.lt.s32.totalorder %s1322_s4, %s1322_s4 }
  0x3b   : > { %p1114_p9 = scmp.lt.s32.totalorder %s1112_s17, %s1105_s28 }
  0x3c   : > { %p1108_p0 = pnand %p1106_p13, %p1066_p3 }
  0x3d   : > { %p1115_p10 = por %p1114_p9, %p1113_p8 }
  0x3e   : > { %p1109_p7 = pneg %p1108_p0 }
  0x40   : > { %p1116_p1 = pnand %p1115_p10, %p1109_p7 }
  0x42   : > { %1119 = shalt.err (!%p1116_p1)
}
  0x43   : > { %998 = dma.hbm_to_vmem [thread:$0]  (!%p1318_p2), %s1666_s2, 16, %s1322_s4, [#allocation6]  }
  0x44   : > { %p809_p4 = scmp.ge.s32.totalorder %s1218_s15, 2 }
  0x45   : > { %p1677_p3 = scmp.ne.s32.totalorder (!%p809_p4), %s1671_s22, 0 }
  0x46   : > { %152 = sbr.rel (%p809_p4) target bundleno = 112 (0x70), region = 24 }
  0x4d   : > { %155 = sbr.rel (!%p1677_p3) target bundleno = 112 (0x70), region = 28  ;;  %s156_s27 = sand.u32 (%p1677_p3), 1, %s1214_s14  }
  0x4e   : > { %s811_s30 = sshll.u32 (%p1677_p3), %s1218_s15, 5  ;;  %s810_s5 = sshll.u32 (%p1677_p3), %s156_s27, 9 }
  0x4f   : > { %s162_s6 = ssub.s32 (%p1677_p3), 36, %s811_s30  ;;  %s1382_s7 = scalar_lea.sflag (%p1677_p3), [#allocation3], %s156_s27 }
  0x50   : > { %p163_p5 = scmp.lt.s32.totalorder (%p1677_p3), %s162_s6, 32  ;;  %s160_s8 = scalar_lea.vmem (%p1677_p3), [#allocation2], %s810_s5 }
  0x54   : > { %s1689_s6 = smov (!%p163_p5, %s162_s6), 32 }
  0x55   : > { %s1379_s29 = sshll.u32 %s1689_s6, 8 }
  0x56   : > { %s168_s4 = ssub.s32 8192, %s1379_s29 }
  0x57   : > { %169 = vsyncadd %s1382_s7, %s168_s4  ;;  %p814_p2 = scmp.ne.s32.totalorder %s1379_s29, 0  ;;  %s852_s22 = sshll.u32 %s1218_s15, 13 }
  0x58   : > { %s1390_s11 = scalar_lea.hbm %s1664_s0, %s852_s22  ;;  %s175_s28 = sshll.u32 %s160_s8, 4  ;;  %s1392_s28 = int_to_ptr.vmem [resolvable:$true] %s175_s28 }
  0x59   : > { %s1120_s17 = scalar_lea.hbm %s1390_s11, %s1379_s29  ;;  %s1124_s27 = scalar_lea.hbm %s1664_s0, 9216 }
  0x5a   : > { %p1121_p6 = scmp.ne.s32.totalorder %s1390_s11, %s1120_s17  ;;  %p1125_p13 = scmp.lt.u32.totalorder %s1390_s11, %s1664_s0 }
  0x5b   : > { %p1126_p0 = scmp.lt.u32.totalorder %s1124_s27, %s1120_s17  ;;  %p1128_p8 = scmp.lt.u32.totalorder %s1120_s17, %s1390_s11 }
  0x5c   : > { %p1122_p11 = pnand %p1121_p6, %p814_p2 }
  0x5d   : > { %p1127_p7 = por %p1126_p0, %p1125_p13 }
  0x5e   : > { %p1123_p12 = pneg %p1122_p11 }
  0x5f   : > { %p1129_p9 = por %p1128_p8, %p1127_p7 }
  0x61   : > { %p1130_p10 = pnand %p1129_p9, %p1123_p12 }
  0x63   : > { %1133 = shalt.err (!%p1130_p10)
}
  0x64   : > { %s1134_s6 = scalar_lea.vmem %s1392_s28, %s1379_s29  ;;  %s1224_s4 = smov [#allocation2]  }
  0x65   : > { %p1135_p1 = scmp.ne.s32.totalorder %s1392_s28, %s1134_s6  ;;  %s1138_s8 = sshll.u32 %s1224_s4, 4  ;;  %s1139_s8 = int_to_ptr.vmem [resolvable:$false] %s1138_s8 }
  0x66   : > { %s1140_s22 = scalar_lea.vmem %s1139_s8, 16384  ;;  %p1141_p6 = scmp.lt.s32.totalorder %s1392_s28, %s1139_s8 }
  0x67   : > { %p1136_p3 = pnand %p1135_p1, %p814_p2  ;;  %p1142_p11 = scmp.lt.s32.totalorder %s1140_s22, %s1134_s6 }
  0x69   : > { %p1137_p5 = pneg %p1136_p3  ;;  %p1143_p13 = por %p1142_p11, %p1141_p6 }
  0x6b   : > { %p1144_p0 = pnand %p1143_p13, %p1137_p5 }
  0x6d   : > { %1147 = shalt.err (!%p1144_p0)
}
  0x6e   : > { %s1225_s9 = smov 256   ;;  %s1226_s10 = smov 16  }
  0x6f   : > { %181 = dma.hbm_to_vmem [thread:$0]  (%p814_p2), %s1390_s11, %s1379_s29, %s1392_s28, %s1382_s7, %s1225_s9, %s1225_s9, %s1226_s10  }
  0x70 PF: > { %p1678_p12 = scmp.ne.s32.totalorder %s1675_s26, 0 }
  0x71   : > { %s1422_s17 = sand.u32 (!%p1678_p12), 1, %s1210_s13   ;;  %p1679_p7 = scmp.ne.s32.totalorder (!%p1678_p12), %s1672_s23, 0 }
  0x72   : > { %187 = sbr.rel (%p1678_p12) target bundleno = 464 (0x1d0), region = 32  ;;  %s820_s19 = sshll.u32 (!%p1678_p12), %s1422_s17, 9 }
  0x73   : > { %s190_s20 = scalar_lea.sflag (!%p1678_p12), [#allocation3], %s1422_s17  ;;  %s1426_s27 = scalar_lea.vmem (!%p1678_p12), [#allocation2], %s820_s19 }
  0x79   : > { %1193 = dma.done.wait (%p1679_p7), %s190_s20, 8192  }
  0x7a   : > { %1195 = vsyncadd (%p1679_p7), %s190_s20, 4294959104  ;;  %p1680_p2 = scmp.eq.s32.totalorder %s1271_s16, 0 }
  0x7c   : > { %1197 = dma.done.wait (%p1680_p2), [#allocation6], 2064   ;;  %p1681_p8 = pmov %p1680_p2 }
  0x7d   : > { %v1048_v0 = vld [vmem:[#allocation5 + $0x40] sm:$0xff]   ;;  %v1050_v2 = vld [vmem:[#allocation5 + $0x48] sm:$0xff]   ;;  %v1052_v4 = vld [vmem:[#allocation5 + $0x50] sm:$0xff]   ;;  %s823_s23 = sshll.u32 %s1422_s17, 8  ;;  %vm660_vm0 = vcmask 261120   ;;  %s694_s29 = scalar_lea.sflag [#allocation4], %s1422_s17 }
  0x7e   : > { %1199 = vsyncadd (%p1681_p8), [#allocation6], 4294965232  ;;  %v1049_v1 = vld [vmem:[#allocation5] sm:$0xff]   ;;  %854 = vmatprep.subr.bf16.mxu0 %v1048_v0  ;;  %966 = vmatprep.subr.bf16.mxu1 %v1048_v0  ;;  %v1051_v3 = vld [vmem:[#allocation5 + $0x8] sm:$0xff]   ;;  %s1507_s26 = scalar_lea.vmem [#allocation8], %s823_s23  ;;  %p1682_p9 = scmp.ne.s32.totalorder %s1673_s24, 0 }
  0x7f   : > { %855 = vmatpush3.bf16.msra.mxu0 %v1049_v1  ;;  %974 = vmatpush3.bf16.msra.mxu1 %v1049_v1  ;;  %v1053_v5 = vld [vmem:[#allocation5 + $0x10] sm:$0xff]   ;;  %v1054_v6 = vld [vmem:[#allocation5 + $0x58] sm:$0xff]   ;;  %v1056_v8 = vld [vmem:[#allocation5 + $0x60] sm:$0xff]   ;;  %s842_s7 = sshll.u32 (%p1682_p9), %s1271_s16, 5 }
  0x80   : > { %856 = vmatprep.subr.bf16.mxu0 %v1050_v2  ;;  %967 = vmatprep.subr.bf16.mxu1 %v1050_v2  ;;  %v1055_v7 = vld [vmem:[#allocation5 + $0x18] sm:$0xff]   ;;  %v1057_v9 = vld [vmem:[#allocation5 + $0x20] sm:$0xff]   ;;  %v1058_v10 = vld [vmem:[#allocation5 + $0x68] sm:$0xff]   ;;  %s702_s11 = ssub.s32 (%p1682_p9), 36, %s842_s7 }
  0x81   : > { %v237_v11 = vld [vmem:[%s1426_s27 + $0x8] sm:$0xff]  ;;  %v239_v12 = vld [vmem:[%s1426_s27 + $0x18] sm:$0xff]  ;;  %v1060_v18 = vld [vmem:[#allocation5 + $0x70] sm:$0xff]   ;;  %p703_p10 = scmp.lt.s32.totalorder (%p1682_p9), %s702_s11, 32 }
  0x82   : > { %v269_v13 = vld [vmem:[%s1426_s27 + $0x108] sm:$0xff]  ;;  %v301_v14 = vpack.c.bf16 %v239_v12, %v237_v11  ;;  %v271_v15 = vld [vmem:[%s1426_s27 + $0x118] sm:$0xff]  ;;  %v1061_v19 = vld [vmem:[#allocation5 + $0x30] sm:$0xff]  }
  0x83   : > { %857 = vmatpush3.bf16.msra.mxu0 %v1051_v3  ;;  %975 = vmatpush3.bf16.msra.mxu1 %v1051_v3  ;;  %v317_v16 = vpack.c.bf16 %v271_v15, %v269_v13  ;;  %v1059_v17 = vld [vmem:[#allocation5 + $0x28] sm:$0xff]   ;;  %v1062_v20 = vld [vmem:[#allocation5 + $0x78] sm:$0xff]   ;;  %v236_v22 = vld [vmem:[%s1426_s27] sm:$0xff] }
  0x84   : > { %858 = vmatprep.subr.bf16.mxu0 %v1052_v4  ;;  %968 = vmatprep.subr.bf16.mxu1 %v1052_v4  ;;  %v1063_v21 = vld [vmem:[#allocation5 + $0x38] sm:$0xff]   ;;  %v238_v23 = vld [vmem:[%s1426_s27 + $0x10] sm:$0xff]  ;;  %v268_v24 = vld [vmem:[%s1426_s27 + $0x100] sm:$0xff] }
  0x85   : > { %499 = vmatprep.mubr.bf16.mxu0 %v301_v14  ;;  %563 = vmatprep.mubr.bf16.mxu1 %v317_v16  ;;  %v270_v25 = vld [vmem:[%s1426_s27 + $0x110] sm:$0xff]  ;;  %v241_v26 = vld [vmem:[%s1426_s27 + $0x28] sm:$0xff]  ;;  %v243_v27 = vld [vmem:[%s1426_s27 + $0x38] sm:$0xff]  ;;  %v300_v30 = vpack.c.bf16 %v238_v23, %v236_v22 }
  0x86   : > { %v273_v28 = vld [vmem:[%s1426_s27 + $0x128] sm:$0xff]  ;;  %v275_v29 = vld [vmem:[%s1426_s27 + $0x138] sm:$0xff]  ;;  %v316_v31 = vpack.c.bf16 %v270_v25, %v268_v24  ;;  %v303_v32 = vpack.c.bf16 %v243_v27, %v241_v26  ;;  %v240_v34 = vld [vmem:[%s1426_s27 + $0x20] sm:$0xff] }
  0x87   : > { %859 = vmatpush3.bf16.msra.mxu0 %v1053_v5  ;;  %976 = vmatpush3.bf16.msra.mxu1 %v1053_v5  ;;  %v319_v33 = vpack.c.bf16 %v275_v29, %v273_v28  ;;  %v242_v35 = vld [vmem:[%s1426_s27 + $0x30] sm:$0xff]  ;;  %v272_v36 = vld [vmem:[%s1426_s27 + $0x120] sm:$0xff]  ;;  %v245_v38 = vld [vmem:[%s1426_s27 + $0x48] sm:$0xff] }
  0x88   : > { %860 = vmatprep.subr.bf16.mxu0 %v1054_v6  ;;  %969 = vmatprep.subr.bf16.mxu1 %v1054_v6  ;;  %v274_v37 = vld [vmem:[%s1426_s27 + $0x130] sm:$0xff]  ;;  %v247_v39 = vld [vmem:[%s1426_s27 + $0x58] sm:$0xff]  ;;  %v277_v40 = vld [vmem:[%s1426_s27 + $0x148] sm:$0xff]  ;;  %v302_v42 = vpack.c.bf16 %v242_v35, %v240_v34 }
  0x89   : > { %v279_v41 = vld [vmem:[%s1426_s27 + $0x158] sm:$0xff]  ;;  %v318_v43 = vpack.c.bf16 %v274_v37, %v272_v36  ;;  %v305_v44 = vpack.c.bf16 %v247_v39, %v245_v38  ;;  %v244_v46 = vld [vmem:[%s1426_s27 + $0x40] sm:$0xff]  ;;  %v246_v47 = vld [vmem:[%s1426_s27 + $0x50] sm:$0xff] }
  0x8a   : > { %v321_v45 = vpack.c.bf16 %v279_v41, %v277_v40  ;;  %v276_v48 = vld [vmem:[%s1426_s27 + $0x140] sm:$0xff]  ;;  %v278_v49 = vld [vmem:[%s1426_s27 + $0x150] sm:$0xff]  ;;  %v249_v50 = vld [vmem:[%s1426_s27 + $0x68] sm:$0xff]  ;;  %v304_v54 = vpack.c.bf16 %v246_v47, %v244_v46 }
  0x8b   : > { %861 = vmatpush3.bf16.msra.mxu0 %v1055_v7  ;;  %977 = vmatpush3.bf16.msra.mxu1 %v1055_v7  ;;  %v251_v51 = vld [vmem:[%s1426_s27 + $0x78] sm:$0xff]  ;;  %v281_v52 = vld [vmem:[%s1426_s27 + $0x168] sm:$0xff]  ;;  %v320_v55 = vpack.c.bf16 %v278_v49, %v276_v48  ;;  %v248_v58 = vld [vmem:[%s1426_s27 + $0x60] sm:$0xff] }
  0x8c   : > { %862 = vmatprep.subr.bf16.mxu0 %v1056_v8  ;;  %970 = vmatprep.subr.bf16.mxu1 %v1056_v8  ;;  %v283_v53 = vld [vmem:[%s1426_s27 + $0x178] sm:$0xff]  ;;  %v307_v56 = vpack.c.bf16 %v251_v51, %v249_v50  ;;  %v250_v59 = vld [vmem:[%s1426_s27 + $0x70] sm:$0xff]  ;;  %v280_v60 = vld [vmem:[%s1426_s27 + $0x160] sm:$0xff] }
  0x8d   : > { %v323_v57 = vpack.c.bf16 %v283_v53, %v281_v52  ;;  %v282_v61 = vld [vmem:[%s1426_s27 + $0x170] sm:$0xff]  ;;  %v253_v62 = vld [vmem:[%s1426_s27 + $0x88] sm:$0xff]  ;;  %v255_v63 = vld [vmem:[%s1426_s27 + $0x98] sm:$0xff]  ;;  %v306_v2 = vpack.c.bf16 %v250_v59, %v248_v58 }
  0x8e   : > { %v285_v0 = vld [vmem:[%s1426_s27 + $0x188] sm:$0xff]  ;;  %v287_v1 = vld [vmem:[%s1426_s27 + $0x198] sm:$0xff]  ;;  %v322_v3 = vpack.c.bf16 %v282_v61, %v280_v60  ;;  %v309_v4 = vpack.c.bf16 %v255_v63, %v253_v62  ;;  %v252_v6 = vld [vmem:[%s1426_s27 + $0x80] sm:$0xff] }
  0x8f   : > { %863 = vmatpush3.bf16.msra.mxu0 %v1057_v9  ;;  %978 = vmatpush3.bf16.msra.mxu1 %v1057_v9  ;;  %v325_v5 = vpack.c.bf16 %v287_v1, %v285_v0  ;;  %v254_v7 = vld [vmem:[%s1426_s27 + $0x90] sm:$0xff]  ;;  %v284_v8 = vld [vmem:[%s1426_s27 + $0x180] sm:$0xff]  ;;  %v259_v11 = vld [vmem:[%s1426_s27 + $0xb8] sm:$0xff] }
  0x90   : > { %864 = vmatprep.subr.bf16.mxu0 %v1058_v10  ;;  %971 = vmatprep.subr.bf16.mxu1 %v1058_v10  ;;  %v286_v9 = vld [vmem:[%s1426_s27 + $0x190] sm:$0xff]  ;;  %v257_v10 = vld [vmem:[%s1426_s27 + $0xa8] sm:$0xff]  ;;  %v291_v13 = vld [vmem:[%s1426_s27 + $0x1b8] sm:$0xff]  ;;  %v308_v14 = vpack.c.bf16 %v254_v7, %v252_v6 }
  0x91   : > { %v289_v12 = vld [vmem:[%s1426_s27 + $0x1a8] sm:$0xff]  ;;  %v324_v15 = vpack.c.bf16 %v286_v9, %v284_v8  ;;  %v311_v16 = vpack.c.bf16 %v259_v11, %v257_v10  ;;  %v263_v23 = vld [vmem:[%s1426_s27 + $0xd8] sm:$0xff]  ;;  %v1500_v50 = vld [vmem:[#allocation7] ss:$0 sm:$0xff] }
  0x92   : > { %v261_v22 = vld [vmem:[%s1426_s27 + $0xc8] sm:$0xff]  ;;  %v295_v25 = vld [vmem:[%s1426_s27 + $0x1d8] sm:$0xff] }
  0x93   : > { %865 = vmatpush3.bf16.msra.mxu0 %v1059_v17  ;;  %979 = vmatpush3.bf16.msra.mxu1 %v1059_v17  ;;  %v327_v17 = vpack.c.bf16 %v291_v13, %v289_v12  ;;  %v293_v24 = vld [vmem:[%s1426_s27 + $0x1c8] sm:$0xff]  ;;  %v313_v28 = vpack.c.bf16 %v263_v23, %v261_v22  ;;  %v267_v35 = vld [vmem:[%s1426_s27 + $0xf8] sm:$0xff] }
  0x94   : > { %866 = vmatprep.subr.bf16.mxu0 %v1060_v18  ;;  %972 = vmatprep.subr.bf16.mxu1 %v1060_v18  ;;  %v256_v18 = vld [vmem:[%s1426_s27 + $0xa0] sm:$0xff]  ;;  %v329_v29 = vpack.c.bf16 %v295_v25, %v293_v24  ;;  %v265_v34 = vld [vmem:[%s1426_s27 + $0xe8] sm:$0xff]  ;;  %v299_v37 = vld [vmem:[%s1426_s27 + $0x1f8] sm:$0xff] }
  0x95   : > { %v297_v36 = vld [vmem:[%s1426_s27 + $0x1e8] sm:$0xff]  ;;  %v315_v40 = vpack.c.bf16 %v267_v35, %v265_v34 }
  0x96   : > { %v331_v41 = vpack.c.bf16 %v299_v37, %v297_v36 }
  0x97   : > { %867 = vmatpush3.bf16.msra.mxu0 %v1061_v19  ;;  %980 = vmatpush3.bf16.msra.mxu1 %v1061_v19  ;;  %v258_v19 = vld [vmem:[%s1426_s27 + $0xb0] sm:$0xff] }
  0x98   : > { %868 = vmatprep.subr.bf16.mxu0 %v1062_v20  ;;  %973 = vmatprep.subr.bf16.mxu1 %v1062_v20  ;;  %v288_v20 = vld [vmem:[%s1426_s27 + $0x1a0] sm:$0xff]  ;;  %v310_v26 = vpack.c.bf16 %v258_v19, %v256_v18 }
  0x9b   : > { %869 = vmatpush3.bf16.msra.mxu0 %v1063_v21  ;;  %981 = vmatpush3.bf16.msra.mxu1 %v1063_v21  ;;  %v290_v21 = vld [vmem:[%s1426_s27 + $0x1b0] sm:$0xff] }
  0x9c   : > { %v326_v27 = vpack.c.bf16 %v290_v21, %v288_v20 }
  0x9e   : > { %500 = vmatmul.mubr.bf16.vlgmr.msra.gmra.mrb[0].mxu0 %v300_v30  ;;  %564 = vmatmul.mubr.bf16.vlgmr.msra.gmra.mrb[0].mxu1 %v316_v31  ;;  %v260_v30 = vld [vmem:[%s1426_s27 + $0xc0] sm:$0xff]  ;;  %v262_v31 = vld [vmem:[%s1426_s27 + $0xd0] sm:$0xff] }
  0x9f   : > { %507 = vmatprep.mubr.bf16.mxu0 %v303_v32  ;;  %571 = vmatprep.mubr.bf16.mxu1 %v319_v33  ;;  %v292_v32 = vld [vmem:[%s1426_s27 + $0x1c0] sm:$0xff]  ;;  %v294_v33 = vld [vmem:[%s1426_s27 + $0x1d0] sm:$0xff]  ;;  %v312_v38 = vpack.c.bf16 %v262_v31, %v260_v30 }
  0xa0   : > { %v328_v39 = vpack.c.bf16 %v294_v33, %v292_v32 }
  0xa6   : > { %508 = vmatmul.mubr.bf16.gmra.mrb[4].mxu0 %v302_v42  ;;  %572 = vmatmul.mubr.bf16.gmra.mrb[4].mxu1 %v318_v43  ;;  %v264_v42 = vld [vmem:[%s1426_s27 + $0xe0] sm:$0xff]  ;;  %v266_v43 = vld [vmem:[%s1426_s27 + $0xf0] sm:$0xff] }
  0xa7   : > { %515 = vmatprep.mubr.bf16.mxu0 %v305_v44  ;;  %579 = vmatprep.mubr.bf16.mxu1 %v321_v45  ;;  %v296_v44 = vld [vmem:[%s1426_s27 + $0x1e0] sm:$0xff]  ;;  %v298_v45 = vld [vmem:[%s1426_s27 + $0x1f0] sm:$0xff]  ;;  %v314_v46 = vpack.c.bf16 %v266_v43, %v264_v42 }
  0xa8   : > { %v330_v47 = vpack.c.bf16 %v298_v45, %v296_v44 }
  0xae   : > { %516 = vmatmul.mubr.bf16.gmra.mrb[8].mxu0 %v304_v54  ;;  %580 = vmatmul.mubr.bf16.gmra.mrb[8].mxu1 %v320_v55 }
  0xaf   : > { %523 = vmatprep.mubr.bf16.mxu0 %v307_v56  ;;  %587 = vmatprep.mubr.bf16.mxu1 %v323_v57 }
  0xb6   : > { %524 = vmatmul.mubr.bf16.gmra.mrb[12].mxu0 %v306_v2  ;;  %588 = vmatmul.mubr.bf16.gmra.mrb[12].mxu1 %v322_v3 }
  0xb7   : > { %531 = vmatprep.mubr.bf16.mxu0 %v309_v4  ;;  %595 = vmatprep.mubr.bf16.mxu1 %v325_v5 }
  0xbe   : > { %532 = vmatmul.mubr.bf16.gmra.mrb[16].mxu0 %v308_v14  ;;  %596 = vmatmul.mubr.bf16.gmra.mrb[16].mxu1 %v324_v15 }
  0xbf   : > { %539 = vmatprep.mubr.bf16.mxu0 %v311_v16  ;;  %603 = vmatprep.mubr.bf16.mxu1 %v327_v17 }
  0xc6   : > { %540 = vmatmul.mubr.bf16.gmra.mrb[20].mxu0 %v310_v26  ;;  %604 = vmatmul.mubr.bf16.gmra.mrb[20].mxu1 %v326_v27 }
  0xc7   : > { %547 = vmatprep.mubr.bf16.mxu0 %v313_v28  ;;  %611 = vmatprep.mubr.bf16.mxu1 %v329_v29 }
  0xce   : > { %548 = vmatmul.mubr.bf16.gmra.mrb[24].mxu0 %v312_v38  ;;  %612 = vmatmul.mubr.bf16.gmra.mrb[24].mxu1 %v328_v39 }
  0xcf   : > { %555 = vmatprep.mubr.bf16.mxu0 %v315_v40  ;;  %619 = vmatprep.mubr.bf16.mxu1 %v331_v41 }
  0xd6   : > { %556 = vmatmul.mubr.bf16.gmra.mrb[28].mxu0 %v314_v46  ;;  %620 = vmatmul.mubr.bf16.gmra.mrb[28].mxu1 %v330_v47 }
 0x171   : > { %v870_v48 = vpop.f32.mrb[0].mxu0  ;;  %v918_v49 = vpop.f32.mrb[0].mxu1 }
 0x172   : > { %v871_v51 = vpop.f32.mrb[1].mxu0  ;;  %v919_v52 = vpop.f32.mrb[1].mxu1 }
 0x173   : > { %v872_v53 = vadd.f32 %v871_v51, %v870_v48  ;;  %v920_v54 = vadd.f32 %v919_v52, %v918_v49  ;;  %v873_v55 = vpop.f32.mrb[2].mxu0  ;;  %v921_v56 = vpop.f32.mrb[2].mxu1 }
 0x174   : > { %v874_v57 = vpop.f32.mrb[3].mxu0  ;;  %v922_v58 = vpop.f32.mrb[3].mxu1 }
 0x175   : > { %v502_v59 = vadd.f32 %v872_v53, %v1500_v50  ;;  %v566_v60 = vadd.f32 %v920_v54, %v1500_v50  ;;  %v875_v61 = vadd.f32 %v874_v57, %v873_v55  ;;  %v923_v62 = vadd.f32 %v922_v58, %v921_v56 }
 0x177   : > { %v628_v63 = vmax.f32 %v502_v59, 0.0  ;;  %v644_v0 = vmax.f32 %v566_v60, 0.0  ;;  %v505_v1 = vadd.f32 %v875_v61, %v1500_v50  ;;  %v569_v2 = vadd.f32 %v923_v62, %v1500_v50 }
 0x179   : > { %661 = vst.msk [vmem:[%s1507_s26] sm:$0xff] %vm660_vm0, %v628_v63  ;;  %677 = vst.msk [vmem:[%s1507_s26 + $0x80] sm:$0xff] %vm660_vm0, %v644_v0  ;;  %v629_v3 = vmax.f32 %v505_v1, 0.0  ;;  %v645_v4 = vmax.f32 %v569_v2, 0.0  ;;  %v876_v5 = vpop.f32.mrb[4].mxu0  ;;  %v924_v6 = vpop.f32.mrb[4].mxu1 }
 0x17a   : > { %v877_v7 = vpop.f32.mrb[5].mxu0  ;;  %v925_v8 = vpop.f32.mrb[5].mxu1 }
 0x17b   : > { %662 = vst.msk [vmem:[%s1507_s26 + $0x8] sm:$0xff] %vm660_vm0, %v629_v3  ;;  %678 = vst.msk [vmem:[%s1507_s26 + $0x88] sm:$0xff] %vm660_vm0, %v645_v4  ;;  %v878_v9 = vadd.f32 %v877_v7, %v876_v5  ;;  %v926_v10 = vadd.f32 %v925_v8, %v924_v6  ;;  %v879_v11 = vpop.f32.mrb[6].mxu0  ;;  %v927_v12 = vpop.f32.mrb[6].mxu1 }
 0x17c   : > { %v880_v13 = vpop.f32.mrb[7].mxu0  ;;  %v928_v14 = vpop.f32.mrb[7].mxu1 }
 0x17d   : > { %v510_v15 = vadd.f32 %v878_v9, %v1500_v50  ;;  %v574_v16 = vadd.f32 %v926_v10, %v1500_v50  ;;  %v881_v17 = vadd.f32 %v880_v13, %v879_v11  ;;  %v929_v18 = vadd.f32 %v928_v14, %v927_v12 }
 0x17f   : > { %v630_v19 = vmax.f32 %v510_v15, 0.0  ;;  %v646_v20 = vmax.f32 %v574_v16, 0.0  ;;  %v513_v21 = vadd.f32 %v881_v17, %v1500_v50  ;;  %v577_v22 = vadd.f32 %v929_v18, %v1500_v50 }
 0x181   : > { %663 = vst.msk [vmem:[%s1507_s26 + $0x10] sm:$0xff] %vm660_vm0, %v630_v19  ;;  %679 = vst.msk [vmem:[%s1507_s26 + $0x90] sm:$0xff] %vm660_vm0, %v646_v20  ;;  %v631_v23 = vmax.f32 %v513_v21, 0.0  ;;  %v647_v24 = vmax.f32 %v577_v22, 0.0  ;;  %v882_v25 = vpop.f32.mrb[8].mxu0  ;;  %v930_v26 = vpop.f32.mrb[8].mxu1 }
 0x182   : > { %v883_v27 = vpop.f32.mrb[9].mxu0  ;;  %v931_v28 = vpop.f32.mrb[9].mxu1 }
 0x183   : > { %664 = vst.msk [vmem:[%s1507_s26 + $0x18] sm:$0xff] %vm660_vm0, %v631_v23  ;;  %680 = vst.msk [vmem:[%s1507_s26 + $0x98] sm:$0xff] %vm660_vm0, %v647_v24  ;;  %v884_v29 = vadd.f32 %v883_v27, %v882_v25  ;;  %v932_v30 = vadd.f32 %v931_v28, %v930_v26  ;;  %v885_v31 = vpop.f32.mrb[10].mxu0  ;;  %v933_v32 = vpop.f32.mrb[10].mxu1 }
 0x184   : > { %v886_v33 = vpop.f32.mrb[11].mxu0  ;;  %v934_v34 = vpop.f32.mrb[11].mxu1 }
 0x185   : > { %v518_v35 = vadd.f32 %v884_v29, %v1500_v50  ;;  %v582_v36 = vadd.f32 %v932_v30, %v1500_v50  ;;  %v887_v37 = vadd.f32 %v886_v33, %v885_v31  ;;  %v935_v38 = vadd.f32 %v934_v34, %v933_v32 }
 0x187   : > { %v632_v39 = vmax.f32 %v518_v35, 0.0  ;;  %v648_v40 = vmax.f32 %v582_v36, 0.0  ;;  %v521_v41 = vadd.f32 %v887_v37, %v1500_v50  ;;  %v585_v42 = vadd.f32 %v935_v38, %v1500_v50 }
 0x189   : > { %665 = vst.msk [vmem:[%s1507_s26 + $0x20] sm:$0xff] %vm660_vm0, %v632_v39  ;;  %681 = vst.msk [vmem:[%s1507_s26 + $0xa0] sm:$0xff] %vm660_vm0, %v648_v40  ;;  %v633_v43 = vmax.f32 %v521_v41, 0.0  ;;  %v649_v44 = vmax.f32 %v585_v42, 0.0  ;;  %v888_v45 = vpop.f32.mrb[12].mxu0  ;;  %v936_v46 = vpop.f32.mrb[12].mxu1 }
 0x18a   : > { %v889_v47 = vpop.f32.mrb[13].mxu0  ;;  %v937_v48 = vpop.f32.mrb[13].mxu1 }
 0x18b   : > { %666 = vst.msk [vmem:[%s1507_s26 + $0x28] sm:$0xff] %vm660_vm0, %v633_v43  ;;  %682 = vst.msk [vmem:[%s1507_s26 + $0xa8] sm:$0xff] %vm660_vm0, %v649_v44  ;;  %v890_v49 = vadd.f32 %v889_v47, %v888_v45  ;;  %v938_v51 = vadd.f32 %v937_v48, %v936_v46  ;;  %v891_v52 = vpop.f32.mrb[14].mxu0  ;;  %v939_v53 = vpop.f32.mrb[14].mxu1 }
 0x18c   : > { %v892_v54 = vpop.f32.mrb[15].mxu0  ;;  %v940_v55 = vpop.f32.mrb[15].mxu1 }
 0x18d   : > { %v526_v56 = vadd.f32 %v890_v49, %v1500_v50  ;;  %v590_v57 = vadd.f32 %v938_v51, %v1500_v50  ;;  %v893_v58 = vadd.f32 %v892_v54, %v891_v52  ;;  %v941_v59 = vadd.f32 %v940_v55, %v939_v53 }
 0x18f   : > { %v634_v60 = vmax.f32 %v526_v56, 0.0  ;;  %v650_v61 = vmax.f32 %v590_v57, 0.0  ;;  %v529_v62 = vadd.f32 %v893_v58, %v1500_v50  ;;  %v593_v63 = vadd.f32 %v941_v59, %v1500_v50 }
 0x191   : > { %667 = vst.msk [vmem:[%s1507_s26 + $0x30] sm:$0xff] %vm660_vm0, %v634_v60  ;;  %683 = vst.msk [vmem:[%s1507_s26 + $0xb0] sm:$0xff] %vm660_vm0, %v650_v61  ;;  %v635_v0 = vmax.f32 %v529_v62, 0.0  ;;  %v651_v1 = vmax.f32 %v593_v63, 0.0  ;;  %v894_v2 = vpop.f32.mrb[16].mxu0  ;;  %v942_v3 = vpop.f32.mrb[16].mxu1 }
 0x192   : > { %v895_v4 = vpop.f32.mrb[17].mxu0  ;;  %v943_v5 = vpop.f32.mrb[17].mxu1 }
 0x193   : > { %668 = vst.msk [vmem:[%s1507_s26 + $0x38] sm:$0xff] %vm660_vm0, %v635_v0  ;;  %684 = vst.msk [vmem:[%s1507_s26 + $0xb8] sm:$0xff] %vm660_vm0, %v651_v1  ;;  %v896_v6 = vadd.f32 %v895_v4, %v894_v2  ;;  %v944_v7 = vadd.f32 %v943_v5, %v942_v3  ;;  %v897_v8 = vpop.f32.mrb[18].mxu0  ;;  %v945_v9 = vpop.f32.mrb[18].mxu1 }
 0x194   : > { %v898_v10 = vpop.f32.mrb[19].mxu0  ;;  %v946_v11 = vpop.f32.mrb[19].mxu1 }
 0x195   : > { %v534_v12 = vadd.f32 %v896_v6, %v1500_v50  ;;  %v598_v13 = vadd.f32 %v944_v7, %v1500_v50  ;;  %v899_v14 = vadd.f32 %v898_v10, %v897_v8  ;;  %v947_v15 = vadd.f32 %v946_v11, %v945_v9 }
 0x197   : > { %v636_v16 = vmax.f32 %v534_v12, 0.0  ;;  %v652_v17 = vmax.f32 %v598_v13, 0.0  ;;  %v537_v18 = vadd.f32 %v899_v14, %v1500_v50  ;;  %v601_v19 = vadd.f32 %v947_v15, %v1500_v50 }
 0x199   : > { %669 = vst.msk [vmem:[%s1507_s26 + $0x40] sm:$0xff] %vm660_vm0, %v636_v16  ;;  %685 = vst.msk [vmem:[%s1507_s26 + $0xc0] sm:$0xff] %vm660_vm0, %v652_v17  ;;  %v637_v20 = vmax.f32 %v537_v18, 0.0  ;;  %v653_v21 = vmax.f32 %v601_v19, 0.0  ;;  %v900_v22 = vpop.f32.mrb[20].mxu0  ;;  %v948_v23 = vpop.f32.mrb[20].mxu1 }
 0x19a   : > { %v901_v24 = vpop.f32.mrb[21].mxu0  ;;  %v949_v25 = vpop.f32.mrb[21].mxu1 }
 0x19b   : > { %670 = vst.msk [vmem:[%s1507_s26 + $0x48] sm:$0xff] %vm660_vm0, %v637_v20  ;;  %686 = vst.msk [vmem:[%s1507_s26 + $0xc8] sm:$0xff] %vm660_vm0, %v653_v21  ;;  %v902_v26 = vadd.f32 %v901_v24, %v900_v22  ;;  %v950_v27 = vadd.f32 %v949_v25, %v948_v23  ;;  %v903_v28 = vpop.f32.mrb[22].mxu0  ;;  %v951_v29 = vpop.f32.mrb[22].mxu1 }
 0x19c   : > { %v904_v30 = vpop.f32.mrb[23].mxu0  ;;  %v952_v31 = vpop.f32.mrb[23].mxu1 }
 0x19d   : > { %v542_v32 = vadd.f32 %v902_v26, %v1500_v50  ;;  %v606_v33 = vadd.f32 %v950_v27, %v1500_v50  ;;  %v905_v34 = vadd.f32 %v904_v30, %v903_v28  ;;  %v953_v35 = vadd.f32 %v952_v31, %v951_v29 }
 0x19f   : > { %v638_v36 = vmax.f32 %v542_v32, 0.0  ;;  %v654_v37 = vmax.f32 %v606_v33, 0.0  ;;  %v545_v38 = vadd.f32 %v905_v34, %v1500_v50  ;;  %v609_v39 = vadd.f32 %v953_v35, %v1500_v50 }
 0x1a1   : > { %671 = vst.msk [vmem:[%s1507_s26 + $0x50] sm:$0xff] %vm660_vm0, %v638_v36  ;;  %687 = vst.msk [vmem:[%s1507_s26 + $0xd0] sm:$0xff] %vm660_vm0, %v654_v37  ;;  %v639_v40 = vmax.f32 %v545_v38, 0.0  ;;  %v655_v41 = vmax.f32 %v609_v39, 0.0  ;;  %v906_v42 = vpop.f32.mrb[24].mxu0  ;;  %v954_v43 = vpop.f32.mrb[24].mxu1 }
 0x1a2   : > { %v907_v44 = vpop.f32.mrb[25].mxu0  ;;  %v955_v45 = vpop.f32.mrb[25].mxu1 }
 0x1a3   : > { %672 = vst.msk [vmem:[%s1507_s26 + $0x58] sm:$0xff] %vm660_vm0, %v639_v40  ;;  %688 = vst.msk [vmem:[%s1507_s26 + $0xd8] sm:$0xff] %vm660_vm0, %v655_v41  ;;  %v908_v46 = vadd.f32 %v907_v44, %v906_v42  ;;  %v956_v47 = vadd.f32 %v955_v45, %v954_v43  ;;  %v909_v48 = vpop.f32.mrb[26].mxu0  ;;  %v957_v49 = vpop.f32.mrb[26].mxu1 }
 0x1a4   : > { %v910_v51 = vpop.f32.mrb[27].mxu0  ;;  %v958_v52 = vpop.f32.mrb[27].mxu1 }
 0x1a5   : > { %v550_v53 = vadd.f32 %v908_v46, %v1500_v50  ;;  %v614_v54 = vadd.f32 %v956_v47, %v1500_v50  ;;  %v911_v55 = vadd.f32 %v910_v51, %v909_v48  ;;  %v959_v56 = vadd.f32 %v958_v52, %v957_v49 }
 0x1a7   : > { %v640_v57 = vmax.f32 %v550_v53, 0.0  ;;  %v656_v58 = vmax.f32 %v614_v54, 0.0  ;;  %v553_v59 = vadd.f32 %v911_v55, %v1500_v50  ;;  %v617_v60 = vadd.f32 %v959_v56, %v1500_v50 }
 0x1a9   : > { %673 = vst.msk [vmem:[%s1507_s26 + $0x60] sm:$0xff] %vm660_vm0, %v640_v57  ;;  %689 = vst.msk [vmem:[%s1507_s26 + $0xe0] sm:$0xff] %vm660_vm0, %v656_v58  ;;  %v641_v61 = vmax.f32 %v553_v59, 0.0  ;;  %v657_v62 = vmax.f32 %v617_v60, 0.0  ;;  %v912_v63 = vpop.f32.mrb[28].mxu0  ;;  %v960_v0 = vpop.f32.mrb[28].mxu1 }
 0x1aa   : > { %v913_v1 = vpop.f32.mrb[29].mxu0  ;;  %v961_v2 = vpop.f32.mrb[29].mxu1 }
 0x1ab   : > { %674 = vst.msk [vmem:[%s1507_s26 + $0x68] sm:$0xff] %vm660_vm0, %v641_v61  ;;  %690 = vst.msk [vmem:[%s1507_s26 + $0xe8] sm:$0xff] %vm660_vm0, %v657_v62  ;;  %v914_v3 = vadd.f32 %v913_v1, %v912_v63  ;;  %v962_v4 = vadd.f32 %v961_v2, %v960_v0  ;;  %v915_v5 = vpop.f32.mrb[30].mxu0  ;;  %v963_v6 = vpop.f32.mrb[30].mxu1 }
 0x1ac   : > { %v916_v7 = vpop.f32.mrb[31].mxu0  ;;  %v964_v8 = vpop.f32.mrb[31].mxu1 }
 0x1ad   : > { %v558_v9 = vadd.f32 %v914_v3, %v1500_v50  ;;  %v622_v10 = vadd.f32 %v962_v4, %v1500_v50  ;;  %v917_v11 = vadd.f32 %v916_v7, %v915_v5  ;;  %v965_v12 = vadd.f32 %v964_v8, %v963_v6  ;;  %700 = sbr.rel (!%p1682_p9) target bundleno = 464 (0x1d0), region = 48 }
 0x1af   : > { %v642_v13 = vmax.f32 %v558_v9, 0.0  ;;  %v658_v14 = vmax.f32 %v622_v10, 0.0  ;;  %v561_v15 = vadd.f32 %v917_v11, %v1500_v50  ;;  %v625_v16 = vadd.f32 %v965_v12, %v1500_v50 }
 0x1b1   : > { %675 = vst.msk [vmem:[%s1507_s26 + $0x70] sm:$0xff] %vm660_vm0, %v642_v13  ;;  %691 = vst.msk [vmem:[%s1507_s26 + $0xf0] sm:$0xff] %vm660_vm0, %v658_v14  ;;  %v643_v17 = vmax.f32 %v561_v15, 0.0  ;;  %v659_v18 = vmax.f32 %v625_v16, 0.0 }
 0x1b3   : > { %676 = vst.msk [vmem:[%s1507_s26 + $0x78] sm:$0xff] %vm660_vm0, %v643_v17  ;;  %692 = vst.msk [vmem:[%s1507_s26 + $0xf8] sm:$0xff] %vm660_vm0, %v659_v18 }
 0x1b4   : > { %s1691_s11 = smov (!%p703_p10, %s702_s11), 32 }
 0x1b5   : > { %s1605_s28 = sshll.u32 %s1691_s11, 7 }
 0x1b6   : > { %s707_s30 = ssub.s32 4096, %s1605_s28 }
 0x1b7   : > { %708 = vsyncadd %s694_s29, %s707_s30  ;;  %p844_p1 = scmp.ne.s32.totalorder %s1605_s28, 0  ;;  %s853_s24 = sshll.u32 %s1271_s16, 12 }
 0x1b8   : > { %s1615_s4 = scalar_lea.hbm %s1667_s3, %s853_s24  ;;  %s713_s8 = sshll.u32 %s1507_s26, 4  ;;  %s1618_s8 = int_to_ptr.vmem [resolvable:$true] %s713_s8 }
 0x1b9   : > { %s1148_s22 = scalar_lea.vmem %s1618_s8, %s1605_s28  ;;  %s1227_s9 = smov [#allocation8]  }
 0x1ba   : > { %p1149_p3 = scmp.ne.s32.totalorder %s1618_s8, %s1148_s22  ;;  %s1152_s10 = sshll.u32 %s1227_s9, 4  ;;  %s1153_s10 = int_to_ptr.vmem [resolvable:$false] %s1152_s10 }
 0x1bb   : > { %s1154_s16 = scalar_lea.vmem %s1153_s10, 8192  ;;  %p1155_p11 = scmp.lt.s32.totalorder %s1618_s8, %s1153_s10 }
 0x1bc   : > { %p1150_p5 = pnand %p1149_p3, %p844_p1  ;;  %p1156_p13 = scmp.lt.s32.totalorder %s1154_s16, %s1148_s22 }
 0x1be   : > { %p1151_p6 = pneg %p1150_p5  ;;  %p1157_p0 = por %p1156_p13, %p1155_p11 }
 0x1c0   : > { %p1158_p12 = pnand %p1157_p0, %p1151_p6 }
 0x1c2   : > { %1161 = shalt.err (!%p1158_p12)
}
 0x1c3   : > { %s1162_s19 = scalar_lea.hbm %s1615_s4, %s1605_s28  ;;  %s1166_s23 = scalar_lea.hbm %s1667_s3, 4608 }
 0x1c4   : > { %p1163_p7 = scmp.ne.s32.totalorder %s1615_s4, %s1162_s19  ;;  %p1167_p9 = scmp.lt.u32.totalorder %s1615_s4, %s1667_s3 }
 0x1c5   : > { %p1168_p10 = scmp.lt.u32.totalorder %s1166_s23, %s1162_s19  ;;  %p1170_p5 = scmp.lt.u32.totalorder %s1162_s19, %s1615_s4 }
 0x1c6   : > { %p1164_p2 = pnand %p1163_p7, %p844_p1 }
 0x1c7   : > { %p1169_p3 = por %p1168_p10, %p1167_p9 }
 0x1c8   : > { %p1165_p8 = pneg %p1164_p2 }
 0x1c9   : > { %p1171_p6 = por %p1170_p5, %p1169_p3 }
 0x1cb   : > { %p1172_p11 = pnand %p1171_p6, %p1165_p8 }
 0x1cd   : > { %1175 = shalt.err (!%p1172_p11)
}
 0x1ce   : > { %s1228_s11 = smov 128   ;;  %s1229_s30 = smov 8  }
 0x1cf   : > { %719 = dma.vmem_to_hbm [thread:$0]  (%p844_p1), %s1618_s8, %s1605_s28, %s1615_s4, %s694_s29, %s1228_s11, %s1228_s11, %s1229_s30  }
 0x1d0 PF: > { %s728_s24 = sand.u32 1, %s1206_s12   ;;  %p1683_p13 = scmp.ne.s32.totalorder %s1674_s25, 0 }
 0x1d1   : > { %s729_s5 = scalar_lea.sflag [#allocation4], %s728_s24 }
 0x1d2   : > { %p1000_p0 = pnand %p809_p4, %p1683_p13 }
 0x1d4   : > { %1201 = dma.done.wait (!%p1000_p0), %s729_s5, 4096  }
 0x1d5   : > { %1203 = vsyncadd (!%p1000_p0), %s729_s5, 4294963200  ;;  %p17_p12 = scmp.ge.s32.totalorder %s1275_s18, 4   ;;  %s1684_s12 = smov %s1210_s13 }
 0x1d6   : > { %s1685_s13 = smov %s1214_s14  ;;  %s1686_s14 = smov %s1287_s21 }
 0x1d7   : > { %s1687_s15 = smov %s1275_s18  ;;  %19 = sbr.rel (!%p17_p12) target bundleno = 6 (0x6), region = 85 }
 0x1de   :  { %734 = vsyncpa [#allocation3], 1 }
 0x1df   :  { %736 = vsyncpa [#allocation3 + $0x1], 1 }
 0x1e0   :  { %737 = vsyncpa [#allocation6], 1 }
 0x1e1   :  { %738 = vsyncpa [#allocation4], 1 }
 0x1e2   :  { %740 = vsyncpa [#allocation4 + $0x1], 1 }

// kernel: dqn_noisy_forward.5
= control target key start
LH: loop header
LB: loop body
LE: loop exit
PB: predicated region body
PF: predicated region fallthrough
CT: control target
= control target key end

     0   :  { %8 = vsyncpa [#allocation3], 0  ;;  %s866_s0 = inlined_call_operand.hbm [shape: f32[56,512], index: 0, kind: input, shape index: {}]   ;;  %s867_s1 = inlined_call_operand.hbm [shape: bf16[512,64], index: 1, kind: input, shape index: {}]   ;;  %s868_s2 = inlined_call_operand.hbm [shape: f32[1,64], index: 2, kind: input, shape index: {}]   ;;  %s869_s3 = inlined_call_operand.hbm [shape: f32[56,64], index: 3, kind: output, shape index: {}]  }
   0x1   :  { %9 = vsyncpa [#allocation6], 0 }
   0x2   :  { %10 = vsyncpa [#allocation4], 0  ;;  %s772_s12 = smov [#allocation5]   ;;  %s678_s16 = scalar_lea.hbm %s867_s1, 4096 }
   0x3   :  { %s28_s13 = sshll.u32 %s772_s12, 4  ;;  %p679_p0 = scmp.ne.s32.totalorder %s867_s1, %s678_s16  ;;  %s29_s13 = int_to_ptr.vmem [resolvable:$true] %s28_s13 }
   0x4   :  { %p682_p1 = scmp.lt.u32.totalorder %s678_s16, %s867_s1 }
   0x6   :  { %p684_p2 = pnand %p682_p1, %p679_p0 }
   0x8   :  { %687 = shalt.err (!%p684_p2)
}
   0x9   :  { %s688_s21 = scalar_lea.vmem %s29_s13, 4096  ;;  %p693_p4 = scmp.lt.s32.totalorder %s29_s13, %s29_s13 }
   0xa   :  { %p689_p3 = scmp.ne.s32.totalorder %s29_s13, %s688_s21  ;;  %p694_p5 = scmp.lt.s32.totalorder %s688_s21, %s688_s21 }
   0xc   :  { %p695_p6 = por %p694_p5, %p693_p4 }
   0xe   :  { %p696_p7 = pnand %p695_p6, %p689_p3 }
  0x10   :  { %699 = shalt.err (!%p696_p7)
}
  0x11   :  { %s773_s22 = smov 64   ;;  %s774_s23 = smov 4  }
  0x12   :  { %34 = dma.hbm_to_vmem [thread:$0]  %s867_s1, 4096, %s29_s13, [#allocation6], %s773_s22, %s773_s22, %s774_s23  }
  0x13   :  { %s775_s26 = smov [#allocation2]   ;;  %s700_s30 = scalar_lea.hbm %s866_s0, 3584 }
  0x14   :  { %s16_s27 = sshll.u32 %s775_s26, 4  ;;  %p701_p8 = scmp.ne.s32.totalorder %s866_s0, %s700_s30  ;;  %s17_s27 = int_to_ptr.vmem [resolvable:$true] %s16_s27 }
  0x15   :  { %p704_p9 = scmp.lt.u32.totalorder %s700_s30, %s866_s0 }
  0x17   :  { %p706_p10 = pnand %p704_p9, %p701_p8 }
  0x19   :  { %709 = shalt.err (!%p706_p10)
}
  0x1a   :  { %s710_s8 = scalar_lea.vmem %s17_s27, 3584  ;;  %p715_p12 = scmp.lt.s32.totalorder %s17_s27, %s17_s27 }
  0x1b   :  { %p711_p11 = scmp.ne.s32.totalorder %s17_s27, %s710_s8  ;;  %p716_p13 = scmp.lt.s32.totalorder %s710_s8, %s710_s8 }
  0x1d   :  { %p717_p0 = por %p716_p13, %p715_p12 }
  0x1f   :  { %p718_p1 = pnand %p717_p0, %p711_p11 }
  0x21   :  { %721 = shalt.err (!%p718_p1)
}
  0x22   :  { %s776_s1 = smov 512   ;;  %s777_s9 = smov 32  }
  0x23   :  { %22 = dma.hbm_to_vmem [thread:$0]  %s866_s0, 3584, %s17_s27, [#allocation3], %s776_s1, %s776_s1, %s777_s9  }
  0x24   :  { %s778_s12 = smov [#allocation7]   ;;  %s722_s16 = scalar_lea.hbm %s868_s2, 16 }
  0x25   :  { %s41_s13 = sshll.u32 %s778_s12, 4  ;;  %p723_p2 = scmp.ne.s32.totalorder %s868_s2, %s722_s16  ;;  %s42_s13 = int_to_ptr.vmem [resolvable:$true] %s41_s13 }
  0x26   :  { %p726_p3 = scmp.lt.u32.totalorder %s722_s16, %s868_s2 }
  0x28   :  { %p728_p4 = pnand %p726_p3, %p723_p2 }
  0x2a   :  { %731 = shalt.err (!%p728_p4)
}
  0x2b   :  { %s732_s21 = scalar_lea.vmem %s42_s13, 16  ;;  %s736_s0 = scalar_lea.vmem %s42_s13, 32 }
  0x2c   :  { %p733_p5 = scmp.ne.s32.totalorder %s42_s13, %s732_s21  ;;  %p737_p6 = scmp.lt.s32.totalorder %s42_s13, %s42_s13 }
  0x2d   :  { %p738_p7 = scmp.lt.s32.totalorder %s736_s0, %s732_s21 }
  0x2f   :  { %p739_p8 = por %p738_p7, %p737_p6 }
  0x31   :  { %p740_p9 = pnand %p739_p8, %p733_p5 }
  0x33   :  { %743 = shalt.err (!%p740_p9)
}
  0x34   :  { %44 = dma.hbm_to_vmem [thread:$0]  %s868_s2, 16, %s42_s13, [#allocation6]  }
  0x35   :  { %766 = dma.done.wait [#allocation3], 3584  }
  0x36   :  { %767 = vsyncadd [#allocation3], 4294963712 }
  0x37   :  { %768 = dma.done.wait [#allocation6], 4112  }
  0x38   :  { %769 = vsyncadd [#allocation6], 4294963184  ;;  %v646_v0 = vld [vmem:[#allocation5 + $0x40] sm:$0xff]   ;;  %v650_v4 = vld [vmem:[#allocation5 + $0x48] sm:$0xff]   ;;  %vm497_vm0 = vcmask 523264   ;;  %s779_s2 = smov [#allocation8]  }
  0x39   :  { %v647_v1 = vld [vmem:[#allocation5 + $0xc0] sm:$0xff]   ;;  %556 = vmatprep.subr.bf16.mxu0 %v646_v0  ;;  %v651_v5 = vld [vmem:[#allocation5 + $0xc8] sm:$0xff]   ;;  %v654_v8 = vld [vmem:[#allocation5 + $0x50] sm:$0xff]   ;;  %s510_s24 = sshll.u32 %s779_s2, 4  ;;  %s511_s24 = int_to_ptr.vmem [resolvable:$true] %s510_s24 }
  0x3a   :  { %v648_v2 = vld [vmem:[#allocation5] sm:$0xff]   ;;  %596 = vmatprep.subr.bf16.mxu1 %v647_v1  ;;  %v652_v6 = vld [vmem:[#allocation5 + $0x8] sm:$0xff]   ;;  %v655_v9 = vld [vmem:[#allocation5 + $0xd0] sm:$0xff]   ;;  %s744_s25 = scalar_lea.vmem %s511_s24, 896  ;;  %p749_p11 = scmp.lt.s32.totalorder %s511_s24, %s511_s24 }
  0x3b   :  { %v649_v3 = vld [vmem:[#allocation5 + $0x80] sm:$0xff]   ;;  %557 = vmatpush3.bf16.msra.mxu0 %v648_v2  ;;  %v653_v7 = vld [vmem:[#allocation5 + $0x88] sm:$0xff]   ;;  %v656_v10 = vld [vmem:[#allocation5 + $0x10] sm:$0xff]   ;;  %p745_p10 = scmp.ne.s32.totalorder %s511_s24, %s744_s25  ;;  %p750_p12 = scmp.lt.s32.totalorder %s744_s25, %s744_s25 }
  0x3c   :  { %597 = vmatpush3.bf16.msra.mxu1 %v649_v3  ;;  %558 = vmatprep.subr.bf16.mxu0 %v650_v4  ;;  %v657_v11 = vld [vmem:[#allocation5 + $0x90] sm:$0xff]   ;;  %v658_v12 = vld [vmem:[#allocation5 + $0x58] sm:$0xff]   ;;  %v662_v16 = vld [vmem:[#allocation5 + $0x60] sm:$0xff]  }
  0x3d   :  { %598 = vmatprep.subr.bf16.mxu1 %v651_v5  ;;  %v659_v13 = vld [vmem:[#allocation5 + $0xd8] sm:$0xff]   ;;  %v663_v17 = vld [vmem:[#allocation5 + $0xe0] sm:$0xff]   ;;  %v666_v20 = vld [vmem:[#allocation5 + $0x68] sm:$0xff]   ;;  %p751_p13 = por %p750_p12, %p749_p11 }
  0x3e   :  { %v660_v14 = vld [vmem:[#allocation5 + $0x18] sm:$0xff]   ;;  %v664_v18 = vld [vmem:[#allocation5 + $0x20] sm:$0xff]   ;;  %v667_v21 = vld [vmem:[#allocation5 + $0xe8] sm:$0xff]  }
  0x3f   :  { %559 = vmatpush3.bf16.msra.mxu0 %v652_v6  ;;  %v661_v15 = vld [vmem:[#allocation5 + $0x98] sm:$0xff]   ;;  %v665_v19 = vld [vmem:[#allocation5 + $0xa0] sm:$0xff]   ;;  %v668_v22 = vld [vmem:[#allocation5 + $0x28] sm:$0xff]   ;;  %p752_p0 = pnand %p751_p13, %p745_p10 }
  0x40   :  { %599 = vmatpush3.bf16.msra.mxu1 %v653_v7  ;;  %560 = vmatprep.subr.bf16.mxu0 %v654_v8  ;;  %v669_v23 = vld [vmem:[#allocation5 + $0xa8] sm:$0xff]   ;;  %v670_v24 = vld [vmem:[#allocation5 + $0x70] sm:$0xff]   ;;  %v674_v28 = vld [vmem:[#allocation5 + $0x78] sm:$0xff]  }
  0x41   :  { %600 = vmatprep.subr.bf16.mxu1 %v655_v9  ;;  %v671_v25 = vld [vmem:[#allocation5 + $0xf0] sm:$0xff]   ;;  %v675_v29 = vld [vmem:[#allocation5 + $0xf8] sm:$0xff]   ;;  %v56_v32 = vld [vmem:[#allocation2 + $0x8] sm:$0xff] }
  0x42   :  { %v672_v26 = vld [vmem:[#allocation5 + $0x30] sm:$0xff]   ;;  %v676_v30 = vld [vmem:[#allocation5 + $0x38] sm:$0xff]   ;;  %v60_v33 = vld [vmem:[#allocation2 + $0x28] sm:$0xff] }
  0x43   :  { %561 = vmatpush3.bf16.msra.mxu0 %v656_v10  ;;  %v673_v27 = vld [vmem:[#allocation5 + $0xb0] sm:$0xff]   ;;  %v677_v31 = vld [vmem:[#allocation5 + $0xb8] sm:$0xff]   ;;  %v84_v35 = vpack.c.bf16 %v60_v33, %v56_v32  ;;  %v55_v37 = vld [vmem:[#allocation2] sm:$0xff] }
  0x44   :  { %601 = vmatpush3.bf16.msra.mxu1 %v657_v11  ;;  %562 = vmatprep.subr.bf16.mxu0 %v658_v12  ;;  %v58_v34 = vld [vmem:[#allocation2 + $0x18] sm:$0xff]  ;;  %v59_v38 = vld [vmem:[#allocation2 + $0x20] sm:$0xff]  ;;  %v57_v41 = vld [vmem:[#allocation2 + $0x10] sm:$0xff] }
  0x45   :  { %602 = vmatprep.subr.bf16.mxu1 %v659_v13  ;;  %v62_v36 = vld [vmem:[#allocation2 + $0x38] sm:$0xff]  ;;  %v83_v40 = vpack.c.bf16 %v59_v38, %v55_v37  ;;  %v61_v42 = vld [vmem:[#allocation2 + $0x30] sm:$0xff]  ;;  %v64_v43 = vld [vmem:[#allocation2 + $0x48] sm:$0xff]  ;;  %394 = vmatprep.mubr.bf16.mxu0 %v84_v35 }
  0x46   :  { %v86_v39 = vpack.c.bf16 %v62_v36, %v58_v34  ;;  %v85_v44 = vpack.c.bf16 %v61_v42, %v57_v41  ;;  %v68_v45 = vld [vmem:[#allocation2 + $0x68] sm:$0xff]  ;;  %v66_v46 = vld [vmem:[#allocation2 + $0x58] sm:$0xff]  ;;  %v63_v50 = vld [vmem:[#allocation2 + $0x40] sm:$0xff] }
  0x47   :  { %563 = vmatpush3.bf16.msra.mxu0 %v660_v14  ;;  %v70_v47 = vld [vmem:[#allocation2 + $0x78] sm:$0xff]  ;;  %v88_v48 = vpack.c.bf16 %v68_v45, %v64_v43  ;;  %v67_v51 = vld [vmem:[#allocation2 + $0x60] sm:$0xff]  ;;  %v65_v52 = vld [vmem:[#allocation2 + $0x50] sm:$0xff] }
  0x48   :  { %603 = vmatpush3.bf16.msra.mxu1 %v661_v15  ;;  %564 = vmatprep.subr.bf16.mxu0 %v662_v16  ;;  %v90_v49 = vpack.c.bf16 %v70_v47, %v66_v46  ;;  %v69_v53 = vld [vmem:[#allocation2 + $0x70] sm:$0xff]  ;;  %v72_v54 = vld [vmem:[#allocation2 + $0x88] sm:$0xff]  ;;  %v74_v56 = vld [vmem:[#allocation2 + $0x98] sm:$0xff]  ;;  %v87_v58 = vpack.c.bf16 %v67_v51, %v63_v50 }
  0x49   :  { %604 = vmatprep.subr.bf16.mxu1 %v663_v17  ;;  %458 = vmatprep.mubr.bf16.mxu1 %v86_v39  ;;  %v76_v55 = vld [vmem:[#allocation2 + $0xa8] sm:$0xff]  ;;  %v78_v57 = vld [vmem:[#allocation2 + $0xb8] sm:$0xff]  ;;  %v89_v59 = vpack.c.bf16 %v69_v53, %v65_v52  ;;  %v71_v62 = vld [vmem:[#allocation2 + $0x80] sm:$0xff] }
  0x4a   :  { %v92_v60 = vpack.c.bf16 %v76_v55, %v72_v54  ;;  %v94_v61 = vpack.c.bf16 %v78_v57, %v74_v56  ;;  %v75_v63 = vld [vmem:[#allocation2 + $0xa0] sm:$0xff]  ;;  %v73_v0 = vld [vmem:[#allocation2 + $0x90] sm:$0xff]  ;;  %v80_v2 = vld [vmem:[#allocation2 + $0xc8] sm:$0xff] }
  0x4b   :  { %565 = vmatpush3.bf16.msra.mxu0 %v664_v18  ;;  %v77_v1 = vld [vmem:[#allocation2 + $0xb0] sm:$0xff]  ;;  %v82_v3 = vld [vmem:[#allocation2 + $0xd8] sm:$0xff]  ;;  %v91_v4 = vpack.c.bf16 %v75_v63, %v71_v62  ;;  %v96_v6 = vpack.c.bf16 %v80_v2, %v80_v2  ;;  %v79_v8 = vld [vmem:[#allocation2 + $0xc0] sm:$0xff] }
  0x4c   :  { %605 = vmatpush3.bf16.msra.mxu1 %v665_v19  ;;  %566 = vmatprep.subr.bf16.mxu0 %v666_v20  ;;  %v93_v5 = vpack.c.bf16 %v77_v1, %v73_v0  ;;  %v98_v7 = vpack.c.bf16 %v82_v3, %v82_v3  ;;  %v81_v9 = vld [vmem:[#allocation2 + $0xd0] sm:$0xff]  ;;  %v95_v10 = vpack.c.bf16 %v79_v8, %v79_v8  ;;  %v838_v14 = vld [vmem:[#allocation7] ss:$0 sm:$0xff] }
  0x4d   :  { %606 = vmatprep.subr.bf16.mxu1 %v667_v21  ;;  %v97_v11 = vpack.c.bf16 %v81_v9, %v81_v9 }
  0x4f   :  { %567 = vmatpush3.bf16.msra.mxu0 %v668_v22 }
  0x50   :  { %607 = vmatpush3.bf16.msra.mxu1 %v669_v23  ;;  %568 = vmatprep.subr.bf16.mxu0 %v670_v24 }
  0x51   :  { %608 = vmatprep.subr.bf16.mxu1 %v671_v25 }
  0x53   :  { %569 = vmatpush3.bf16.msra.mxu0 %v672_v26 }
  0x54   :  { %609 = vmatpush3.bf16.msra.mxu1 %v673_v27  ;;  %570 = vmatprep.subr.bf16.mxu0 %v674_v28 }
  0x55   :  { %610 = vmatprep.subr.bf16.mxu1 %v675_v29 }
  0x57   :  { %571 = vmatpush3.bf16.msra.mxu0 %v676_v30 }
  0x58   :  { %611 = vmatpush3.bf16.msra.mxu1 %v677_v31 }
  0x5a   :  { %395 = vmatmul.mubr.bf16.vlgmr.msra.gmra.mrb[0].mxu0 %v83_v40 }
  0x5b   :  { %459 = vmatmul.mubr.bf16.vlgmr.msra.gmra.mrb[0].mxu1 %v85_v44  ;;  %402 = vmatprep.mubr.bf16.mxu0 %v88_v48 }
  0x5c   :  { %466 = vmatprep.mubr.bf16.mxu1 %v90_v49 }
  0x62   :  { %403 = vmatmul.mubr.bf16.gmra.mrb[4].mxu0 %v87_v58 }
  0x63   :  { %467 = vmatmul.mubr.bf16.gmra.mrb[4].mxu1 %v89_v59  ;;  %410 = vmatprep.mubr.bf16.mxu0 %v92_v60 }
  0x64   :  { %474 = vmatprep.mubr.bf16.mxu1 %v94_v61 }
  0x6a   :  { %411 = vmatmul.mubr.bf16.gmra.mrb[8].mxu0 %v91_v4 }
  0x6b   :  { %475 = vmatmul.mubr.bf16.gmra.mrb[8].mxu1 %v93_v5  ;;  %418 = vmatprep.mubr.bf16.mxu0 %v96_v6 }
  0x6c   :  { %482 = vmatprep.mubr.bf16.mxu1 %v98_v7 }
  0x72   :  { %419 = vmatmul.mubr.bf16.gmra.mrb[12].mxu0 %v95_v10 }
  0x73   :  { %483 = vmatmul.mubr.bf16.gmra.mrb[12].mxu1 %v97_v11 }
 0x12d   :  { %v572_v12 = vpop.f32.mrb[0].mxu0 }
 0x12e   :  { %v612_v13 = vpop.f32.mrb[0].mxu1  ;;  %v573_v15 = vpop.f32.mrb[1].mxu0 }
 0x12f   :  { %v574_v16 = vadd.f32 %v573_v15, %v572_v12  ;;  %v613_v17 = vpop.f32.mrb[1].mxu1  ;;  %v575_v18 = vpop.f32.mrb[2].mxu0 }
 0x130   :  { %v614_v19 = vadd.f32 %v613_v17, %v612_v13  ;;  %v615_v20 = vpop.f32.mrb[2].mxu1  ;;  %v576_v21 = vpop.f32.mrb[3].mxu0 }
 0x131   :  { %v397_v22 = vadd.f32 %v574_v16, %v838_v14  ;;  %v577_v23 = vadd.f32 %v576_v21, %v575_v18  ;;  %v616_v24 = vpop.f32.mrb[3].mxu1 }
 0x132   :  { %v617_v25 = vadd.f32 %v616_v24, %v615_v20 }
 0x133   :  { %v461_v26 = vadd.f32 %v614_v19, %v397_v22  ;;  %v400_v27 = vadd.f32 %v577_v23, %v838_v14 }
 0x135   :  { %v490_v28 = vmax.f32 %v461_v26, 0.0  ;;  %v464_v29 = vadd.f32 %v617_v25, %v400_v27  ;;  %v578_v30 = vpop.f32.mrb[4].mxu0 }
 0x136   :  { %v618_v31 = vpop.f32.mrb[4].mxu1  ;;  %v579_v32 = vpop.f32.mrb[5].mxu0 }
 0x137   :  { %498 = vst.msk [vmem:[#allocation8] sm:$0xff] %vm497_vm0, %v490_v28  ;;  %v491_v33 = vmax.f32 %v464_v29, 0.0  ;;  %v580_v34 = vadd.f32 %v579_v32, %v578_v30  ;;  %v619_v35 = vpop.f32.mrb[5].mxu1  ;;  %v581_v36 = vpop.f32.mrb[6].mxu0 }
 0x138   :  { %v620_v37 = vadd.f32 %v619_v35, %v618_v31  ;;  %v621_v38 = vpop.f32.mrb[6].mxu1  ;;  %v582_v39 = vpop.f32.mrb[7].mxu0 }
 0x139   :  { %499 = vst.msk [vmem:[#allocation8 + $0x8] sm:$0xff] %vm497_vm0, %v491_v33  ;;  %v405_v40 = vadd.f32 %v580_v34, %v838_v14  ;;  %v583_v41 = vadd.f32 %v582_v39, %v581_v36  ;;  %v622_v42 = vpop.f32.mrb[7].mxu1 }
 0x13a   :  { %v623_v43 = vadd.f32 %v622_v42, %v621_v38 }
 0x13b   :  { %v469_v44 = vadd.f32 %v620_v37, %v405_v40  ;;  %v408_v45 = vadd.f32 %v583_v41, %v838_v14 }
 0x13d   :  { %v492_v46 = vmax.f32 %v469_v44, 0.0  ;;  %v472_v47 = vadd.f32 %v623_v43, %v408_v45  ;;  %v584_v48 = vpop.f32.mrb[8].mxu0 }
 0x13e   :  { %v624_v49 = vpop.f32.mrb[8].mxu1  ;;  %v585_v50 = vpop.f32.mrb[9].mxu0 }
 0x13f   :  { %500 = vst.msk [vmem:[#allocation8 + $0x10] sm:$0xff] %vm497_vm0, %v492_v46  ;;  %v493_v51 = vmax.f32 %v472_v47, 0.0  ;;  %v586_v52 = vadd.f32 %v585_v50, %v584_v48  ;;  %v625_v53 = vpop.f32.mrb[9].mxu1  ;;  %v587_v54 = vpop.f32.mrb[10].mxu0 }
 0x140   :  { %v626_v55 = vadd.f32 %v625_v53, %v624_v49  ;;  %v627_v56 = vpop.f32.mrb[10].mxu1  ;;  %v588_v57 = vpop.f32.mrb[11].mxu0 }
 0x141   :  { %501 = vst.msk [vmem:[#allocation8 + $0x18] sm:$0xff] %vm497_vm0, %v493_v51  ;;  %v413_v58 = vadd.f32 %v586_v52, %v838_v14  ;;  %v589_v59 = vadd.f32 %v588_v57, %v587_v54  ;;  %v628_v60 = vpop.f32.mrb[11].mxu1 }
 0x142   :  { %v629_v61 = vadd.f32 %v628_v60, %v627_v56 }
 0x143   :  { %v477_v62 = vadd.f32 %v626_v55, %v413_v58  ;;  %v416_v63 = vadd.f32 %v589_v59, %v838_v14 }
 0x145   :  { %v494_v0 = vmax.f32 %v477_v62, 0.0  ;;  %v480_v1 = vadd.f32 %v629_v61, %v416_v63  ;;  %v590_v2 = vpop.f32.mrb[12].mxu0 }
 0x146   :  { %v630_v3 = vpop.f32.mrb[12].mxu1  ;;  %v591_v4 = vpop.f32.mrb[13].mxu0 }
 0x147   :  { %502 = vst.msk [vmem:[#allocation8 + $0x20] sm:$0xff] %vm497_vm0, %v494_v0  ;;  %v495_v5 = vmax.f32 %v480_v1, 0.0  ;;  %v592_v6 = vadd.f32 %v591_v4, %v590_v2  ;;  %v631_v7 = vpop.f32.mrb[13].mxu1  ;;  %v593_v8 = vpop.f32.mrb[14].mxu0 }
 0x148   :  { %v632_v9 = vadd.f32 %v631_v7, %v630_v3  ;;  %v633_v10 = vpop.f32.mrb[14].mxu1  ;;  %v594_v11 = vpop.f32.mrb[15].mxu0 }
 0x149   :  { %503 = vst.msk [vmem:[#allocation8 + $0x28] sm:$0xff] %vm497_vm0, %v495_v5  ;;  %v421_v12 = vadd.f32 %v592_v6, %v838_v14  ;;  %v634_v13 = vpop.f32.mrb[15].mxu1 }
 0x14b   :  { %v485_v15 = vadd.f32 %v632_v9, %v421_v12 }
 0x14d   :  { %v496_v16 = vmax.f32 %v485_v15, 0.0 }
 0x14f   :  { %504 = vst.msk [vmem:[#allocation8 + $0x30] sm:$0xff] %vm497_vm0, %v496_v16 }
 0x150   :  { %755 = shalt.err (!%p752_p0)
}
 0x151   :  { %s756_s28 = scalar_lea.hbm %s869_s3, 896 }
 0x152   :  { %p757_p1 = scmp.ne.s32.totalorder %s869_s3, %s756_s28  ;;  %p760_p2 = scmp.lt.u32.totalorder %s756_s28, %s869_s3 }
 0x154   :  { %p762_p3 = pnand %p760_p2, %p757_p1 }
 0x156   :  { %765 = shalt.err (!%p762_p3)
}
 0x157   :  { %s780_s6 = smov 128   ;;  %s781_s7 = smov 8  }
 0x158   :  { %516 = dma.vmem_to_hbm [thread:$0]  %s511_s24, 896, %s869_s3, [#allocation4], %s780_s6, %s780_s6, %s781_s7  }
 0x159   :  { %770 = dma.done.wait [#allocation4], 896  }
 0x15a   :  { %771 = vsyncadd [#allocation4], 4294966400 }
 0x15b   :  { %520 = vsyncpa [#allocation3], 1 }
 0x15c   :  { %521 = vsyncpa [#allocation6], 1 }
 0x15d   :  { %522 = vsyncpa [#allocation4], 1 }

// kernel: dqn_noisy_forward.6
= control target key start
LH: loop header
LB: loop body
LE: loop exit
PB: predicated region body
PF: predicated region fallthrough
CT: control target
= control target key end

     0   :  { %8 = vsyncpa [#allocation3], 0  ;;  %s886_s0 = inlined_call_operand.hbm [shape: f32[24,576], index: 0, kind: input, shape index: {}]   ;;  %s887_s1 = inlined_call_operand.hbm [shape: bf16[576,64], index: 1, kind: input, shape index: {}]   ;;  %s888_s2 = inlined_call_operand.hbm [shape: f32[1,64], index: 2, kind: input, shape index: {}]   ;;  %s889_s3 = inlined_call_operand.hbm [shape: f32[24,64], index: 3, kind: output, shape index: {}]  }
   0x1   :  { %9 = vsyncpa [#allocation6], 0 }
   0x2   :  { %10 = vsyncpa [#allocation4], 0  ;;  %s803_s12 = smov [#allocation5]   ;;  %s709_s16 = scalar_lea.hbm %s887_s1, 4608 }
   0x3   :  { %s28_s13 = sshll.u32 %s803_s12, 4  ;;  %p710_p0 = scmp.ne.s32.totalorder %s887_s1, %s709_s16  ;;  %s29_s13 = int_to_ptr.vmem [resolvable:$true] %s28_s13 }
   0x4   :  { %p713_p1 = scmp.lt.u32.totalorder %s709_s16, %s887_s1 }
   0x6   :  { %p715_p2 = pnand %p713_p1, %p710_p0 }
   0x8   :  { %718 = shalt.err (!%p715_p2)
}
   0x9   :  { %s719_s21 = scalar_lea.vmem %s29_s13, 4608  ;;  %p724_p4 = scmp.lt.s32.totalorder %s29_s13, %s29_s13 }
   0xa   :  { %p720_p3 = scmp.ne.s32.totalorder %s29_s13, %s719_s21  ;;  %p725_p5 = scmp.lt.s32.totalorder %s719_s21, %s719_s21 }
   0xc   :  { %p726_p6 = por %p725_p5, %p724_p4 }
   0xe   :  { %p727_p7 = pnand %p726_p6, %p720_p3 }
  0x10   :  { %730 = shalt.err (!%p727_p7)
}
  0x11   :  { %s804_s22 = smov 64   ;;  %s805_s23 = smov 4  }
  0x12   :  { %34 = dma.hbm_to_vmem [thread:$0]  %s887_s1, 4608, %s29_s13, [#allocation6], %s804_s22, %s804_s22, %s805_s23  }
  0x13   :  { %s806_s26 = smov [#allocation2]   ;;  %s731_s30 = scalar_lea.hbm %s886_s0, 1920 }
  0x14   :  { %s16_s27 = sshll.u32 %s806_s26, 4  ;;  %p732_p8 = scmp.ne.s32.totalorder %s886_s0, %s731_s30  ;;  %s17_s27 = int_to_ptr.vmem [resolvable:$true] %s16_s27 }
  0x15   :  { %p735_p9 = scmp.lt.u32.totalorder %s731_s30, %s886_s0 }
  0x17   :  { %p737_p10 = pnand %p735_p9, %p732_p8 }
  0x19   :  { %740 = shalt.err (!%p737_p10)
}
  0x1a   :  { %s741_s8 = scalar_lea.vmem %s17_s27, 1920  ;;  %p746_p12 = scmp.lt.s32.totalorder %s17_s27, %s17_s27 }
  0x1b   :  { %p742_p11 = scmp.ne.s32.totalorder %s17_s27, %s741_s8  ;;  %p747_p13 = scmp.lt.s32.totalorder %s741_s8, %s741_s8 }
  0x1d   :  { %p748_p0 = por %p747_p13, %p746_p12 }
  0x1f   :  { %p749_p1 = pnand %p748_p0, %p742_p11 }
  0x21   :  { %752 = shalt.err (!%p749_p1)
}
  0x22   :  { %s807_s1 = smov 640   ;;  %s808_s9 = smov 40  }
  0x23   :  { %22 = dma.hbm_to_vmem [thread:$0]  %s886_s0, 1920, %s17_s27, [#allocation3], %s807_s1, %s807_s1, %s808_s9  }
  0x24   :  { %s809_s12 = smov [#allocation7]   ;;  %s753_s16 = scalar_lea.hbm %s888_s2, 16 }
  0x25   :  { %s41_s13 = sshll.u32 %s809_s12, 4  ;;  %p754_p2 = scmp.ne.s32.totalorder %s888_s2, %s753_s16  ;;  %s42_s13 = int_to_ptr.vmem [resolvable:$true] %s41_s13 }
  0x26   :  { %p757_p3 = scmp.lt.u32.totalorder %s753_s16, %s888_s2 }
  0x28   :  { %p759_p4 = pnand %p757_p3, %p754_p2 }
  0x2a   :  { %762 = shalt.err (!%p759_p4)
}
  0x2b   :  { %s763_s21 = scalar_lea.vmem %s42_s13, 16  ;;  %s767_s0 = scalar_lea.vmem %s42_s13, 32 }
  0x2c   :  { %p764_p5 = scmp.ne.s32.totalorder %s42_s13, %s763_s21  ;;  %p768_p6 = scmp.lt.s32.totalorder %s42_s13, %s42_s13 }
  0x2d   :  { %p769_p7 = scmp.lt.s32.totalorder %s767_s0, %s763_s21 }
  0x2f   :  { %p770_p8 = por %p769_p7, %p768_p6 }
  0x31   :  { %p771_p9 = pnand %p770_p8, %p764_p5 }
  0x33   :  { %774 = shalt.err (!%p771_p9)
}
  0x34   :  { %44 = dma.hbm_to_vmem [thread:$0]  %s888_s2, 16, %s42_s13, [#allocation6]  }
  0x35   :  { %797 = dma.done.wait [#allocation3], 1920  }
  0x36   :  { %798 = vsyncadd [#allocation3], 4294965376 }
  0x37   :  { %799 = dma.done.wait [#allocation6], 4624  }
  0x38   :  { %800 = vsyncadd [#allocation6], 4294962672  ;;  %v673_v0 = vld [vmem:[#allocation5 + $0x40] sm:$0xff]   ;;  %v677_v4 = vld [vmem:[#allocation5 + $0x48] sm:$0xff]   ;;  %vm375_vm0 = vcmask 523264   ;;  %s810_s2 = smov [#allocation8]  }
  0x39   :  { %v674_v1 = vld [vmem:[#allocation5] sm:$0xff]   ;;  %589 = vmatprep.subr.bf16.mxu0 %v673_v0  ;;  %v678_v5 = vld [vmem:[#allocation5 + $0x8] sm:$0xff]   ;;  %v681_v8 = vld [vmem:[#allocation5 + $0x50] sm:$0xff]   ;;  %s537_s24 = sshll.u32 %s810_s2, 4  ;;  %s538_s24 = int_to_ptr.vmem [resolvable:$true] %s537_s24 }
  0x3a   :  { %v675_v2 = vld [vmem:[#allocation5 + $0xc0] sm:$0xff]   ;;  %590 = vmatpush3.bf16.msra.mxu0 %v674_v1  ;;  %v679_v6 = vld [vmem:[#allocation5 + $0xc8] sm:$0xff]   ;;  %v682_v9 = vld [vmem:[#allocation5 + $0x10] sm:$0xff]   ;;  %s775_s25 = scalar_lea.vmem %s538_s24, 384  ;;  %p780_p11 = scmp.lt.s32.totalorder %s538_s24, %s538_s24 }
  0x3b   :  { %v676_v3 = vld [vmem:[#allocation5 + $0x80] sm:$0xff]   ;;  %617 = vmatprep.subr.bf16.mxu1 %v675_v2  ;;  %591 = vmatprep.subr.bf16.mxu0 %v677_v4  ;;  %v680_v7 = vld [vmem:[#allocation5 + $0x88] sm:$0xff]   ;;  %v683_v10 = vld [vmem:[#allocation5 + $0xd0] sm:$0xff]   ;;  %p776_p10 = scmp.ne.s32.totalorder %s538_s24, %s775_s25  ;;  %p781_p12 = scmp.lt.s32.totalorder %s775_s25, %s775_s25 }
  0x3c   :  { %618 = vmatpush3.bf16.msra.mxu1 %v676_v3  ;;  %v684_v11 = vld [vmem:[#allocation5 + $0x90] sm:$0xff]   ;;  %v685_v12 = vld [vmem:[#allocation5 + $0x58] sm:$0xff]   ;;  %v689_v16 = vld [vmem:[#allocation5 + $0x60] sm:$0xff]  }
  0x3d   :  { %619 = vmatprep.subr.bf16.mxu1 %v679_v6  ;;  %v686_v13 = vld [vmem:[#allocation5 + $0x18] sm:$0xff]   ;;  %v690_v17 = vld [vmem:[#allocation5 + $0x20] sm:$0xff]   ;;  %v693_v20 = vld [vmem:[#allocation5 + $0x68] sm:$0xff]   ;;  %p782_p13 = por %p781_p12, %p780_p11 }
  0x3e   :  { %592 = vmatpush3.bf16.msra.mxu0 %v678_v5  ;;  %v687_v14 = vld [vmem:[#allocation5 + $0xd8] sm:$0xff]   ;;  %v691_v18 = vld [vmem:[#allocation5 + $0xe0] sm:$0xff]   ;;  %v694_v21 = vld [vmem:[#allocation5 + $0x28] sm:$0xff]  }
  0x3f   :  { %593 = vmatprep.subr.bf16.mxu0 %v681_v8  ;;  %v688_v15 = vld [vmem:[#allocation5 + $0x98] sm:$0xff]   ;;  %v692_v19 = vld [vmem:[#allocation5 + $0xa0] sm:$0xff]   ;;  %v695_v22 = vld [vmem:[#allocation5 + $0xe8] sm:$0xff]   ;;  %p783_p0 = pnand %p782_p13, %p776_p10 }
  0x40   :  { %620 = vmatpush3.bf16.msra.mxu1 %v680_v7  ;;  %v696_v23 = vld [vmem:[#allocation5 + $0xa8] sm:$0xff]   ;;  %v697_v24 = vld [vmem:[#allocation5 + $0x70] sm:$0xff]   ;;  %v701_v28 = vld [vmem:[#allocation5 + $0x78] sm:$0xff]  }
  0x41   :  { %621 = vmatprep.subr.bf16.mxu1 %v683_v10  ;;  %v698_v25 = vld [vmem:[#allocation5 + $0x30] sm:$0xff]   ;;  %v702_v29 = vld [vmem:[#allocation5 + $0x38] sm:$0xff]   ;;  %v55_v35 = vld [vmem:[#allocation2] sm:$0xff] }
  0x42   :  { %594 = vmatpush3.bf16.msra.mxu0 %v682_v9  ;;  %v699_v26 = vld [vmem:[#allocation5 + $0xf0] sm:$0xff]   ;;  %v703_v30 = vld [vmem:[#allocation5 + $0xf8] sm:$0xff]   ;;  %v705_v38 = vld [vmem:[#allocation5 + $0x100] sm:$0xff]  }
  0x43   :  { %595 = vmatprep.subr.bf16.mxu0 %v685_v12  ;;  %v700_v27 = vld [vmem:[#allocation5 + $0xb0] sm:$0xff]   ;;  %v61_v32 = vld [vmem:[#allocation2 + $0x30] sm:$0xff]  ;;  %v58_v39 = vld [vmem:[#allocation2 + $0x18] sm:$0xff] }
  0x44   :  { %622 = vmatpush3.bf16.msra.mxu1 %v684_v11  ;;  %v56_v31 = vld [vmem:[#allocation2 + $0x8] sm:$0xff]  ;;  %v704_v34 = vld [vmem:[#allocation5 + $0xb8] sm:$0xff]   ;;  %v63_v40 = vld [vmem:[#allocation2 + $0x40] sm:$0xff] }
  0x45   :  { %623 = vmatprep.subr.bf16.mxu1 %v687_v14  ;;  %v71_v33 = vpack.c.bf16 %v61_v32, %v56_v31  ;;  %v60_v36 = vld [vmem:[#allocation2 + $0x28] sm:$0xff]  ;;  %v73_v41 = vpack.c.bf16 %v63_v40, %v58_v39  ;;  %v57_v42 = vld [vmem:[#allocation2 + $0x10] sm:$0xff]  ;;  %v62_v43 = vld [vmem:[#allocation2 + $0x38] sm:$0xff] }
  0x46   :  { %596 = vmatpush3.bf16.msra.mxu0 %v686_v13  ;;  %v70_v37 = vpack.c.bf16 %v60_v36, %v55_v35  ;;  %v72_v44 = vpack.c.bf16 %v62_v43, %v57_v42  ;;  %v706_v45 = vld [vmem:[#allocation5 + $0x108] sm:$0xff]   ;;  %v66_v46 = vld [vmem:[#allocation2 + $0x58] sm:$0xff]  ;;  %v65_v48 = vld [vmem:[#allocation2 + $0x50] sm:$0xff] }
  0x47   :  { %597 = vmatprep.subr.bf16.mxu0 %v689_v16  ;;  %414 = vmatprep.mubr.bf16.mxu0 %v71_v33  ;;  %v76_v47 = vpack.c.bf16 %v66_v46, %v66_v46  ;;  %v707_v49 = vld [vmem:[#allocation5 + $0x110] sm:$0xff]   ;;  %v67_v52 = vld [vmem:[#allocation2 + $0x60] sm:$0xff]  ;;  %v75_v53 = vpack.c.bf16 %v65_v48, %v65_v48  ;;  %v708_v58 = vld [vmem:[#allocation5 + $0x118] sm:$0xff]  }
  0x48   :  { %624 = vmatpush3.bf16.msra.mxu1 %v688_v15  ;;  %462 = vmatprep.mubr.bf16.mxu1 %v73_v41  ;;  %v68_v50 = vld [vmem:[#allocation2 + $0x68] sm:$0xff]  ;;  %v59_v54 = vld [vmem:[#allocation2 + $0x20] sm:$0xff]  ;;  %v77_v57 = vpack.c.bf16 %v67_v52, %v67_v52  ;;  %v69_v59 = vld [vmem:[#allocation2 + $0x70] sm:$0xff] }
  0x49   :  { %625 = vmatprep.subr.bf16.mxu1 %v691_v18  ;;  %v78_v51 = vpack.c.bf16 %v68_v50, %v68_v50  ;;  %v64_v55 = vld [vmem:[#allocation2 + $0x48] sm:$0xff]  ;;  %v79_v60 = vpack.c.bf16 %v69_v59, %v69_v59  ;;  %v550_v62 = vld [vmem:[#allocation7] ss:$0 sm:$0xff] }
  0x4a   :  { %598 = vmatpush3.bf16.msra.mxu0 %v690_v17  ;;  %v74_v56 = vpack.c.bf16 %v64_v55, %v59_v54 }
  0x4b   :  { %599 = vmatprep.subr.bf16.mxu0 %v693_v20 }
  0x4c   :  { %626 = vmatpush3.bf16.msra.mxu1 %v692_v19 }
  0x4d   :  { %627 = vmatprep.subr.bf16.mxu1 %v695_v22 }
  0x4e   :  { %600 = vmatpush3.bf16.msra.mxu0 %v694_v21 }
  0x4f   :  { %601 = vmatprep.subr.bf16.mxu0 %v697_v24 }
  0x50   :  { %628 = vmatpush3.bf16.msra.mxu1 %v696_v23 }
  0x51   :  { %629 = vmatprep.subr.bf16.mxu1 %v699_v26 }
  0x52   :  { %602 = vmatpush3.bf16.msra.mxu0 %v698_v25 }
  0x53   :  { %603 = vmatprep.subr.bf16.mxu0 %v701_v28 }
  0x54   :  { %630 = vmatpush3.bf16.msra.mxu1 %v700_v27 }
  0x55   :  { %631 = vmatprep.subr.bf16.mxu1 %v703_v30 }
  0x56   :  { %604 = vmatpush3.bf16.msra.mxu0 %v702_v29 }
  0x57   :  { %651 = vmatprep.subr.bf16.mxu0 %v705_v38 }
  0x58   :  { %632 = vmatpush3.bf16.msra.mxu1 %v704_v34 }
  0x59   :  { %415 = vmatmul.mubr.bf16.vlgmr.msra.gmra.mrb[0].mxu0 %v70_v37 }
  0x5a   :  { %652 = vmatpush3.bf16.msra.mxu0 %v705_v38  ;;  %422 = vmatprep.mubr.bf16.mxu0 %v76_v47 }
  0x5b   :  { %463 = vmatmul.mubr.bf16.vlgmr.msra.gmra.mrb[0].mxu1 %v72_v44  ;;  %653 = vmatprep.subr.bf16.mxu0 %v706_v45 }
  0x5c   :  { %470 = vmatprep.mubr.bf16.mxu1 %v78_v51 }
  0x5e   :  { %654 = vmatpush3.bf16.msra.mxu0 %v706_v45 }
  0x5f   :  { %655 = vmatprep.subr.bf16.mxu0 %v707_v49 }
  0x61   :  { %423 = vmatmul.mubr.bf16.gmra.mrb[4].mxu0 %v75_v53 }
  0x62   :  { %656 = vmatpush3.bf16.msra.mxu0 %v707_v49  ;;  %659 = vmatprep.mubr.msk.bf16.mxu0 %vm375_vm0, %v74_v56 }
  0x63   :  { %471 = vmatmul.mubr.bf16.gmra.mrb[4].mxu1 %v77_v57  ;;  %657 = vmatprep.subr.bf16.mxu0 %v708_v58 }
  0x66   :  { %658 = vmatpush3.bf16.msra.mxu0 %v708_v58 }
  0x69   :  { %660 = vmatmul.mubr.msk.bf16.vlgmr.msra.gmra.mrb[8].mxu0 %vm375_vm0, %v79_v60 }
 0x12c   :  { %v605_v61 = vpop.f32.mrb[0].mxu0 }
 0x12d   :  { %v606_v63 = vpop.f32.mrb[1].mxu0 }
 0x12e   :  { %v607_v0 = vadd.f32 %v606_v63, %v605_v61  ;;  %v608_v1 = vpop.f32.mrb[2].mxu0  ;;  %v633_v2 = vpop.f32.mrb[0].mxu1 }
 0x12f   :  { %v609_v3 = vpop.f32.mrb[3].mxu0  ;;  %v634_v4 = vpop.f32.mrb[1].mxu1 }
 0x130   :  { %v417_v5 = vadd.f32 %v607_v0, %v550_v62  ;;  %v610_v6 = vadd.f32 %v609_v3, %v608_v1  ;;  %v635_v7 = vadd.f32 %v634_v4, %v633_v2  ;;  %v636_v8 = vpop.f32.mrb[2].mxu1 }
 0x131   :  { %v637_v9 = vpop.f32.mrb[3].mxu1 }
 0x132   :  { %v420_v10 = vadd.f32 %v610_v6, %v550_v62  ;;  %v638_v11 = vadd.f32 %v637_v9, %v636_v8  ;;  %v465_v12 = vadd.f32 %v635_v7, %v417_v5 }
 0x134   :  { %v611_v13 = vpop.f32.mrb[4].mxu0  ;;  %v468_v14 = vadd.f32 %v638_v11, %v420_v10 }
 0x135   :  { %v612_v15 = vpop.f32.mrb[5].mxu0 }
 0x136   :  { %v613_v16 = vadd.f32 %v612_v15, %v611_v13  ;;  %v614_v17 = vpop.f32.mrb[6].mxu0  ;;  %v639_v18 = vpop.f32.mrb[4].mxu1 }
 0x137   :  { %v615_v19 = vpop.f32.mrb[7].mxu0  ;;  %v640_v20 = vpop.f32.mrb[5].mxu1 }
 0x138   :  { %v425_v21 = vadd.f32 %v613_v16, %v550_v62  ;;  %v641_v22 = vadd.f32 %v640_v20, %v639_v18  ;;  %v642_v23 = vpop.f32.mrb[6].mxu1 }
 0x139   :  { %v643_v24 = vpop.f32.mrb[7].mxu1 }
 0x13a   :  { %v473_v25 = vadd.f32 %v641_v22, %v425_v21 }
 0x13c   :  { %v661_v26 = vpop.f32.mrb[8].mxu0 }
 0x13d   :  { %v521_v27 = vadd.f32 %v661_v26, %v473_v25  ;;  %v512_v28 = vpop.f32.mrb[9].mxu0 }
 0x13e   :  { %v513_v29 = vadd.f32 %v512_v28, %v465_v12  ;;  %v662_v30 = vpop.f32.mrb[10].mxu0 }
 0x13f   :  { %v528_v31 = vmax.f32 %v521_v27, 0.0  ;;  %v515_v32 = vpop.f32.mrb[11].mxu0 }
 0x140   :  { %v526_v33 = vmax.f32 %v513_v29, 0.0  ;;  %v516_v34 = vadd.f32 %v515_v32, %v468_v14 }
 0x141   :  { %531 = vst.msk [vmem:[#allocation8 + $0x10] sm:$0xff] %vm375_vm0, %v528_v31 }
 0x142   :  { %529 = vst.msk [vmem:[#allocation8] sm:$0xff] %vm375_vm0, %v526_v33  ;;  %v527_v35 = vmax.f32 %v516_v34, 0.0 }
 0x144   :  { %530 = vst.msk [vmem:[#allocation8 + $0x8] sm:$0xff] %vm375_vm0, %v527_v35 }
 0x145   :  { %786 = shalt.err (!%p783_p0)
}
 0x146   :  { %s787_s28 = scalar_lea.hbm %s889_s3, 384 }
 0x147   :  { %p788_p1 = scmp.ne.s32.totalorder %s889_s3, %s787_s28  ;;  %p791_p2 = scmp.lt.u32.totalorder %s787_s28, %s889_s3 }
 0x149   :  { %p793_p3 = pnand %p791_p2, %p788_p1 }
 0x14b   :  { %796 = shalt.err (!%p793_p3)
}
 0x14c   :  { %s811_s6 = smov 128   ;;  %s812_s7 = smov 8  }
 0x14d   :  { %543 = dma.vmem_to_hbm [thread:$0]  %s538_s24, 384, %s889_s3, [#allocation4], %s811_s6, %s811_s6, %s812_s7  }
 0x14e   :  { %801 = dma.done.wait [#allocation4], 384  }
 0x14f   :  { %802 = vsyncadd [#allocation4], 4294966912 }
 0x150   :  { %547 = vsyncpa [#allocation3], 1 }
 0x151   :  { %548 = vsyncpa [#allocation6], 1 }
 0x152   :  { %549 = vsyncpa [#allocation4], 1 }

// kernel: dqn_noisy_forward.7
= control target key start
LH: loop header
LB: loop body
LE: loop exit
PB: predicated region body
PF: predicated region fallthrough
CT: control target
= control target key end

     0   :  { %16 = vsyncpa [#allocation3], 0  ;;  %s4842_s0 = inlined_call_operand.hbm [shape: f32[8,576], index: 0, kind: input, shape index: {}]   ;;  %s4843_s1 = inlined_call_operand.hbm [shape: bf16[576,512], index: 1, kind: input, shape index: {}]   ;;  %s4844_s2 = inlined_call_operand.hbm [shape: bf16[576,512], index: 2, kind: input, shape index: {}]   ;;  %s4845_s3 = inlined_call_operand.hbm [shape: f32[1,576], index: 3, kind: input, shape index: {}]   ;;  %s4846_s4 = inlined_call_operand.hbm [shape: f32[1,512], index: 4, kind: input, shape index: {}]   ;;  %s4847_s5 = inlined_call_operand.hbm [shape: f32[1,512], index: 5, kind: input, shape index: {}]   ;;  %s4848_s6 = inlined_call_operand.hbm [shape: bf16[512,128], index: 6, kind: input, shape index: {}]   ;;  %s4849_s7 = inlined_call_operand.hbm [shape: bf16[512,128], index: 7, kind: input, shape index: {}]   ;;  %s4850_s8 = inlined_call_operand.hbm [shape: f32[1,512], index: 8, kind: input, shape index: {}]   ;;  %s4851_s9 = inlined_call_operand.hbm [shape: f32[1,128], index: 9, kind: input, shape index: {}]   ;;  %s4852_s10 = inlined_call_operand.hbm [shape: f32[1,128], index: 10, kind: input, shape index: {}]   ;;  %s4853_s11 = inlined_call_operand.hbm [shape: f32[8,128], index: 11, kind: output, shape index: {}]  }
   0x1   :  { %17 = vsyncpa [#allocation6], 0 }
   0x2   :  { %18 = vsyncpa [#allocation9], 0 }
   0x3   :  { %19 = vsyncpa [#allocation12], 0 }
   0x4   :  { %20 = vsyncpa [#allocation15], 0 }
   0x5   :  { %21 = vsyncpa [#allocation18], 0 }
   0x6   :  { %22 = vsyncpa [#allocation4], 0  ;;  %s4502_s17 = smov [#allocation5]   ;;  %s4224_s21 = scalar_lea.hbm %s4843_s1, 18432 }
   0x7   :  { %s38_s18 = sshll.u32 %s4502_s17, 4  ;;  %p4225_p0 = scmp.ne.s32.totalorder %s4843_s1, %s4224_s21  ;;  %s39_s18 = int_to_ptr.vmem [resolvable:$true] %s38_s18 }
   0x8   :  { %p4228_p1 = scmp.lt.u32.totalorder %s4224_s21, %s4843_s1 }
   0xa   :  { %p4230_p2 = pnand %p4228_p1, %p4225_p0 }
   0xc   :  { %4233 = shalt.err (!%p4230_p2)
}
   0xd   :  { %s4234_s26 = scalar_lea.vmem %s39_s18, 18432  ;;  %p4239_p4 = scmp.lt.s32.totalorder %s39_s18, %s39_s18 }
   0xe   :  { %p4235_p3 = scmp.ne.s32.totalorder %s39_s18, %s4234_s26  ;;  %p4240_p5 = scmp.lt.s32.totalorder %s4234_s26, %s4234_s26 }
  0x10   :  { %p4241_p6 = por %p4240_p5, %p4239_p4 }
  0x12   :  { %p4242_p7 = pnand %p4241_p6, %p4235_p3 }
  0x14   :  { %4245 = shalt.err (!%p4242_p7)
}
  0x15   :  { %s4503_s27 = smov 256   ;;  %s4504_s28 = smov 16  }
  0x16   :  { %44 = dma.hbm_to_vmem [thread:$0]  %s4843_s1, 18432, %s39_s18, [#allocation6], %s4503_s27, %s4503_s27, %s4504_s28  }
  0x17   :  { %s4505_s12 = smov [#allocation8]   ;;  %s4506_s14 = smov [#allocation11]  }
  0x18   :  { %s63_s13 = sshll.u32 %s4505_s12, 4  ;;  %s83_s15 = sshll.u32 %s4506_s14, 4  ;;  %s64_s13 = int_to_ptr.vmem [resolvable:$true] %s63_s13  ;;  %s84_s15 = int_to_ptr.vmem [resolvable:$true] %s83_s15 }
  0x19   :  { %s4246_s19 = scalar_lea.hbm %s4845_s3, 80 }
  0x1a   :  { %p4247_p8 = scmp.ne.s32.totalorder %s4845_s3, %s4246_s19  ;;  %p4250_p9 = scmp.lt.u32.totalorder %s4246_s19, %s4845_s3 }
  0x1c   :  { %p4252_p10 = pnand %p4250_p9, %p4247_p8 }
  0x1e   :  { %4255 = shalt.err (!%p4252_p10)
}
  0x1f   :  { %s4256_s1 = scalar_lea.vmem %s64_s13, 80  ;;  %s4260_s18 = scalar_lea.vmem %s64_s13, 96 }
  0x20   :  { %p4257_p11 = scmp.ne.s32.totalorder %s64_s13, %s4256_s1  ;;  %p4261_p12 = scmp.lt.s32.totalorder %s64_s13, %s64_s13 }
  0x21   :  { %p4262_p13 = scmp.lt.s32.totalorder %s4260_s18, %s4256_s1 }
  0x23   :  { %p4263_p0 = por %p4262_p13, %p4261_p12 }
  0x25   :  { %p4264_p1 = pnand %p4263_p0, %p4257_p11 }
  0x27   :  { %4267 = shalt.err (!%p4264_p1)
}
  0x28   :  { %66 = dma.hbm_to_vmem [thread:$0]  %s4845_s3, 80, %s64_s13, [#allocation9]  }
  0x29   :  { %s4268_s30 = scalar_lea.hbm %s4847_s5, 64 }
  0x2a   :  { %p4269_p2 = scmp.ne.s32.totalorder %s4847_s5, %s4268_s30  ;;  %p4272_p3 = scmp.lt.u32.totalorder %s4268_s30, %s4847_s5 }
  0x2c   :  { %p4274_p4 = pnand %p4272_p3, %p4269_p2 }
  0x2e   :  { %4277 = shalt.err (!%p4274_p4)
}
  0x2f   :  { %s4278_s19 = scalar_lea.vmem %s84_s15, 64  ;;  %p4283_p6 = scmp.lt.s32.totalorder %s84_s15, %s84_s15 }
  0x30   :  { %p4279_p5 = scmp.ne.s32.totalorder %s84_s15, %s4278_s19  ;;  %p4284_p7 = scmp.lt.s32.totalorder %s4278_s19, %s4278_s19 }
  0x32   :  { %p4285_p8 = por %p4284_p7, %p4283_p6 }
  0x34   :  { %p4286_p9 = pnand %p4285_p8, %p4279_p5 }
  0x36   :  { %4289 = shalt.err (!%p4286_p9)
}
  0x37   :  { %86 = dma.hbm_to_vmem [thread:$0]  %s4847_s5, 64, %s84_s15, [#allocation12]  }
  0x38   :  { %s4507_s20 = smov [#allocation14]   ;;  %s4508_s22 = smov [#allocation17]  }
  0x39   :  { %s104_s21 = sshll.u32 %s4507_s20, 4  ;;  %s127_s23 = sshll.u32 %s4508_s22, 4  ;;  %s105_s21 = int_to_ptr.vmem [resolvable:$true] %s104_s21  ;;  %s128_s23 = int_to_ptr.vmem [resolvable:$true] %s127_s23 }
  0x3a   :  { %s4290_s24 = scalar_lea.hbm %s4849_s7, 4096 }
  0x3b   :  { %p4291_p10 = scmp.ne.s32.totalorder %s4849_s7, %s4290_s24  ;;  %p4294_p11 = scmp.lt.u32.totalorder %s4290_s24, %s4849_s7 }
  0x3d   :  { %p4296_p12 = pnand %p4294_p11, %p4291_p10 }
  0x3f   :  { %4299 = shalt.err (!%p4296_p12)
}
  0x40   :  { %s4300_s5 = scalar_lea.vmem %s105_s21, 4096  ;;  %p4305_p0 = scmp.lt.s32.totalorder %s105_s21, %s105_s21 }
  0x41   :  { %p4301_p13 = scmp.ne.s32.totalorder %s105_s21, %s4300_s5  ;;  %p4306_p1 = scmp.lt.s32.totalorder %s4300_s5, %s4300_s5 }
  0x43   :  { %p4307_p2 = por %p4306_p1, %p4305_p0 }
  0x45   :  { %p4308_p3 = pnand %p4307_p2, %p4301_p13 }
  0x47   :  { %4311 = shalt.err (!%p4308_p3)
}
  0x48   :  { %s4509_s15 = smov 64   ;;  %s4510_s12 = smov 4  }
  0x49   :  { %110 = dma.hbm_to_vmem [thread:$0]  %s4849_s7, 4096, %s105_s21, [#allocation15], %s4509_s15, %s4509_s15, %s4510_s12  }
  0x4a   :  { %s4312_s3 = scalar_lea.hbm %s4851_s9, 16 }
  0x4b   :  { %p4313_p4 = scmp.ne.s32.totalorder %s4851_s9, %s4312_s3  ;;  %p4316_p5 = scmp.lt.u32.totalorder %s4312_s3, %s4851_s9 }
  0x4d   :  { %p4318_p6 = pnand %p4316_p5, %p4313_p4 }
  0x4f   :  { %4321 = shalt.err (!%p4318_p6)
}
  0x50   :  { %s4322_s18 = scalar_lea.vmem %s128_s23, 16  ;;  %s4326_s24 = scalar_lea.vmem %s128_s23, 32 }
  0x51   :  { %p4323_p7 = scmp.ne.s32.totalorder %s128_s23, %s4322_s18  ;;  %p4327_p8 = scmp.lt.s32.totalorder %s128_s23, %s128_s23 }
  0x52   :  { %p4328_p9 = scmp.lt.s32.totalorder %s4326_s24, %s4322_s18 }
  0x54   :  { %p4329_p10 = por %p4328_p9, %p4327_p8 }
  0x56   :  { %p4330_p11 = pnand %p4329_p10, %p4323_p7 }
  0x58   :  { %4333 = shalt.err (!%p4330_p11)
}
  0x59   :  { %130 = dma.hbm_to_vmem [thread:$0]  %s4851_s9, 16, %s128_s23, [#allocation18]  }
  0x5a   :  { %s4511_s25 = smov [#allocation2]   ;;  %s4512_s29 = smov [#allocation7]  }
  0x5b   :  { %s29_s26 = sshll.u32 %s4511_s25, 4  ;;  %s50_s30 = sshll.u32 %s4512_s29, 4  ;;  %s30_s26 = int_to_ptr.vmem [resolvable:$true] %s29_s26  ;;  %s51_s30 = int_to_ptr.vmem [resolvable:$true] %s50_s30 }
  0x5c   :  { %s4334_s16 = scalar_lea.hbm %s4842_s0, 640 }
  0x5d   :  { %p4335_p12 = scmp.ne.s32.totalorder %s4842_s0, %s4334_s16  ;;  %p4338_p13 = scmp.lt.u32.totalorder %s4334_s16, %s4842_s0 }
  0x5f   :  { %p4340_p0 = pnand %p4338_p13, %p4335_p12 }
  0x61   :  { %4343 = shalt.err (!%p4340_p0)
}
  0x62   :  { %s4344_s9 = scalar_lea.vmem %s30_s26, 640  ;;  %p4349_p2 = scmp.lt.s32.totalorder %s30_s26, %s30_s26 }
  0x63   :  { %p4345_p1 = scmp.ne.s32.totalorder %s30_s26, %s4344_s9  ;;  %p4350_p3 = scmp.lt.s32.totalorder %s4344_s9, %s4344_s9 }
  0x65   :  { %p4351_p4 = por %p4350_p3, %p4349_p2 }
  0x67   :  { %p4352_p5 = pnand %p4351_p4, %p4345_p1 }
  0x69   :  { %4355 = shalt.err (!%p4352_p5)
}
  0x6a   :  { %32 = dma.hbm_to_vmem [thread:$0]  %s4842_s0, 640, %s30_s26, [#allocation3]  }
  0x6b   :  { %s4356_s18 = scalar_lea.hbm %s4844_s2, 18432 }
  0x6c   :  { %p4357_p6 = scmp.ne.s32.totalorder %s4844_s2, %s4356_s18  ;;  %p4360_p7 = scmp.lt.u32.totalorder %s4356_s18, %s4844_s2 }
  0x6e   :  { %p4362_p8 = pnand %p4360_p7, %p4357_p6 }
  0x70   :  { %4365 = shalt.err (!%p4362_p8)
}
  0x71   :  { %s4366_s29 = scalar_lea.vmem %s51_s30, 18432  ;;  %p4371_p10 = scmp.lt.s32.totalorder %s51_s30, %s51_s30 }
  0x72   :  { %p4367_p9 = scmp.ne.s32.totalorder %s51_s30, %s4366_s29  ;;  %p4372_p11 = scmp.lt.s32.totalorder %s4366_s29, %s4366_s29 }
  0x74   :  { %p4373_p12 = por %p4372_p11, %p4371_p10 }
  0x76   :  { %p4374_p13 = pnand %p4373_p12, %p4367_p9 }
  0x78   :  { %4377 = shalt.err (!%p4374_p13)
}
  0x79   :  { %56 = dma.hbm_to_vmem [thread:$0]  %s4844_s2, 18432, %s51_s30, [#allocation6], %s4503_s27, %s4503_s27, %s4504_s28  }
  0x7a   :  { %s4513_s5 = smov [#allocation10]   ;;  %s4514_s16 = smov [#allocation13]  }
  0x7b   :  { %s73_s14 = sshll.u32 %s4513_s5, 4  ;;  %s92_s17 = sshll.u32 %s4514_s16, 4  ;;  %s74_s14 = int_to_ptr.vmem [resolvable:$true] %s73_s14  ;;  %s93_s17 = int_to_ptr.vmem [resolvable:$true] %s92_s17 }
  0x7c   :  { %s4378_s13 = scalar_lea.hbm %s4846_s4, 64 }
  0x7d   :  { %p4379_p0 = scmp.ne.s32.totalorder %s4846_s4, %s4378_s13  ;;  %p4382_p1 = scmp.lt.u32.totalorder %s4378_s13, %s4846_s4 }
  0x7f   :  { %p4384_p2 = pnand %p4382_p1, %p4379_p0 }
  0x81   :  { %4387 = shalt.err (!%p4384_p2)
}
  0x82   :  { %s4388_s2 = scalar_lea.vmem %s74_s14, 64  ;;  %p4393_p4 = scmp.lt.s32.totalorder %s74_s14, %s74_s14 }
  0x83   :  { %p4389_p3 = scmp.ne.s32.totalorder %s74_s14, %s4388_s2  ;;  %p4394_p5 = scmp.lt.s32.totalorder %s4388_s2, %s4388_s2 }
  0x85   :  { %p4395_p6 = por %p4394_p5, %p4393_p4 }
  0x87   :  { %p4396_p7 = pnand %p4395_p6, %p4389_p3 }
  0x89   :  { %4399 = shalt.err (!%p4396_p7)
}
  0x8a   :  { %76 = dma.hbm_to_vmem [thread:$0]  %s4846_s4, 64, %s74_s14, [#allocation9]  }
  0x8b   :  { %s4400_s18 = scalar_lea.hbm %s4848_s6, 4096 }
  0x8c   :  { %p4401_p8 = scmp.ne.s32.totalorder %s4848_s6, %s4400_s18  ;;  %p4404_p9 = scmp.lt.u32.totalorder %s4400_s18, %s4848_s6 }
  0x8e   :  { %p4406_p10 = pnand %p4404_p9, %p4401_p8 }
  0x90   :  { %4409 = shalt.err (!%p4406_p10)
}
  0x91   :  { %s4410_s29 = scalar_lea.vmem %s93_s17, 4096  ;;  %p4415_p12 = scmp.lt.s32.totalorder %s93_s17, %s93_s17 }
  0x92   :  { %p4411_p11 = scmp.ne.s32.totalorder %s93_s17, %s4410_s29  ;;  %p4416_p13 = scmp.lt.s32.totalorder %s4410_s29, %s4410_s29 }
  0x94   :  { %p4417_p0 = por %p4416_p13, %p4415_p12 }
  0x96   :  { %p4418_p1 = pnand %p4417_p0, %p4411_p11 }
  0x98   :  { %4421 = shalt.err (!%p4418_p1)
}
  0x99   :  { %98 = dma.hbm_to_vmem [thread:$0]  %s4848_s6, 4096, %s93_s17, [#allocation12], %s4509_s15, %s4509_s15, %s4510_s12  }
  0x9a   :  { %s4515_s26 = smov [#allocation16]   ;;  %s4516_s14 = smov [#allocation19]  }
  0x9b   :  { %s117_s5 = sshll.u32 %s4515_s26, 4  ;;  %s137_s16 = sshll.u32 %s4516_s14, 4  ;;  %s118_s5 = int_to_ptr.vmem [resolvable:$true] %s117_s5  ;;  %s138_s16 = int_to_ptr.vmem [resolvable:$true] %s137_s16 }
  0x9c   :  { %s4422_s13 = scalar_lea.hbm %s4850_s8, 64 }
  0x9d   :  { %p4423_p2 = scmp.ne.s32.totalorder %s4850_s8, %s4422_s13  ;;  %p4426_p3 = scmp.lt.u32.totalorder %s4422_s13, %s4850_s8 }
  0x9f   :  { %p4428_p4 = pnand %p4426_p3, %p4423_p2 }
  0xa1   :  { %4431 = shalt.err (!%p4428_p4)
}
  0xa2   :  { %s4432_s6 = scalar_lea.vmem %s118_s5, 64  ;;  %p4437_p6 = scmp.lt.s32.totalorder %s118_s5, %s118_s5 }
  0xa3   :  { %p4433_p5 = scmp.ne.s32.totalorder %s118_s5, %s4432_s6  ;;  %p4438_p7 = scmp.lt.s32.totalorder %s4432_s6, %s4432_s6 }
  0xa5   :  { %p4439_p8 = por %p4438_p7, %p4437_p6 }
  0xa7   :  { %p4440_p9 = pnand %p4439_p8, %p4433_p5 }
  0xa9   :  { %4443 = shalt.err (!%p4440_p9)
}
  0xaa   :  { %120 = dma.hbm_to_vmem [thread:$0]  %s4850_s8, 64, %s118_s5, [#allocation15]  }
  0xab   :  { %s4444_s27 = scalar_lea.hbm %s4852_s10, 16 }
  0xac   :  { %p4445_p10 = scmp.ne.s32.totalorder %s4852_s10, %s4444_s27  ;;  %p4448_p11 = scmp.lt.u32.totalorder %s4444_s27, %s4852_s10 }
  0xae   :  { %p4450_p12 = pnand %p4448_p11, %p4445_p10 }
  0xb0   :  { %4453 = shalt.err (!%p4450_p12)
}
  0xb1   :  { %s4454_s24 = scalar_lea.vmem %s138_s16, 16  ;;  %s4458_s7 = scalar_lea.vmem %s138_s16, 32 }
  0xb2   :  { %p4455_p13 = scmp.ne.s32.totalorder %s138_s16, %s4454_s24  ;;  %p4459_p0 = scmp.lt.s32.totalorder %s138_s16, %s138_s16 }
  0xb3   :  { %p4460_p1 = scmp.lt.s32.totalorder %s4458_s7, %s4454_s24 }
  0xb5   :  { %p4461_p2 = por %p4460_p1, %p4459_p0 }
  0xb7   :  { %p4462_p3 = pnand %p4461_p2, %p4455_p13 }
  0xb9   :  { %4465 = shalt.err (!%p4462_p3)
}
  0xba   :  { %140 = dma.hbm_to_vmem [thread:$0]  %s4852_s10, 16, %s138_s16, [#allocation18]  }
  0xbb   :  { %4488 = dma.done.wait [#allocation3], 640  }
  0xbc   :  { %4489 = vsyncadd [#allocation3], 4294966656 }
  0xbd   :  { %4490 = dma.done.wait [#allocation6], 36864  }
  0xbe   :  { %4491 = vsyncadd [#allocation6], 4294930432 }
  0xbf   :  { %4492 = dma.done.wait [#allocation9], 144  }
  0xc0   :  { %4493 = vsyncadd [#allocation9], 4294967152 }
  0xc1   :  { %4494 = dma.done.wait [#allocation12], 4160  }
  0xc2   :  { %4495 = vsyncadd [#allocation12], 4294963136 }
  0xc3   :  { %4496 = dma.done.wait [#allocation15], 4160  }
  0xc4   :  { %4497 = vsyncadd [#allocation15], 4294963136 }
  0xc5   :  { %4498 = dma.done.wait [#allocation18], 32  }
  0xc6   :  { %4499 = vsyncadd [#allocation18], 4294967264  ;;  %v3727_v0 = vld [vmem:[#allocation7 + $0x4] ss:$16 sps:$4 sm:$0xff]   ;;  %v3729_v1 = vld [vmem:[#allocation7 + $0xc] ss:$16 sps:$4 sm:$0xff]   ;;  %v331_v37 = vlaneseq }
  0xc7   :  { %1234 = vmatprep.subr.bf16.mxu0 %v3727_v0  ;;  %v3731_v2 = vld [vmem:[#allocation7] ss:$16 sps:$4 sm:$0xff]   ;;  %v3732_v3 = vld [vmem:[#allocation7 + $0x8] ss:$16 sps:$4 sm:$0xff]   ;;  %1357 = vmatprep.subr.bf16.mxu1 %v3729_v1  ;;  %v3733_v4 = vld [vmem:[#allocation7 + $0x24] ss:$16 sps:$4 sm:$0xff]  }
  0xc8   :  { %1235 = vmatpush1.bf16.msra.mxu0 %v3731_v2  ;;  %1358 = vmatpush1.bf16.msra.mxu1 %v3732_v3  ;;  %v3735_v5 = vld [vmem:[#allocation7 + $0x2c] ss:$16 sps:$4 sm:$0xff]   ;;  %v3737_v6 = vld [vmem:[#allocation7 + $0x20] ss:$16 sps:$4 sm:$0xff]   ;;  %v3738_v7 = vld [vmem:[#allocation7 + $0x28] ss:$16 sps:$4 sm:$0xff]  }
  0xc9   :  { %1236 = vmatprep.subr.bf16.mxu0 %v3733_v4  ;;  %1359 = vmatprep.subr.bf16.mxu1 %v3735_v5  ;;  %v3739_v8 = vld [vmem:[#allocation7 + $0x44] ss:$16 sps:$4 sm:$0xff]   ;;  %v3741_v9 = vld [vmem:[#allocation7 + $0x4c] ss:$16 sps:$4 sm:$0xff]   ;;  %v3743_v10 = vld [vmem:[#allocation7 + $0x40] ss:$16 sps:$4 sm:$0xff]  }
  0xca   :  { %v3744_v11 = vld [vmem:[#allocation7 + $0x48] ss:$16 sps:$4 sm:$0xff]   ;;  %v3745_v12 = vld [vmem:[#allocation7 + $0x64] ss:$16 sps:$4 sm:$0xff]   ;;  %v3747_v13 = vld [vmem:[#allocation7 + $0x6c] ss:$16 sps:$4 sm:$0xff]  }
  0xcb   :  { %v3749_v14 = vld [vmem:[#allocation7 + $0x60] ss:$16 sps:$4 sm:$0xff]   ;;  %v3750_v15 = vld [vmem:[#allocation7 + $0x68] ss:$16 sps:$4 sm:$0xff]   ;;  %v3751_v16 = vld [vmem:[#allocation7 + $0x84] ss:$16 sps:$4 sm:$0xff]  }
  0xcc   :  { %1237 = vmatpush1.bf16.msra.mxu0 %v3737_v6  ;;  %1360 = vmatpush1.bf16.msra.mxu1 %v3738_v7  ;;  %v3753_v17 = vld [vmem:[#allocation7 + $0x8c] ss:$16 sps:$4 sm:$0xff]   ;;  %v3755_v18 = vld [vmem:[#allocation7 + $0x80] ss:$16 sps:$4 sm:$0xff]   ;;  %v3756_v19 = vld [vmem:[#allocation7 + $0x88] ss:$16 sps:$4 sm:$0xff]  }
  0xcd   :  { %1238 = vmatprep.subr.bf16.mxu0 %v3739_v8  ;;  %1361 = vmatprep.subr.bf16.mxu1 %v3741_v9  ;;  %v3757_v20 = vld [vmem:[#allocation7 + $0xa4] ss:$16 sps:$4 sm:$0xff]   ;;  %v3759_v21 = vld [vmem:[#allocation7 + $0xac] ss:$16 sps:$4 sm:$0xff]   ;;  %v3761_v22 = vld [vmem:[#allocation7 + $0xa0] ss:$16 sps:$4 sm:$0xff]  }
  0xce   :  { %v3762_v23 = vld [vmem:[#allocation7 + $0xa8] ss:$16 sps:$4 sm:$0xff]   ;;  %v3763_v24 = vld [vmem:[#allocation7 + $0xc4] ss:$16 sps:$4 sm:$0xff]   ;;  %v3765_v25 = vld [vmem:[#allocation7 + $0xcc] ss:$16 sps:$4 sm:$0xff]  }
  0xcf   :  { %v3767_v26 = vld [vmem:[#allocation7 + $0xc0] ss:$16 sps:$4 sm:$0xff]   ;;  %v3768_v27 = vld [vmem:[#allocation7 + $0xc8] ss:$16 sps:$4 sm:$0xff]   ;;  %v3769_v28 = vld [vmem:[#allocation7 + $0xe4] ss:$16 sps:$4 sm:$0xff]  }
  0xd0   :  { %1239 = vmatpush1.bf16.msra.mxu0 %v3743_v10  ;;  %1362 = vmatpush1.bf16.msra.mxu1 %v3744_v11  ;;  %v3771_v29 = vld [vmem:[#allocation7 + $0xec] ss:$16 sps:$4 sm:$0xff]   ;;  %v3773_v30 = vld [vmem:[#allocation7 + $0xe0] ss:$16 sps:$4 sm:$0xff]   ;;  %v3774_v31 = vld [vmem:[#allocation7 + $0xe8] ss:$16 sps:$4 sm:$0xff]  }
  0xd1   :  { %1240 = vmatprep.subr.bf16.mxu0 %v3745_v12  ;;  %1363 = vmatprep.subr.bf16.mxu1 %v3747_v13  ;;  %v3775_v32 = vld [vmem:[#allocation7 + $0x104] ss:$16 sps:$4 sm:$0xff]   ;;  %v3777_v33 = vld [vmem:[#allocation7 + $0x10c] ss:$16 sps:$4 sm:$0xff]   ;;  %v3779_v34 = vld [vmem:[#allocation7 + $0x100] ss:$16 sps:$4 sm:$0xff]  }
  0xd2   :  { %v3780_v35 = vld [vmem:[#allocation7 + $0x108] ss:$16 sps:$4 sm:$0xff]   ;;  %v3781_v36 = vld [vmem:[#allocation7 + $0x124] ss:$16 sps:$4 sm:$0xff]   ;;  %v3783_v38 = vld [vmem:[#allocation7 + $0x12c] ss:$16 sps:$4 sm:$0xff]  }
  0xd3   :  { %v3785_v39 = vld [vmem:[#allocation7 + $0x120] ss:$16 sps:$4 sm:$0xff]   ;;  %v3786_v40 = vld [vmem:[#allocation7 + $0x128] ss:$16 sps:$4 sm:$0xff]   ;;  %v3787_v41 = vld [vmem:[#allocation7 + $0x144] ss:$16 sps:$4 sm:$0xff]  }
  0xd4   :  { %1241 = vmatpush1.bf16.msra.mxu0 %v3749_v14  ;;  %1364 = vmatpush1.bf16.msra.mxu1 %v3750_v15  ;;  %v4723_v42 = vshrl.u32 %v331_v37, 7  ;;  %v3789_v43 = vld [vmem:[#allocation7 + $0x14c] ss:$16 sps:$4 sm:$0xff]   ;;  %v3791_v44 = vld [vmem:[#allocation7 + $0x140] ss:$16 sps:$4 sm:$0xff]   ;;  %vm1230_vm0 = vcmask 523264  }
  0xd5   :  { %1242 = vmatprep.subr.bf16.mxu0 %v3751_v16  ;;  %1365 = vmatprep.subr.bf16.mxu1 %v3753_v17  ;;  %v3792_v45 = vld [vmem:[#allocation7 + $0x148] ss:$16 sps:$4 sm:$0xff]   ;;  %v3793_v46 = vld [vmem:[#allocation7 + $0x164] ss:$16 sps:$4 sm:$0xff]   ;;  %v3795_v48 = vld [vmem:[#allocation7 + $0x16c] ss:$16 sps:$4 sm:$0xff]  }
  0xd6   :  { %v4726_v47 = vsub.s32 1, %v4723_v42  ;;  %v349_v49 = vsub.s32 4, %v4723_v42  ;;  %v4729_v50 = vld [vmem:[#allocation2 + $0x8] sm:$0xff]  ;;  %v3798_v53 = vld [vmem:[#allocation7 + $0x168] ss:$16 sps:$4 sm:$0xff]   ;;  %v4740_v1 = vsub.s32 0, %v4723_v42 }
  0xd7   :  { %v4731_v51 = vld [vmem:[#allocation8] sm:$0x1f]  ;;  %v3801_v56 = vld [vmem:[#allocation7 + $0x18c] ss:$16 sps:$4 sm:$0xff]   ;;  %v3804_v60 = vld [vmem:[#allocation7 + $0x188] ss:$16 sps:$4 sm:$0xff]  }
  0xd8   :  { %1243 = vmatpush1.bf16.msra.mxu0 %v3755_v18  ;;  %1366 = vmatpush1.bf16.msra.mxu1 %v3756_v19  ;;  %v3797_v52 = vld [vmem:[#allocation7 + $0x160] ss:$16 sps:$4 sm:$0xff]   ;;  %v338_v54 = vrot.slane %v4731_v51, %v4726_v47  ;;  %v3799_v55 = vld [vmem:[#allocation7 + $0x184] ss:$16 sps:$4 sm:$0xff]   ;;  %v4736_v57 = vrot.slane %v4731_v51, %v349_v49  ;;  %v3807_v63 = vld [vmem:[#allocation7 + $0x1ac] ss:$16 sps:$4 sm:$0xff]   ;;  %v334_v7 = vrot.slane %v4731_v51, %v4740_v1 }
  0xd9   :  { %1244 = vmatprep.subr.bf16.mxu0 %v3757_v20  ;;  %1367 = vmatprep.subr.bf16.mxu1 %v3759_v21  ;;  %v3803_v59 = vld [vmem:[#allocation7 + $0x180] ss:$16 sps:$4 sm:$0xff]   ;;  %v3805_v61 = vld [vmem:[#allocation7 + $0x1a4] ss:$16 sps:$4 sm:$0xff]   ;;  %v3810_v2 = vld [vmem:[#allocation7 + $0x1a8] ss:$16 sps:$4 sm:$0xff]  }
  0xda   :  { %v357_v58 = vmul.f32 %v338_v54, %v4729_v50  ;;  %v3809_v0 = vld [vmem:[#allocation7 + $0x1a0] ss:$16 sps:$4 sm:$0xff]   ;;  %v3811_v3 = vld [vmem:[#allocation7 + $0x1c4] ss:$16 sps:$4 sm:$0xff]   ;;  %v3813_v4 = vld [vmem:[#allocation7 + $0x1cc] ss:$16 sps:$4 sm:$0xff]  }
  0xdb   :  { %v3815_v5 = vld [vmem:[#allocation7 + $0x1c0] ss:$16 sps:$4 sm:$0xff]   ;;  %v3816_v6 = vld [vmem:[#allocation7 + $0x1c8] ss:$16 sps:$4 sm:$0xff]   ;;  %v3817_v8 = vld [vmem:[#allocation7 + $0x1e4] ss:$16 sps:$4 sm:$0xff]  }
  0xdc   :  { %1245 = vmatpush1.bf16.msra.mxu0 %v3761_v22  ;;  %1368 = vmatpush1.bf16.msra.mxu1 %v3762_v23  ;;  %v362_v62 = vpack.c.bf16 %v357_v58, %v357_v58  ;;  %v175_v9 = vld [vmem:[#allocation2] sm:$0xff]  ;;  %v3821_v11 = vld [vmem:[#allocation7 + $0x1e0] ss:$16 sps:$4 sm:$0xff]   ;;  %v3825_v14 = vld [vmem:[#allocation7 + $0x204] ss:$16 sps:$4 sm:$0xff]   ;;  %s4518_s10 = smov [#allocation20]  }
  0xdd   :  { %1246 = vmatprep.subr.bf16.mxu0 %v3763_v24  ;;  %1369 = vmatprep.subr.bf16.mxu1 %v3765_v25  ;;  %v3819_v10 = vld [vmem:[#allocation7 + $0x1ec] ss:$16 sps:$4 sm:$0xff]   ;;  %v356_v12 = vmul.f32 %v334_v7, %v175_v9  ;;  %v3822_v13 = vld [vmem:[#allocation7 + $0x1e8] ss:$16 sps:$4 sm:$0xff]   ;;  %v3823_v16 = vld [vmem:[#allocation7 + $0x200] ss:$16 sps:$4 sm:$0xff]  }
  0xde   :  { %1266 = vmatprep.mubr.bf16.mxu0 %v362_v62  ;;  %1389 = vmatprep.mubr.bf16.mxu1 %v362_v62  ;;  %v3828_v15 = vld [vmem:[#allocation7 + $0x20c] ss:$16 sps:$4 sm:$0xff]   ;;  %v3826_v18 = vld [vmem:[#allocation7 + $0x208] ss:$16 sps:$4 sm:$0xff]   ;;  %v3831_v19 = vld [vmem:[#allocation7 + $0x224] ss:$16 sps:$4 sm:$0xff]  }
  0xdf   :  { %v361_v17 = vpack.c.bf16 %v356_v12, %v356_v12  ;;  %v3834_v20 = vld [vmem:[#allocation7 + $0x22c] ss:$16 sps:$4 sm:$0xff]   ;;  %v3829_v21 = vld [vmem:[#allocation7 + $0x220] ss:$16 sps:$4 sm:$0xff]   ;;  %v3832_v22 = vld [vmem:[#allocation7 + $0x228] ss:$16 sps:$4 sm:$0xff]  }
  0xe0   :  { %1247 = vmatpush1.bf16.msra.mxu0 %v3767_v26  ;;  %1370 = vmatpush1.bf16.msra.mxu1 %v3768_v27  ;;  %v3837_v23 = vld [vmem:[#allocation7 + $0x244] ss:$16 sps:$4 sm:$0xff]   ;;  %v3840_v24 = vld [vmem:[#allocation7 + $0x24c] ss:$16 sps:$4 sm:$0xff]   ;;  %v3835_v25 = vld [vmem:[#allocation7 + $0x240] ss:$16 sps:$4 sm:$0xff]  }
  0xe1   :  { %1248 = vmatprep.subr.bf16.mxu0 %v3769_v28  ;;  %1371 = vmatprep.subr.bf16.mxu1 %v3771_v29  ;;  %v3838_v26 = vld [vmem:[#allocation7 + $0x248] ss:$16 sps:$4 sm:$0xff]   ;;  %v3843_v27 = vld [vmem:[#allocation7 + $0x264] ss:$16 sps:$4 sm:$0xff]   ;;  %v3846_v28 = vld [vmem:[#allocation7 + $0x26c] ss:$16 sps:$4 sm:$0xff]  }
  0xe2   :  { %v3841_v29 = vld [vmem:[#allocation7 + $0x260] ss:$16 sps:$4 sm:$0xff]   ;;  %v3858_v37 = vld [vmem:[#allocation7 + $0x2ac] ss:$16 sps:$4 sm:$0xff]   ;;  %v3867_v49 = vld [vmem:[#allocation7 + $0x2e4] ss:$16 sps:$4 sm:$0xff]  }
  0xe3   :  { %v3865_v54 = vld [vmem:[#allocation7 + $0x2e0] ss:$16 sps:$4 sm:$0xff]   ;;  %v3876_v58 = vld [vmem:[#allocation7 + $0x30c] ss:$16 sps:$4 sm:$0xff]   ;;  %v3892_v9 = vld [vmem:[#allocation7 + $0x368] ss:$16 sps:$4 sm:$0xff]  }
  0xe4   :  { %1249 = vmatpush1.bf16.msra.mxu0 %v3773_v30  ;;  %1372 = vmatpush1.bf16.msra.mxu1 %v3774_v31  ;;  %v3844_v30 = vld [vmem:[#allocation7 + $0x268] ss:$16 sps:$4 sm:$0xff]   ;;  %v3849_v31 = vld [vmem:[#allocation7 + $0x284] ss:$16 sps:$4 sm:$0xff]   ;;  %v3882_v62 = vld [vmem:[#allocation7 + $0x32c] ss:$16 sps:$4 sm:$0xff]  }
  0xe5   :  { %1250 = vmatprep.subr.bf16.mxu0 %v3775_v32  ;;  %1373 = vmatprep.subr.bf16.mxu1 %v3777_v33  ;;  %v3852_v32 = vld [vmem:[#allocation7 + $0x28c] ss:$16 sps:$4 sm:$0xff]   ;;  %v3847_v33 = vld [vmem:[#allocation7 + $0x280] ss:$16 sps:$4 sm:$0xff]   ;;  %s3234_s25 = sshll.u32 %s4518_s10, 4  ;;  %s3235_s25 = int_to_ptr.vmem [resolvable:$true] %s3234_s25 }
  0xe6   :  { %v3894_v7 = vld [vmem:[#allocation7 + $0x36c] ss:$16 sps:$4 sm:$0xff]   ;;  %v3895_v12 = vld [vmem:[#allocation7 + $0x380] ss:$16 sps:$4 sm:$0xff]   ;;  %s4466_s29 = scalar_lea.vmem %s3235_s25, 128  ;;  %p4471_p5 = scmp.lt.s32.totalorder %s3235_s25, %s3235_s25 }
  0xe7   :  { %p4467_p4 = scmp.ne.s32.totalorder %s3235_s25, %s4466_s29  ;;  %p4472_p6 = scmp.lt.s32.totalorder %s4466_s29, %s4466_s29 }
  0xe8   :  { %1251 = vmatpush1.bf16.msra.mxu0 %v3779_v34  ;;  %1374 = vmatpush1.bf16.msra.mxu1 %v3780_v35  ;;  %v4745_v34 = vsub.s32 3, %v4723_v42  ;;  %v3850_v35 = vld [vmem:[#allocation7 + $0x288] ss:$16 sps:$4 sm:$0xff]  }
  0xe9   :  { %1252 = vmatprep.subr.bf16.mxu0 %v3781_v36  ;;  %1375 = vmatprep.subr.bf16.mxu1 %v3783_v38  ;;  %v3855_v36 = vld [vmem:[#allocation7 + $0x2a4] ss:$16 sps:$4 sm:$0xff]   ;;  %v3853_v38 = vld [vmem:[#allocation7 + $0x2a0] ss:$16 sps:$4 sm:$0xff]   ;;  %p4473_p7 = por %p4472_p6, %p4471_p5 }
  0xeb   :  { %p4474_p8 = pnand %p4473_p7, %p4467_p4 }
  0xec   :  { %1253 = vmatpush1.bf16.msra.mxu0 %v3785_v39  ;;  %1376 = vmatpush1.bf16.msra.mxu1 %v3786_v40  ;;  %v346_v39 = vrot.slane %v4731_v51, %v4745_v34  ;;  %v3856_v40 = vld [vmem:[#allocation7 + $0x2a8] ss:$16 sps:$4 sm:$0xff]  }
  0xed   :  { %1254 = vmatprep.subr.bf16.mxu0 %v3787_v41  ;;  %1377 = vmatprep.subr.bf16.mxu1 %v3789_v43  ;;  %v3861_v41 = vld [vmem:[#allocation7 + $0x2c4] ss:$16 sps:$4 sm:$0xff]   ;;  %v3864_v43 = vld [vmem:[#allocation7 + $0x2cc] ss:$16 sps:$4 sm:$0xff]  }
  0xf0   :  { %1255 = vmatpush1.bf16.msra.mxu0 %v3791_v44  ;;  %1378 = vmatpush1.bf16.msra.mxu1 %v3792_v45  ;;  %v4749_v44 = vld [vmem:[#allocation2 + $0x18] sm:$0xff] }
  0xf1   :  { %1256 = vmatprep.subr.bf16.mxu0 %v3793_v46  ;;  %1379 = vmatprep.subr.bf16.mxu1 %v3795_v48  ;;  %v3859_v45 = vld [vmem:[#allocation7 + $0x2c0] ss:$16 sps:$4 sm:$0xff]   ;;  %v359_v46 = vmul.f32 %v346_v39, %v4749_v44  ;;  %v3862_v48 = vld [vmem:[#allocation7 + $0x2c8] ss:$16 sps:$4 sm:$0xff]   ;;  %v3936_v39 = vld [vmem:[#allocation7 + $0x44c] ss:$16 sps:$4 sm:$0xff]  }
  0xf4   :  { %1257 = vmatpush1.bf16.msra.mxu0 %v3797_v52  ;;  %1380 = vmatpush1.bf16.msra.mxu1 %v3798_v53  ;;  %v3870_v52 = vld [vmem:[#allocation7 + $0x2ec] ss:$16 sps:$4 sm:$0xff]   ;;  %v364_v53 = vpack.c.bf16 %v359_v46, %v359_v46  ;;  %v3939_v46 = vld [vmem:[#allocation7 + $0x464] ss:$16 sps:$4 sm:$0xff]  }
  0xf5   :  { %1258 = vmatprep.subr.bf16.mxu0 %v3799_v55  ;;  %1381 = vmatprep.subr.bf16.mxu1 %v3801_v56  ;;  %v3868_v55 = vld [vmem:[#allocation7 + $0x2e8] ss:$16 sps:$4 sm:$0xff]   ;;  %v3873_v56 = vld [vmem:[#allocation7 + $0x304] ss:$16 sps:$4 sm:$0xff]  }
  0xf8   :  { %1259 = vmatpush1.bf16.msra.mxu0 %v3803_v59  ;;  %1382 = vmatpush1.bf16.msra.mxu1 %v3804_v60  ;;  %v3871_v59 = vld [vmem:[#allocation7 + $0x300] ss:$16 sps:$4 sm:$0xff]   ;;  %v3874_v60 = vld [vmem:[#allocation7 + $0x308] ss:$16 sps:$4 sm:$0xff]  }
  0xf9   :  { %1260 = vmatprep.subr.bf16.mxu0 %v3805_v61  ;;  %1383 = vmatprep.subr.bf16.mxu1 %v3807_v63  ;;  %v3879_v61 = vld [vmem:[#allocation7 + $0x324] ss:$16 sps:$4 sm:$0xff]   ;;  %v3877_v63 = vld [vmem:[#allocation7 + $0x320] ss:$16 sps:$4 sm:$0xff]  }
  0xfc   :  { %1261 = vmatpush1.bf16.msra.mxu0 %v3809_v0  ;;  %1384 = vmatpush1.bf16.msra.mxu1 %v3810_v2  ;;  %v3880_v0 = vld [vmem:[#allocation7 + $0x328] ss:$16 sps:$4 sm:$0xff]   ;;  %v3885_v2 = vld [vmem:[#allocation7 + $0x344] ss:$16 sps:$4 sm:$0xff]  }
  0xfd   :  { %1262 = vmatprep.subr.bf16.mxu0 %v3811_v3  ;;  %1385 = vmatprep.subr.bf16.mxu1 %v3813_v4  ;;  %v3888_v3 = vld [vmem:[#allocation7 + $0x34c] ss:$16 sps:$4 sm:$0xff]   ;;  %v3883_v4 = vld [vmem:[#allocation7 + $0x340] ss:$16 sps:$4 sm:$0xff]  }
 0x100   :  { %1263 = vmatpush1.bf16.msra.mxu0 %v3815_v5  ;;  %1386 = vmatpush1.bf16.msra.mxu1 %v3816_v6  ;;  %v3886_v5 = vld [vmem:[#allocation7 + $0x348] ss:$16 sps:$4 sm:$0xff]   ;;  %v3891_v6 = vld [vmem:[#allocation7 + $0x364] ss:$16 sps:$4 sm:$0xff]  }
 0x101   :  { %1264 = vmatprep.subr.bf16.mxu0 %v3817_v8  ;;  %1387 = vmatprep.subr.bf16.mxu1 %v3819_v10  ;;  %v3889_v8 = vld [vmem:[#allocation7 + $0x360] ss:$16 sps:$4 sm:$0xff]   ;;  %v3897_v10 = vld [vmem:[#allocation7 + $0x384] ss:$16 sps:$4 sm:$0xff]  }
 0x104   :  { %1265 = vmatpush1.bf16.msra.mxu0 %v3821_v11  ;;  %1388 = vmatpush1.bf16.msra.mxu1 %v3822_v13  ;;  %v3900_v11 = vld [vmem:[#allocation7 + $0x38c] ss:$16 sps:$4 sm:$0xff]   ;;  %v3898_v13 = vld [vmem:[#allocation7 + $0x388] ss:$16 sps:$4 sm:$0xff]  }
 0x105   :  { %1275 = vmatprep.subr.bf16.mxu0 %v3825_v14  ;;  %1398 = vmatprep.subr.bf16.mxu1 %v3828_v15  ;;  %v3903_v14 = vld [vmem:[#allocation7 + $0x3a4] ss:$16 sps:$4 sm:$0xff]   ;;  %v3906_v15 = vld [vmem:[#allocation7 + $0x3ac] ss:$16 sps:$4 sm:$0xff]  }
 0x107   :  { %1267 = vmatmul.mubr.bf16.vlgmr.msra.gmra.mrb[0].mxu0 %v361_v17  ;;  %1390 = vmatmul.mubr.bf16.vlgmr.msra.gmra.mrb[0].mxu1 %v361_v17  ;;  %v3901_v17 = vld [vmem:[#allocation7 + $0x3a0] ss:$16 sps:$4 sm:$0xff]  }
 0x108   :  { %1276 = vmatpush1.bf16.msra.mxu0 %v3823_v16  ;;  %1399 = vmatpush1.bf16.msra.mxu1 %v3826_v18  ;;  %v4753_v16 = vsub.s32 2, %v4723_v42  ;;  %v3904_v18 = vld [vmem:[#allocation7 + $0x3a8] ss:$16 sps:$4 sm:$0xff]   ;;  %v3915_v42 = vld [vmem:[#allocation7 + $0x3e4] ss:$16 sps:$4 sm:$0xff]  }
 0x109   :  { %1277 = vmatprep.subr.bf16.mxu0 %v3831_v19  ;;  %1400 = vmatprep.subr.bf16.mxu1 %v3834_v20  ;;  %v3909_v19 = vld [vmem:[#allocation7 + $0x3c4] ss:$16 sps:$4 sm:$0xff]   ;;  %v3912_v20 = vld [vmem:[#allocation7 + $0x3cc] ss:$16 sps:$4 sm:$0xff]  }
 0x10a   :  { %1307 = vmatprep.mubr.bf16.mxu0 %v364_v53  ;;  %1430 = vmatprep.mubr.bf16.mxu1 %v364_v53  ;;  %v3940_v53 = vld [vmem:[#allocation7 + $0x468] ss:$16 sps:$4 sm:$0xff]  }
 0x10c   :  { %1278 = vmatpush1.bf16.msra.mxu0 %v3829_v21  ;;  %1401 = vmatpush1.bf16.msra.mxu1 %v3832_v22  ;;  %v3907_v21 = vld [vmem:[#allocation7 + $0x3c0] ss:$16 sps:$4 sm:$0xff]   ;;  %v342_v22 = vrot.slane %v4731_v51, %v4753_v16 }
 0x10d   :  { %1279 = vmatprep.subr.bf16.mxu0 %v3837_v23  ;;  %1402 = vmatprep.subr.bf16.mxu1 %v3840_v24  ;;  %v3910_v23 = vld [vmem:[#allocation7 + $0x3c8] ss:$16 sps:$4 sm:$0xff]  }
 0x10e   :  { %v4757_v24 = vld [vmem:[#allocation2 + $0x10] sm:$0xff] }
 0x110   :  { %1280 = vmatpush1.bf16.msra.mxu0 %v3835_v25  ;;  %1403 = vmatpush1.bf16.msra.mxu1 %v3838_v26  ;;  %v3918_v25 = vld [vmem:[#allocation7 + $0x3ec] ss:$16 sps:$4 sm:$0xff]   ;;  %v358_v26 = vmul.f32 %v342_v22, %v4757_v24  ;;  %v3990_v22 = vld [vmem:[#allocation5 + $0x2e4] ss:$16 sps:$4 sm:$0xff]  }
 0x111   :  { %1281 = vmatprep.subr.bf16.mxu0 %v3843_v27  ;;  %1404 = vmatprep.subr.bf16.mxu1 %v3846_v28  ;;  %v3913_v27 = vld [vmem:[#allocation7 + $0x3e0] ss:$16 sps:$4 sm:$0xff]   ;;  %v3916_v28 = vld [vmem:[#allocation7 + $0x3e8] ss:$16 sps:$4 sm:$0xff]  }
 0x112   :  { %v363_v51 = vpack.c.bf16 %v358_v26, %v358_v26  ;;  %v3996_v26 = vld [vmem:[#allocation5 + $0x304] ss:$16 sps:$4 sm:$0xff]  }
 0x114   :  { %1282 = vmatpush1.bf16.msra.mxu0 %v3841_v29  ;;  %1405 = vmatpush1.bf16.msra.mxu1 %v3844_v30  ;;  %v3921_v29 = vld [vmem:[#allocation7 + $0x404] ss:$16 sps:$4 sm:$0xff]   ;;  %v3924_v30 = vld [vmem:[#allocation7 + $0x40c] ss:$16 sps:$4 sm:$0xff]  }
 0x115   :  { %1283 = vmatprep.subr.bf16.mxu0 %v3849_v31  ;;  %1406 = vmatprep.subr.bf16.mxu1 %v3852_v32  ;;  %v3919_v31 = vld [vmem:[#allocation7 + $0x400] ss:$16 sps:$4 sm:$0xff]   ;;  %v3922_v32 = vld [vmem:[#allocation7 + $0x408] ss:$16 sps:$4 sm:$0xff]  }
 0x118   :  { %1284 = vmatpush1.bf16.msra.mxu0 %v3847_v33  ;;  %1407 = vmatpush1.bf16.msra.mxu1 %v3850_v35  ;;  %v3927_v33 = vld [vmem:[#allocation7 + $0x424] ss:$16 sps:$4 sm:$0xff]   ;;  %v3930_v35 = vld [vmem:[#allocation7 + $0x42c] ss:$16 sps:$4 sm:$0xff]  }
 0x119   :  { %1285 = vmatprep.subr.bf16.mxu0 %v3855_v36  ;;  %1408 = vmatprep.subr.bf16.mxu1 %v3858_v37  ;;  %v3925_v36 = vld [vmem:[#allocation7 + $0x420] ss:$16 sps:$4 sm:$0xff]   ;;  %v3928_v37 = vld [vmem:[#allocation7 + $0x428] ss:$16 sps:$4 sm:$0xff]  }
 0x11c   :  { %1286 = vmatpush1.bf16.msra.mxu0 %v3853_v38  ;;  %1409 = vmatpush1.bf16.msra.mxu1 %v3856_v40  ;;  %v3933_v38 = vld [vmem:[#allocation7 + $0x444] ss:$16 sps:$4 sm:$0xff]   ;;  %v4517_v40 = vmov 0  }
 0x11d   :  { %1287 = vmatprep.subr.bf16.mxu0 %v3861_v41  ;;  %1410 = vmatprep.subr.bf16.mxu1 %v3864_v43  ;;  %v3931_v41 = vld [vmem:[#allocation7 + $0x440] ss:$16 sps:$4 sm:$0xff]   ;;  %v3934_v43 = vld [vmem:[#allocation7 + $0x448] ss:$16 sps:$4 sm:$0xff]  }
 0x120   :  { %1288 = vmatpush1.bf16.msra.mxu0 %v3859_v45  ;;  %1411 = vmatpush1.bf16.msra.mxu1 %v3862_v48  ;;  %v4762_v45 = vld [vmem:[#allocation2 + $0x20] sm:$0xff] }
 0x121   :  { %1289 = vmatprep.subr.bf16.mxu0 %v3867_v49  ;;  %1412 = vmatprep.subr.bf16.mxu1 %v3870_v52  ;;  %v3942_v48 = vld [vmem:[#allocation7 + $0x46c] ss:$16 sps:$4 sm:$0xff]   ;;  %v360_v49 = vmul.f32 %v4736_v57, %v4762_v45  ;;  %v3937_v52 = vld [vmem:[#allocation7 + $0x460] ss:$16 sps:$4 sm:$0xff]   ;;  %v4768_v57 = vpack.c.bf16 %v4729_v50, %v4729_v50 }
 0x122   :  { %v3955_v50 = vld [vmem:[#allocation5 + $0x40] ss:$16 sps:$4 sm:$0xff]  }
 0x124   :  { %1290 = vmatpush1.bf16.msra.mxu0 %v3865_v54  ;;  %1413 = vmatpush1.bf16.msra.mxu1 %v3868_v55  ;;  %v3945_v54 = vld [vmem:[#allocation5 + $0x4] ss:$16 sps:$4 sm:$0xff]  }
 0x125   :  { %1291 = vmatprep.subr.bf16.mxu0 %v3873_v56  ;;  %1414 = vmatprep.subr.bf16.mxu1 %v3876_v58  ;;  %v3948_v55 = vld [vmem:[#allocation5 + $0x204] ss:$16 sps:$4 sm:$0xff]   ;;  %v365_v56 = vpack.c.bf16 %v360_v49, %v360_v49  ;;  %v3943_v58 = vld [vmem:[#allocation5] ss:$16 sps:$4 sm:$0xff]  }
 0x126   :  { %v4018_v49 = vld [vmem:[#allocation5 + $0x380] ss:$16 sps:$4 sm:$0xff]  }
 0x128   :  { %1292 = vmatpush1.bf16.msra.mxu0 %v3871_v59  ;;  %1415 = vmatpush1.bf16.msra.mxu1 %v3874_v60  ;;  %v3946_v59 = vld [vmem:[#allocation5 + $0x200] ss:$16 sps:$4 sm:$0xff]   ;;  %v3951_v60 = vld [vmem:[#allocation5 + $0x24] ss:$16 sps:$4 sm:$0xff]  }
 0x129   :  { %1293 = vmatprep.subr.bf16.mxu0 %v3879_v61  ;;  %1416 = vmatprep.subr.bf16.mxu1 %v3882_v62  ;;  %v3954_v61 = vld [vmem:[#allocation5 + $0x224] ss:$16 sps:$4 sm:$0xff]   ;;  %v4772_v62 = vpack.c.bf16 %v4749_v44, %v4749_v44  ;;  %v3958_v44 = vld [vmem:[#allocation5 + $0x240] ss:$16 sps:$4 sm:$0xff]  }
 0x12c   :  { %1294 = vmatpush1.bf16.msra.mxu0 %v3877_v63  ;;  %1417 = vmatpush1.bf16.msra.mxu1 %v3880_v0  ;;  %v3949_v63 = vld [vmem:[#allocation5 + $0x20] ss:$16 sps:$4 sm:$0xff]  }
 0x12d   :  { %1295 = vmatprep.subr.bf16.mxu0 %v3885_v2  ;;  %1418 = vmatprep.subr.bf16.mxu1 %v3888_v3  ;;  %v3952_v0 = vld [vmem:[#allocation5 + $0x220] ss:$16 sps:$4 sm:$0xff]   ;;  %v3957_v2 = vld [vmem:[#allocation5 + $0x44] ss:$16 sps:$4 sm:$0xff]  }
 0x12e   :  { %v3960_v3 = vld [vmem:[#allocation5 + $0x244] ss:$16 sps:$4 sm:$0xff]  }
 0x130   :  { %1296 = vmatpush1.bf16.msra.mxu0 %v3883_v4  ;;  %1419 = vmatpush1.bf16.msra.mxu1 %v3886_v5  ;;  %v3963_v4 = vld [vmem:[#allocation5 + $0x64] ss:$16 sps:$4 sm:$0xff]  }
 0x131   :  { %1297 = vmatprep.subr.bf16.mxu0 %v3891_v6  ;;  %1420 = vmatprep.subr.bf16.mxu1 %v3894_v7  ;;  %v3966_v5 = vld [vmem:[#allocation5 + $0x264] ss:$16 sps:$4 sm:$0xff]   ;;  %v3961_v6 = vld [vmem:[#allocation5 + $0x60] ss:$16 sps:$4 sm:$0xff]  }
 0x132   :  { %v3964_v7 = vld [vmem:[#allocation5 + $0x260] ss:$16 sps:$4 sm:$0xff]  }
 0x134   :  { %1298 = vmatpush1.bf16.msra.mxu0 %v3889_v8  ;;  %1421 = vmatpush1.bf16.msra.mxu1 %v3892_v9  ;;  %v3969_v8 = vld [vmem:[#allocation5 + $0x84] ss:$16 sps:$4 sm:$0xff]  }
 0x135   :  { %1299 = vmatprep.subr.bf16.mxu0 %v3897_v10  ;;  %1422 = vmatprep.subr.bf16.mxu1 %v3900_v11  ;;  %v3972_v9 = vld [vmem:[#allocation5 + $0x284] ss:$16 sps:$4 sm:$0xff]   ;;  %v3967_v10 = vld [vmem:[#allocation5 + $0x80] ss:$16 sps:$4 sm:$0xff]  }
 0x136   :  { %v3970_v11 = vld [vmem:[#allocation5 + $0x280] ss:$16 sps:$4 sm:$0xff]  }
 0x138   :  { %1300 = vmatpush1.bf16.msra.mxu0 %v3895_v12  ;;  %1423 = vmatpush1.bf16.msra.mxu1 %v3898_v13  ;;  %v3975_v12 = vld [vmem:[#allocation5 + $0xa4] ss:$16 sps:$4 sm:$0xff]  }
 0x139   :  { %1301 = vmatprep.subr.bf16.mxu0 %v3903_v14  ;;  %1424 = vmatprep.subr.bf16.mxu1 %v3906_v15  ;;  %v3978_v13 = vld [vmem:[#allocation5 + $0x2a4] ss:$16 sps:$4 sm:$0xff]   ;;  %v3973_v14 = vld [vmem:[#allocation5 + $0xa0] ss:$16 sps:$4 sm:$0xff]  }
 0x13a   :  { %v3976_v15 = vld [vmem:[#allocation5 + $0x2a0] ss:$16 sps:$4 sm:$0xff]  }
 0x13c   :  { %1302 = vmatpush1.bf16.msra.mxu0 %v3901_v17  ;;  %1425 = vmatpush1.bf16.msra.mxu1 %v3904_v18  ;;  %v3981_v17 = vld [vmem:[#allocation5 + $0xc4] ss:$16 sps:$4 sm:$0xff]  }
 0x13d   :  { %1303 = vmatprep.subr.bf16.mxu0 %v3909_v19  ;;  %1426 = vmatprep.subr.bf16.mxu1 %v3912_v20  ;;  %v3984_v18 = vld [vmem:[#allocation5 + $0x2c4] ss:$16 sps:$4 sm:$0xff]   ;;  %v3979_v19 = vld [vmem:[#allocation5 + $0xc0] ss:$16 sps:$4 sm:$0xff]  }
 0x13e   :  { %v3982_v20 = vld [vmem:[#allocation5 + $0x2c0] ss:$16 sps:$4 sm:$0xff]  }
 0x140   :  { %1304 = vmatpush1.bf16.msra.mxu0 %v3907_v21  ;;  %1427 = vmatpush1.bf16.msra.mxu1 %v3910_v23  ;;  %v3987_v21 = vld [vmem:[#allocation5 + $0xe4] ss:$16 sps:$4 sm:$0xff]   ;;  %v3985_v23 = vld [vmem:[#allocation5 + $0xe0] ss:$16 sps:$4 sm:$0xff]  }
 0x141   :  { %1305 = vmatprep.subr.bf16.mxu0 %v3915_v42  ;;  %1428 = vmatprep.subr.bf16.mxu1 %v3918_v25  ;;  %v3988_v42 = vld [vmem:[#allocation5 + $0x2e0] ss:$16 sps:$4 sm:$0xff]   ;;  %v3993_v25 = vld [vmem:[#allocation5 + $0x104] ss:$16 sps:$4 sm:$0xff]  }
 0x144   :  { %1306 = vmatpush1.bf16.msra.mxu0 %v3913_v27  ;;  %1429 = vmatpush1.bf16.msra.mxu1 %v3916_v28  ;;  %v3991_v27 = vld [vmem:[#allocation5 + $0x100] ss:$16 sps:$4 sm:$0xff]  }
 0x145   :  { %1316 = vmatprep.subr.bf16.mxu0 %v3921_v29  ;;  %1439 = vmatprep.subr.bf16.mxu1 %v3924_v30  ;;  %v3994_v28 = vld [vmem:[#allocation5 + $0x300] ss:$16 sps:$4 sm:$0xff]   ;;  %v3999_v29 = vld [vmem:[#allocation5 + $0x124] ss:$16 sps:$4 sm:$0xff]  }
 0x146   :  { %v4002_v30 = vld [vmem:[#allocation5 + $0x324] ss:$16 sps:$4 sm:$0xff]  }
 0x147   :  { %1308 = vmatmul.mubr.bf16.vlgmr.msra.gmra.mrb[0].mxu0 %v363_v51  ;;  %1431 = vmatmul.mubr.bf16.vlgmr.msra.gmra.mrb[0].mxu1 %v363_v51  ;;  %v3997_v51 = vld [vmem:[#allocation5 + $0x120] ss:$16 sps:$4 sm:$0xff]  }
 0x148   :  { %1317 = vmatpush1.bf16.msra.mxu0 %v3919_v31  ;;  %1440 = vmatpush1.bf16.msra.mxu1 %v3922_v32  ;;  %v4000_v31 = vld [vmem:[#allocation5 + $0x320] ss:$16 sps:$4 sm:$0xff]   ;;  %v4005_v32 = vld [vmem:[#allocation5 + $0x144] ss:$16 sps:$4 sm:$0xff]  }
 0x149   :  { %1318 = vmatprep.subr.bf16.mxu0 %v3927_v33  ;;  %1441 = vmatprep.subr.bf16.mxu1 %v3930_v35  ;;  %v4008_v33 = vld [vmem:[#allocation5 + $0x344] ss:$16 sps:$4 sm:$0xff]   ;;  %v4003_v35 = vld [vmem:[#allocation5 + $0x140] ss:$16 sps:$4 sm:$0xff]  }
 0x14a   :  { %1348 = vmatprep.mubr.bf16.mxu0 %v4517_v40  ;;  %1471 = vmatprep.mubr.bf16.mxu1 %v4517_v40 }
 0x14c   :  { %1319 = vmatpush1.bf16.msra.mxu0 %v3925_v36  ;;  %1442 = vmatpush1.bf16.msra.mxu1 %v3928_v37  ;;  %v4006_v36 = vld [vmem:[#allocation5 + $0x340] ss:$16 sps:$4 sm:$0xff]   ;;  %v4011_v37 = vld [vmem:[#allocation5 + $0x164] ss:$16 sps:$4 sm:$0xff]  }
 0x14d   :  { %1320 = vmatprep.subr.bf16.mxu0 %v3933_v38  ;;  %1443 = vmatprep.subr.bf16.mxu1 %v3936_v39  ;;  %v4014_v38 = vld [vmem:[#allocation5 + $0x364] ss:$16 sps:$4 sm:$0xff]   ;;  %v4009_v39 = vld [vmem:[#allocation5 + $0x160] ss:$16 sps:$4 sm:$0xff]  }
 0x150   :  { %1321 = vmatpush1.bf16.msra.mxu0 %v3931_v41  ;;  %1444 = vmatpush1.bf16.msra.mxu1 %v3934_v43  ;;  %v4012_v41 = vld [vmem:[#allocation5 + $0x360] ss:$16 sps:$4 sm:$0xff]   ;;  %v4017_v43 = vld [vmem:[#allocation5 + $0x184] ss:$16 sps:$4 sm:$0xff]  }
 0x151   :  { %1322 = vmatprep.subr.bf16.mxu0 %v3939_v46  ;;  %1445 = vmatprep.subr.bf16.mxu1 %v3942_v48  ;;  %v4020_v46 = vld [vmem:[#allocation5 + $0x384] ss:$16 sps:$4 sm:$0xff]   ;;  %v4015_v48 = vld [vmem:[#allocation5 + $0x180] ss:$16 sps:$4 sm:$0xff]  }
 0x154   :  { %1323 = vmatpush1.bf16.msra.mxu0 %v3937_v52  ;;  %1446 = vmatpush1.bf16.msra.mxu1 %v3940_v53  ;;  %v4023_v52 = vld [vmem:[#allocation5 + $0x1a4] ss:$16 sps:$4 sm:$0xff]  }
 0x155   :  { %2229 = vmatprep.subr.bf16.mxu0 %v3945_v54  ;;  %2270 = vmatprep.subr.bf16.mxu1 %v3948_v55  ;;  %v4026_v53 = vld [vmem:[#allocation5 + $0x3a4] ss:$16 sps:$4 sm:$0xff]   ;;  %v4021_v54 = vld [vmem:[#allocation5 + $0x1a0] ss:$16 sps:$4 sm:$0xff]  }
 0x156   :  { %v4024_v55 = vld [vmem:[#allocation5 + $0x3a0] ss:$16 sps:$4 sm:$0xff]  }
 0x157   :  { %3392 = vmatmul.mubr.msk.bf16.vlgmr.msra.gmra.mrb[0].mxu0 %vm1230_vm0, %v365_v56  ;;  %3393 = vmatmul.mubr.msk.bf16.vlgmr.msra.gmra.mrb[0].mxu1 %vm1230_vm0, %v365_v56  ;;  %v4029_v56 = vld [vmem:[#allocation5 + $0x1c4] ss:$16 sps:$4 sm:$0xff]  }
 0x158   :  { %2230 = vmatpush1.bf16.msra.mxu0 %v3943_v58  ;;  %2271 = vmatpush1.bf16.msra.mxu1 %v3946_v59  ;;  %v4032_v58 = vld [vmem:[#allocation5 + $0x3c4] ss:$16 sps:$4 sm:$0xff]   ;;  %v4027_v59 = vld [vmem:[#allocation5 + $0x1c0] ss:$16 sps:$4 sm:$0xff]  }
 0x159   :  { %2231 = vmatprep.subr.bf16.mxu0 %v3951_v60  ;;  %2272 = vmatprep.subr.bf16.mxu1 %v3954_v61  ;;  %v4030_v60 = vld [vmem:[#allocation5 + $0x3c0] ss:$16 sps:$4 sm:$0xff]   ;;  %v4035_v61 = vld [vmem:[#allocation5 + $0x1e4] ss:$16 sps:$4 sm:$0xff]  }
 0x15a   :  { %2261 = vmatprep.mubr.bf16.mxu0 %v4768_v57  ;;  %2302 = vmatprep.mubr.bf16.mxu1 %v4772_v62 }
 0x15c   :  { %2232 = vmatpush1.bf16.msra.mxu0 %v3949_v63  ;;  %2273 = vmatpush1.bf16.msra.mxu1 %v3952_v0  ;;  %v4038_v63 = vld [vmem:[#allocation5 + $0x3e4] ss:$16 sps:$4 sm:$0xff]   ;;  %v4033_v0 = vld [vmem:[#allocation5 + $0x1e0] ss:$16 sps:$4 sm:$0xff]  }
 0x15d   :  { %2233 = vmatprep.subr.bf16.mxu0 %v3957_v2  ;;  %2274 = vmatprep.subr.bf16.mxu1 %v3960_v3  ;;  %v4036_v2 = vld [vmem:[#allocation5 + $0x3e0] ss:$16 sps:$4 sm:$0xff]   ;;  %v4041_v3 = vld [vmem:[#allocation5 + $0x404] ss:$16 sps:$4 sm:$0xff]  }
 0x160   :  { %2234 = vmatpush1.bf16.msra.mxu0 %v3955_v50  ;;  %2275 = vmatpush1.bf16.msra.mxu1 %v3958_v44  ;;  %v4044_v50 = vld [vmem:[#allocation5 + $0xc] ss:$16 sps:$4 sm:$0xff]   ;;  %v4039_v44 = vld [vmem:[#allocation5 + $0x400] ss:$16 sps:$4 sm:$0xff]  }
 0x161   :  { %2235 = vmatprep.subr.bf16.mxu0 %v3963_v4  ;;  %2276 = vmatprep.subr.bf16.mxu1 %v3966_v5  ;;  %v4042_v4 = vld [vmem:[#allocation5 + $0x8] ss:$16 sps:$4 sm:$0xff]  }
 0x162   :  { %v4223_v5 = vld [vmem:[#allocation2] sm:$0xff] }
 0x164   :  { %2236 = vmatpush1.bf16.msra.mxu0 %v3961_v6  ;;  %2277 = vmatpush1.bf16.msra.mxu1 %v3964_v7  ;;  %v4778_v6 = vpack.c.bf16 %v4223_v5, %v4223_v5  ;;  %v4782_v7 = vpack.c.bf16 %v4757_v24, %v4757_v24  ;;  %v4051_v24 = vld [vmem:[#allocation5 + $0x440] ss:$16 sps:$4 sm:$0xff]   ;;  %v4126_v5 = vld [vmem:[#allocation5 + $0x348] ss:$16 sps:$4 sm:$0xff]  }
 0x165   :  { %2237 = vmatprep.subr.bf16.mxu0 %v3969_v8  ;;  %2278 = vmatprep.subr.bf16.mxu1 %v3972_v9  ;;  %v4047_v8 = vld [vmem:[#allocation5 + $0x424] ss:$16 sps:$4 sm:$0xff]   ;;  %v4050_v9 = vld [vmem:[#allocation5 + $0x2c] ss:$16 sps:$4 sm:$0xff]  }
 0x168   :  { %2238 = vmatpush1.bf16.msra.mxu0 %v3967_v10  ;;  %2279 = vmatpush1.bf16.msra.mxu1 %v3970_v11  ;;  %v4045_v10 = vld [vmem:[#allocation5 + $0x420] ss:$16 sps:$4 sm:$0xff]   ;;  %v4048_v11 = vld [vmem:[#allocation5 + $0x28] ss:$16 sps:$4 sm:$0xff]  }
 0x169   :  { %2239 = vmatprep.subr.bf16.mxu0 %v3975_v12  ;;  %2280 = vmatprep.subr.bf16.mxu1 %v3978_v13  ;;  %v4053_v12 = vld [vmem:[#allocation5 + $0x444] ss:$16 sps:$4 sm:$0xff]   ;;  %v4056_v13 = vld [vmem:[#allocation5 + $0x4c] ss:$16 sps:$4 sm:$0xff]  }
 0x16c   :  { %2240 = vmatpush1.bf16.msra.mxu0 %v3973_v14  ;;  %2281 = vmatpush1.bf16.msra.mxu1 %v3976_v15  ;;  %v4054_v14 = vld [vmem:[#allocation5 + $0x48] ss:$16 sps:$4 sm:$0xff]   ;;  %v4059_v15 = vld [vmem:[#allocation5 + $0x464] ss:$16 sps:$4 sm:$0xff]  }
 0x16d   :  { %2241 = vmatprep.subr.bf16.mxu0 %v3981_v17  ;;  %2282 = vmatprep.subr.bf16.mxu1 %v3984_v18  ;;  %v4062_v17 = vld [vmem:[#allocation5 + $0x6c] ss:$16 sps:$4 sm:$0xff]   ;;  %v4057_v18 = vld [vmem:[#allocation5 + $0x460] ss:$16 sps:$4 sm:$0xff]  }
 0x170   :  { %2242 = vmatpush1.bf16.msra.mxu0 %v3979_v19  ;;  %2283 = vmatpush1.bf16.msra.mxu1 %v3982_v20  ;;  %v4060_v19 = vld [vmem:[#allocation5 + $0x68] ss:$16 sps:$4 sm:$0xff]   ;;  %v4065_v20 = vld [vmem:[#allocation5 + $0x8c] ss:$16 sps:$4 sm:$0xff]  }
 0x171   :  { %2243 = vmatprep.subr.bf16.mxu0 %v3987_v21  ;;  %2284 = vmatprep.subr.bf16.mxu1 %v3990_v22  ;;  %v4068_v21 = vld [vmem:[#allocation5 + $0x20c] ss:$16 sps:$4 sm:$0xff]   ;;  %v4063_v22 = vld [vmem:[#allocation5 + $0x88] ss:$16 sps:$4 sm:$0xff]  }
 0x174   :  { %2244 = vmatpush1.bf16.msra.mxu0 %v3985_v23  ;;  %2285 = vmatpush1.bf16.msra.mxu1 %v3988_v42  ;;  %v4066_v23 = vld [vmem:[#allocation5 + $0x208] ss:$16 sps:$4 sm:$0xff]   ;;  %v4790_v42 = vpack.c.bf16 %v4762_v45, %v4762_v45 }
 0x175   :  { %2245 = vmatprep.subr.bf16.mxu0 %v3993_v25  ;;  %2286 = vmatprep.subr.bf16.mxu1 %v3996_v26  ;;  %v4074_v25 = vld [vmem:[#allocation5 + $0x22c] ss:$16 sps:$4 sm:$0xff]   ;;  %v4069_v26 = vld [vmem:[#allocation5 + $0xa8] ss:$16 sps:$4 sm:$0xff]  }
 0x176   :  { %v4078_v45 = vld [vmem:[#allocation5 + $0x248] ss:$16 sps:$4 sm:$0xff]  }
 0x178   :  { %2246 = vmatpush1.bf16.msra.mxu0 %v3991_v27  ;;  %2287 = vmatpush1.bf16.msra.mxu1 %v3994_v28  ;;  %v4072_v27 = vld [vmem:[#allocation5 + $0x228] ss:$16 sps:$4 sm:$0xff]   ;;  %v4077_v28 = vld [vmem:[#allocation5 + $0xcc] ss:$16 sps:$4 sm:$0xff]  }
 0x179   :  { %2247 = vmatprep.subr.bf16.mxu0 %v3999_v29  ;;  %2288 = vmatprep.subr.bf16.mxu1 %v4002_v30  ;;  %v4080_v29 = vld [vmem:[#allocation5 + $0x24c] ss:$16 sps:$4 sm:$0xff]   ;;  %v4075_v30 = vld [vmem:[#allocation5 + $0xc8] ss:$16 sps:$4 sm:$0xff]  }
 0x17c   :  { %2248 = vmatpush1.bf16.msra.mxu0 %v3997_v51  ;;  %2289 = vmatpush1.bf16.msra.mxu1 %v4000_v31  ;;  %v4083_v51 = vld [vmem:[#allocation5 + $0xec] ss:$16 sps:$4 sm:$0xff]  }
 0x17d   :  { %2249 = vmatprep.subr.bf16.mxu0 %v4005_v32  ;;  %2290 = vmatprep.subr.bf16.mxu1 %v4008_v33  ;;  %v4086_v31 = vld [vmem:[#allocation5 + $0x26c] ss:$16 sps:$4 sm:$0xff]   ;;  %v4081_v32 = vld [vmem:[#allocation5 + $0xe8] ss:$16 sps:$4 sm:$0xff]  }
 0x17e   :  { %v4084_v33 = vld [vmem:[#allocation5 + $0x268] ss:$16 sps:$4 sm:$0xff]  }
 0x180   :  { %2250 = vmatpush1.bf16.msra.mxu0 %v4003_v35  ;;  %2291 = vmatpush1.bf16.msra.mxu1 %v4006_v36  ;;  %v4089_v35 = vld [vmem:[#allocation5 + $0x10c] ss:$16 sps:$4 sm:$0xff]  }
 0x181   :  { %2251 = vmatprep.subr.bf16.mxu0 %v4011_v37  ;;  %2292 = vmatprep.subr.bf16.mxu1 %v4014_v38  ;;  %v4092_v36 = vld [vmem:[#allocation5 + $0x28c] ss:$16 sps:$4 sm:$0xff]   ;;  %v4087_v37 = vld [vmem:[#allocation5 + $0x108] ss:$16 sps:$4 sm:$0xff]  }
 0x182   :  { %v4090_v38 = vld [vmem:[#allocation5 + $0x288] ss:$16 sps:$4 sm:$0xff]  }
 0x184   :  { %2252 = vmatpush1.bf16.msra.mxu0 %v4009_v39  ;;  %2293 = vmatpush1.bf16.msra.mxu1 %v4012_v41  ;;  %v4098_v39 = vld [vmem:[#allocation5 + $0x2ac] ss:$16 sps:$4 sm:$0xff]   ;;  %v4093_v41 = vld [vmem:[#allocation5 + $0x128] ss:$16 sps:$4 sm:$0xff]  }
 0x185   :  { %2253 = vmatprep.subr.bf16.mxu0 %v4017_v43  ;;  %2294 = vmatprep.subr.bf16.mxu1 %v4020_v46  ;;  %v4096_v43 = vld [vmem:[#allocation5 + $0x2a8] ss:$16 sps:$4 sm:$0xff]   ;;  %v4101_v46 = vld [vmem:[#allocation5 + $0x14c] ss:$16 sps:$4 sm:$0xff]  }
 0x188   :  { %2254 = vmatpush1.bf16.msra.mxu0 %v4015_v48  ;;  %2295 = vmatpush1.bf16.msra.mxu1 %v4018_v49  ;;  %v4104_v48 = vld [vmem:[#allocation5 + $0x2cc] ss:$16 sps:$4 sm:$0xff]   ;;  %v4099_v49 = vld [vmem:[#allocation5 + $0x148] ss:$16 sps:$4 sm:$0xff]  }
 0x189   :  { %2255 = vmatprep.subr.bf16.mxu0 %v4023_v52  ;;  %2296 = vmatprep.subr.bf16.mxu1 %v4026_v53  ;;  %v4102_v52 = vld [vmem:[#allocation5 + $0x2c8] ss:$16 sps:$4 sm:$0xff]   ;;  %v4107_v53 = vld [vmem:[#allocation5 + $0x16c] ss:$16 sps:$4 sm:$0xff]  }
 0x18c   :  { %2256 = vmatpush1.bf16.msra.mxu0 %v4021_v54  ;;  %2297 = vmatpush1.bf16.msra.mxu1 %v4024_v55  ;;  %v4110_v54 = vld [vmem:[#allocation5 + $0x2ec] ss:$16 sps:$4 sm:$0xff]   ;;  %v4105_v55 = vld [vmem:[#allocation5 + $0x168] ss:$16 sps:$4 sm:$0xff]  }
 0x18d   :  { %2257 = vmatprep.subr.bf16.mxu0 %v4029_v56  ;;  %2298 = vmatprep.subr.bf16.mxu1 %v4032_v58  ;;  %v4108_v56 = vld [vmem:[#allocation5 + $0x2e8] ss:$16 sps:$4 sm:$0xff]   ;;  %v4113_v58 = vld [vmem:[#allocation5 + $0x18c] ss:$16 sps:$4 sm:$0xff]  }
 0x190   :  { %2258 = vmatpush1.bf16.msra.mxu0 %v4027_v59  ;;  %2299 = vmatpush1.bf16.msra.mxu1 %v4030_v60  ;;  %v4116_v59 = vld [vmem:[#allocation5 + $0x30c] ss:$16 sps:$4 sm:$0xff]   ;;  %v4111_v60 = vld [vmem:[#allocation5 + $0x188] ss:$16 sps:$4 sm:$0xff]  }
 0x191   :  { %2259 = vmatprep.subr.bf16.mxu0 %v4035_v61  ;;  %2300 = vmatprep.subr.bf16.mxu1 %v4038_v63  ;;  %v4114_v61 = vld [vmem:[#allocation5 + $0x308] ss:$16 sps:$4 sm:$0xff]   ;;  %v4119_v63 = vld [vmem:[#allocation5 + $0x1ac] ss:$16 sps:$4 sm:$0xff]  }
 0x194   :  { %2260 = vmatpush1.bf16.msra.mxu0 %v4033_v0  ;;  %2301 = vmatpush1.bf16.msra.mxu1 %v4036_v2  ;;  %v4122_v0 = vld [vmem:[#allocation5 + $0x32c] ss:$16 sps:$4 sm:$0xff]   ;;  %v4117_v2 = vld [vmem:[#allocation5 + $0x1a8] ss:$16 sps:$4 sm:$0xff]  }
 0x195   :  { %2311 = vmatprep.subr.bf16.mxu0 %v4041_v3  ;;  %2352 = vmatprep.subr.bf16.mxu1 %v4044_v50  ;;  %v4120_v3 = vld [vmem:[#allocation5 + $0x328] ss:$16 sps:$4 sm:$0xff]   ;;  %v4125_v50 = vld [vmem:[#allocation5 + $0x1cc] ss:$16 sps:$4 sm:$0xff]  }
 0x197   :  { %2262 = vmatmul.mubr.bf16.vlgmr.msra.gmra.mrb[4].mxu0 %v4778_v6  ;;  %2303 = vmatmul.mubr.bf16.vlgmr.msra.gmra.mrb[4].mxu1 %v4782_v7 }
 0x198   :  { %2312 = vmatpush1.bf16.msra.mxu0 %v4039_v44  ;;  %2353 = vmatpush1.bf16.msra.mxu1 %v4042_v4  ;;  %v4128_v44 = vld [vmem:[#allocation5 + $0x34c] ss:$16 sps:$4 sm:$0xff]   ;;  %v4123_v4 = vld [vmem:[#allocation5 + $0x1c8] ss:$16 sps:$4 sm:$0xff]  }
 0x199   :  { %2313 = vmatprep.subr.bf16.mxu0 %v4047_v8  ;;  %2354 = vmatprep.subr.bf16.mxu1 %v4050_v9  ;;  %v4131_v8 = vld [vmem:[#allocation5 + $0x1ec] ss:$16 sps:$4 sm:$0xff]  }
 0x19a   :  { %2343 = vmatprep.mubr.bf16.mxu0 %v4517_v40  ;;  %2384 = vmatprep.mubr.bf16.mxu1 %v4768_v57  ;;  %v4071_v57 = vld [vmem:[#allocation5 + $0xac] ss:$16 sps:$4 sm:$0xff]  }
 0x19b   :  { %v4134_v9 = vld [vmem:[#allocation5 + $0x36c] ss:$16 sps:$4 sm:$0xff]  }
 0x19c   :  { %2314 = vmatpush1.bf16.msra.mxu0 %v4045_v10  ;;  %2355 = vmatpush1.bf16.msra.mxu1 %v4048_v11  ;;  %v4129_v10 = vld [vmem:[#allocation5 + $0x1e8] ss:$16 sps:$4 sm:$0xff]  }
 0x19d   :  { %2315 = vmatprep.subr.bf16.mxu0 %v4053_v12  ;;  %2356 = vmatprep.subr.bf16.mxu1 %v4056_v13  ;;  %v4132_v11 = vld [vmem:[#allocation5 + $0x368] ss:$16 sps:$4 sm:$0xff]   ;;  %v4137_v12 = vld [vmem:[#allocation5 + $0x38c] ss:$16 sps:$4 sm:$0xff]  }
 0x19e   :  { %v4140_v13 = vld [vmem:[#allocation5 + $0x40c] ss:$16 sps:$4 sm:$0xff]  }
 0x1a0   :  { %2316 = vmatpush1.bf16.msra.mxu0 %v4051_v24  ;;  %2357 = vmatpush1.bf16.msra.mxu1 %v4054_v14  ;;  %v4135_v24 = vld [vmem:[#allocation5 + $0x388] ss:$16 sps:$4 sm:$0xff]  }
 0x1a1   :  { %2317 = vmatprep.subr.bf16.mxu0 %v4059_v15  ;;  %2358 = vmatprep.subr.bf16.mxu1 %v4062_v17  ;;  %v4138_v14 = vld [vmem:[#allocation5 + $0x408] ss:$16 sps:$4 sm:$0xff]   ;;  %v4143_v15 = vld [vmem:[#allocation5 + $0x3ac] ss:$16 sps:$4 sm:$0xff]  }
 0x1a2   :  { %v4146_v17 = vld [vmem:[#allocation5 + $0x42c] ss:$16 sps:$4 sm:$0xff]  }
 0x1a4   :  { %2318 = vmatpush1.bf16.msra.mxu0 %v4057_v18  ;;  %2359 = vmatpush1.bf16.msra.mxu1 %v4060_v19  ;;  %v4141_v18 = vld [vmem:[#allocation5 + $0x3a8] ss:$16 sps:$4 sm:$0xff]  }
 0x1a5   :  { %2360 = vmatprep.subr.bf16.mxu1 %v4065_v20  ;;  %2393 = vmatprep.subr.bf16.mxu0 %v4068_v21  ;;  %v4144_v19 = vld [vmem:[#allocation5 + $0x428] ss:$16 sps:$4 sm:$0xff]   ;;  %v4149_v20 = vld [vmem:[#allocation5 + $0x3cc] ss:$16 sps:$4 sm:$0xff]  }
 0x1a6   :  { %v4152_v21 = vld [vmem:[#allocation5 + $0x44c] ss:$16 sps:$4 sm:$0xff]  }
 0x1a7   :  { %3538 = vmatmul.mubr.msk.bf16.vlgmr.msra.gmra.mrb[8].mxu0 %vm1230_vm0, %v4790_v42 }
 0x1a8   :  { %2361 = vmatpush1.bf16.msra.mxu1 %v4063_v22  ;;  %2394 = vmatpush1.bf16.msra.mxu0 %v4066_v23  ;;  %v4147_v22 = vld [vmem:[#allocation5 + $0x3c8] ss:$16 sps:$4 sm:$0xff]  }
 0x1a9   :  { %2362 = vmatprep.subr.bf16.mxu1 %v4071_v57  ;;  %2395 = vmatprep.subr.bf16.mxu0 %v4074_v25  ;;  %v4150_v23 = vld [vmem:[#allocation5 + $0x448] ss:$16 sps:$4 sm:$0xff]   ;;  %v4155_v57 = vld [vmem:[#allocation5 + $0x3ec] ss:$16 sps:$4 sm:$0xff]  }
 0x1aa   :  { %2425 = vmatprep.mubr.bf16.mxu0 %v4772_v62  ;;  %v4095_v62 = vld [vmem:[#allocation5 + $0x12c] ss:$16 sps:$4 sm:$0xff]  }
 0x1ab   :  { %v4158_v25 = vld [vmem:[#allocation5 + $0x46c] ss:$16 sps:$4 sm:$0xff]  }
 0x1ac   :  { %2363 = vmatpush1.bf16.msra.mxu1 %v4069_v26  ;;  %2396 = vmatpush1.bf16.msra.mxu0 %v4072_v27  ;;  %v4156_v26 = vld [vmem:[#allocation5 + $0x468] ss:$16 sps:$4 sm:$0xff]   ;;  %v4159_v27 = vld [vmem:[#allocation14 + $0x40] sm:$0xff]  }
 0x1ad   :  { %2364 = vmatprep.subr.bf16.mxu1 %v4077_v28  ;;  %2397 = vmatprep.subr.bf16.mxu0 %v4080_v29  ;;  %v4160_v28 = vld [vmem:[#allocation14] sm:$0xff]   ;;  %v4162_v29 = vld [vmem:[#allocation14 + $0x8] sm:$0xff]  }
 0x1b0   :  { %2365 = vmatpush1.bf16.msra.mxu1 %v4075_v30  ;;  %2398 = vmatpush1.bf16.msra.mxu0 %v4078_v45  ;;  %v4163_v30 = vld [vmem:[#allocation14 + $0x50] sm:$0xff]  }
 0x1b1   :  { %2366 = vmatprep.subr.bf16.mxu1 %v4083_v51  ;;  %2399 = vmatprep.subr.bf16.mxu0 %v4086_v31  ;;  %v4164_v45 = vld [vmem:[#allocation14 + $0x10] sm:$0xff]   ;;  %v4165_v51 = vld [vmem:[#allocation14 + $0x58] sm:$0xff]  }
 0x1b2   :  { %v4166_v31 = vld [vmem:[#allocation14 + $0x18] sm:$0xff]  }
 0x1b4   :  { %2367 = vmatpush1.bf16.msra.mxu1 %v4081_v32  ;;  %2400 = vmatpush1.bf16.msra.mxu0 %v4084_v33  ;;  %v4167_v32 = vld [vmem:[#allocation14 + $0x60] sm:$0xff]  }
 0x1b5   :  { %2368 = vmatprep.subr.bf16.mxu1 %v4089_v35  ;;  %2401 = vmatprep.subr.bf16.mxu0 %v4092_v36  ;;  %v4168_v33 = vld [vmem:[#allocation14 + $0x20] sm:$0xff]   ;;  %v4170_v35 = vld [vmem:[#allocation14 + $0x28] sm:$0xff]   ;;  %v4172_v36 = vld [vmem:[#allocation14 + $0x30] sm:$0xff]  }
 0x1b8   :  { %2369 = vmatpush1.bf16.msra.mxu1 %v4087_v37  ;;  %2402 = vmatpush1.bf16.msra.mxu0 %v4090_v38  ;;  %v4173_v37 = vld [vmem:[#allocation14 + $0x78] sm:$0xff]  }
 0x1b9   :  { %2370 = vmatprep.subr.bf16.mxu1 %v4095_v62  ;;  %2403 = vmatprep.subr.bf16.mxu0 %v4098_v39  ;;  %v4174_v38 = vld [vmem:[#allocation14 + $0x38] sm:$0xff]   ;;  %v4175_v62 = vld [vmem:[#allocation13 + $0x40] sm:$0xff]  }
 0x1ba   :  { %v1480_v39 = vld [vmem:[#allocation10] sm:$0xf] }
 0x1bc   :  { %2371 = vmatpush1.bf16.msra.mxu1 %v4093_v41  ;;  %2404 = vmatpush1.bf16.msra.mxu0 %v4096_v43  ;;  %v1493_v41 = vrot.slane %v1480_v39, %v4753_v16  ;;  %v4191_v43 = vld [vmem:[#allocation14 + $0xc0] sm:$0xff]  }
 0x1bd   :  { %2372 = vmatprep.subr.bf16.mxu1 %v4101_v46  ;;  %2405 = vmatprep.subr.bf16.mxu0 %v4104_v48  ;;  %v4192_v46 = vld [vmem:[#allocation14 + $0x80] sm:$0xff]   ;;  %v1497_v48 = vrot.slane %v1480_v39, %v4745_v34 }
 0x1c0   :  { %2373 = vmatpush1.bf16.msra.mxu1 %v4099_v49  ;;  %2406 = vmatpush1.bf16.msra.mxu0 %v4102_v52 }
 0x1c1   :  { %2374 = vmatprep.subr.bf16.mxu1 %v4107_v53  ;;  %2407 = vmatprep.subr.bf16.mxu0 %v4110_v54 }
 0x1c4   :  { %2375 = vmatpush1.bf16.msra.mxu1 %v4105_v55  ;;  %2408 = vmatpush1.bf16.msra.mxu0 %v4108_v56  ;;  %v4193_v56 = vld [vmem:[#allocation14 + $0xc8] sm:$0xff]  }
 0x1c5   :  { %2376 = vmatprep.subr.bf16.mxu1 %v4113_v58  ;;  %2409 = vmatprep.subr.bf16.mxu0 %v4116_v59 }
 0x1c8   :  { %2377 = vmatpush1.bf16.msra.mxu1 %v4111_v60  ;;  %2410 = vmatpush1.bf16.msra.mxu0 %v4114_v61  ;;  %v4194_v61 = vld [vmem:[#allocation14 + $0x88] sm:$0xff]  }
 0x1c9   :  { %2378 = vmatprep.subr.bf16.mxu1 %v4119_v63  ;;  %2411 = vmatprep.subr.bf16.mxu0 %v4122_v0 }
 0x1cc   :  { %2379 = vmatpush1.bf16.msra.mxu1 %v4117_v2  ;;  %2412 = vmatpush1.bf16.msra.mxu0 %v4120_v3  ;;  %v4195_v2 = vld [vmem:[#allocation14 + $0xd0] sm:$0xff]  }
 0x1cd   :  { %2380 = vmatprep.subr.bf16.mxu1 %v4125_v50  ;;  %2413 = vmatprep.subr.bf16.mxu0 %v4128_v44  ;;  %v4196_v3 = vld [vmem:[#allocation14 + $0x90] sm:$0xff]   ;;  %v4197_v50 = vld [vmem:[#allocation14 + $0xd8] sm:$0xff]  }
 0x1ce   :  { %v4198_v44 = vld [vmem:[#allocation14 + $0x98] sm:$0xff]  }
 0x1d0   :  { %2381 = vmatpush1.bf16.msra.mxu1 %v4123_v4  ;;  %2414 = vmatpush1.bf16.msra.mxu0 %v4126_v5  ;;  %v4199_v4 = vld [vmem:[#allocation14 + $0xe0] sm:$0xff]  }
 0x1d1   :  { %2382 = vmatprep.subr.bf16.mxu1 %v4131_v8  ;;  %2415 = vmatprep.subr.bf16.mxu0 %v4134_v9  ;;  %v4200_v5 = vld [vmem:[#allocation14 + $0xa0] sm:$0xff]   ;;  %v4201_v8 = vld [vmem:[#allocation14 + $0xe8] sm:$0xff]  }
 0x1d2   :  { %v4202_v9 = vld [vmem:[#allocation14 + $0xa8] sm:$0xff]  }
 0x1d4   :  { %2383 = vmatpush1.bf16.msra.mxu1 %v4129_v10  ;;  %2416 = vmatpush1.bf16.msra.mxu0 %v4132_v11  ;;  %v4203_v10 = vld [vmem:[#allocation14 + $0xf0] sm:$0xff]  }
 0x1d5   :  { %2417 = vmatprep.subr.bf16.mxu0 %v4137_v12  ;;  %2434 = vmatprep.subr.bf16.mxu1 %v4140_v13  ;;  %v4204_v11 = vld [vmem:[#allocation14 + $0xb0] sm:$0xff]   ;;  %v4205_v12 = vld [vmem:[#allocation14 + $0xf8] sm:$0xff]  }
 0x1d6   :  { %v4206_v13 = vld [vmem:[#allocation14 + $0xb8] sm:$0xff]  }
 0x1d7   :  { %2385 = vmatmul.mubr.bf16.vlgmr.msra.gmra.mrb[8].mxu1 %v4778_v6  ;;  %v4153_v6 = vld [vmem:[#allocation5 + $0x3e8] ss:$16 sps:$4 sm:$0xff]  }
 0x1d8   :  { %2418 = vmatpush1.bf16.msra.mxu0 %v4135_v24  ;;  %2435 = vmatpush1.bf16.msra.mxu1 %v4138_v14  ;;  %v4207_v24 = vld [vmem:[#allocation13 + $0xc0] sm:$0xff]   ;;  %v1485_v14 = vrot.slane %v1480_v39, %v4740_v1 }
 0x1d9   :  { %2419 = vmatprep.subr.bf16.mxu0 %v4143_v15  ;;  %2436 = vmatprep.subr.bf16.mxu1 %v4146_v17  ;;  %v1489_v15 = vrot.slane %v1480_v39, %v4726_v47 }
 0x1da   :  { %2466 = vmatprep.mubr.bf16.mxu1 %v4517_v40  ;;  %v4161_v40 = vld [vmem:[#allocation14 + $0x48] sm:$0xff]  }
 0x1dc   :  { %2420 = vmatpush1.bf16.msra.mxu0 %v4141_v18  ;;  %2437 = vmatpush1.bf16.msra.mxu1 %v4144_v19 }
 0x1dd   :  { %2421 = vmatprep.subr.bf16.mxu0 %v4149_v20  ;;  %2438 = vmatprep.subr.bf16.mxu1 %v4152_v21 }
 0x1e0   :  { %2422 = vmatpush1.bf16.msra.mxu0 %v4147_v22  ;;  %2439 = vmatpush1.bf16.msra.mxu1 %v4150_v23 }
 0x1e1   :  { %2423 = vmatprep.subr.bf16.mxu0 %v4155_v57  ;;  %2440 = vmatprep.subr.bf16.mxu1 %v4158_v25 }
 0x1e4   :  { %2424 = vmatpush1.bf16.msra.mxu0 %v4153_v6  ;;  %2441 = vmatpush1.bf16.msra.mxu1 %v4156_v26 }
 0x1e5   :  { %3606 = vmatprep.subr.bf16.mxu0 %v4159_v27  ;;  %3628 = vmatprep.subr.bf16.mxu1 %v4191_v43 }
 0x1e7   :  { %2426 = vmatmul.mubr.bf16.vlgmr.msra.gmra.mrb[12].mxu0 %v4782_v7  ;;  %3539 = vmatmul.mubr.msk.bf16.vlgmr.msra.gmra.mrb[12].mxu1 %vm1230_vm0, %v4790_v42  ;;  %v4169_v7 = vld [vmem:[#allocation14 + $0x68] sm:$0xff]   ;;  %v4171_v42 = vld [vmem:[#allocation14 + $0x70] sm:$0xff]  }
 0x1e8   :  { %3607 = vmatpush3.bf16.msra.mxu0 %v4160_v28  ;;  %3629 = vmatpush3.bf16.msra.mxu1 %v4192_v46 }
 0x1e9   :  { %3608 = vmatprep.subr.bf16.mxu0 %v4161_v40  ;;  %3630 = vmatprep.subr.bf16.mxu1 %v4193_v56  ;;  %v4178_v56 = vld [vmem:[#allocation13 + $0x8] sm:$0xff]  }
 0x1ec   :  { %3609 = vmatpush3.bf16.msra.mxu0 %v4162_v29  ;;  %3631 = vmatpush3.bf16.msra.mxu1 %v4194_v61  ;;  %v4808_v29 = vld [vmem:[#allocation11] sm:$0xf]  ;;  %v4183_v61 = vld [vmem:[#allocation13 + $0x60] sm:$0xff]  }
 0x1ed   :  { %3610 = vmatprep.subr.bf16.mxu0 %v4163_v30  ;;  %3632 = vmatprep.subr.bf16.mxu1 %v4195_v2  ;;  %v2480_v30 = vrot.slane %v4808_v29, %v4740_v1  ;;  %v4186_v2 = vld [vmem:[#allocation13 + $0x28] sm:$0xff]  }
 0x1f0   :  { %3611 = vmatpush3.bf16.msra.mxu0 %v4164_v45  ;;  %3633 = vmatpush3.bf16.msra.mxu1 %v4196_v3  ;;  %v4187_v3 = vld [vmem:[#allocation13 + $0x70] sm:$0xff]  }
 0x1f1   :  { %3612 = vmatprep.subr.bf16.mxu0 %v4165_v51  ;;  %3634 = vmatprep.subr.bf16.mxu1 %v4197_v50  ;;  %v4812_v51 = vld [vmem:[#allocation16] sm:$0xf]  ;;  %v4188_v50 = vld [vmem:[#allocation13 + $0x30] sm:$0xff]  }
 0x1f4   :  { %3613 = vmatpush3.bf16.msra.mxu0 %v4166_v31  ;;  %3635 = vmatpush3.bf16.msra.mxu1 %v4198_v44  ;;  %v2484_v31 = vrot.slane %v4808_v29, %v4726_v47  ;;  %v4189_v44 = vld [vmem:[#allocation13 + $0x78] sm:$0xff]  }
 0x1f5   :  { %3614 = vmatprep.subr.bf16.mxu0 %v4167_v32  ;;  %3636 = vmatprep.subr.bf16.mxu1 %v4199_v4  ;;  %v4190_v4 = vld [vmem:[#allocation13 + $0x38] sm:$0xff]  }
 0x1f8   :  { %3615 = vmatpush3.bf16.msra.mxu0 %v4168_v33  ;;  %3637 = vmatpush3.bf16.msra.mxu1 %v4200_v5 }
 0x1f9   :  { %3616 = vmatprep.subr.bf16.mxu0 %v4169_v7  ;;  %3638 = vmatprep.subr.bf16.mxu1 %v4201_v8 }
 0x1fc   :  { %3617 = vmatpush3.bf16.msra.mxu0 %v4170_v35  ;;  %3639 = vmatpush3.bf16.msra.mxu1 %v4202_v9 }
 0x1fd   :  { %3618 = vmatprep.subr.bf16.mxu0 %v4171_v42  ;;  %3640 = vmatprep.subr.bf16.mxu1 %v4203_v10 }
 0x200   :  { %3619 = vmatpush3.bf16.msra.mxu0 %v4172_v36  ;;  %3641 = vmatpush3.bf16.msra.mxu1 %v4204_v11  ;;  %v2578_v36 = vrot.slane %v4812_v51, %v4740_v1  ;;  %v4179_v1 = vld [vmem:[#allocation13 + $0x50] sm:$0xff]  }
 0x201   :  { %3620 = vmatprep.subr.bf16.mxu0 %v4173_v37  ;;  %3642 = vmatprep.subr.bf16.mxu1 %v4205_v12 }
 0x204   :  { %3621 = vmatpush3.bf16.msra.mxu0 %v4174_v38  ;;  %3643 = vmatpush3.bf16.msra.mxu1 %v4206_v13 }
 0x205   :  { %3650 = vmatprep.subr.bf16.mxu0 %v4175_v62  ;;  %3672 = vmatprep.subr.bf16.mxu1 %v4207_v24  ;;  %v2582_v62 = vrot.slane %v4812_v51, %v4726_v47  ;;  %v4181_v47 = vld [vmem:[#allocation13 + $0x58] sm:$0xff]  }
 0x22a   :  { %v1350_v49 = vpop.f32.mrb[0].mxu0  ;;  %v1473_v52 = vpop.f32.mrb[0].mxu1 }
 0x22b   :  { %v4802_v53 = vmul.f32 %v1493_v41, %v1473_v52  ;;  %v1352_v54 = vpop.f32.mrb[1].mxu0  ;;  %v1475_v55 = vpop.f32.mrb[1].mxu1  ;;  %v1502_v17 = vmul.f32 %v1485_v14, %v1350_v49  ;;  %v4176_v49 = vld [vmem:[#allocation13] sm:$0xff]  }
 0x22c   :  { %v4804_v58 = vmul.f32 %v1497_v48, %v1475_v55  ;;  %v1354_v59 = vpop.f32.mrb[2].mxu0  ;;  %v1477_v60 = vpop.f32.mrb[2].mxu1  ;;  %v1503_v18 = vmul.f32 %v1489_v15, %v1352_v54  ;;  %v4177_v54 = vld [vmem:[#allocation13 + $0x48] sm:$0xff]  }
 0x22d   :  { %v1355_v63 = vpop.f32.mrb[3].mxu0  ;;  %v1478_v0 = vpop.f32.mrb[3].mxu1  ;;  %v4180_v59 = vld [vmem:[#allocation13 + $0x10] sm:$0xff]   ;;  %v4182_v60 = vld [vmem:[#allocation13 + $0x18] sm:$0xff]  }
 0x22e   :  { %v4184_v63 = vld [vmem:[#allocation13 + $0x20] sm:$0xff]   ;;  %v4185_v0 = vld [vmem:[#allocation13 + $0x68] sm:$0xff]  }
 0x26a   :  { %v2263_v19 = vpop.f32.mrb[4].mxu0  ;;  %v2304_v20 = vpop.f32.mrb[4].mxu1 }
 0x26b   :  { %v2264_v21 = vadd.f32 %v2263_v19, %v1502_v17  ;;  %v2265_v22 = vpop.f32.mrb[5].mxu0  ;;  %v2306_v23 = vpop.f32.mrb[5].mxu1  ;;  %v2488_v17 = vrot.slane %v4808_v29, %v4753_v16 }
 0x26c   :  { %v2266_v57 = vadd.f32 %v2265_v22, %v1503_v18  ;;  %v2267_v25 = vpop.f32.mrb[6].mxu0  ;;  %v2308_v6 = vpop.f32.mrb[6].mxu1 }
 0x26d   :  { %v2305_v26 = vadd.f32 %v2304_v20, %v2264_v21  ;;  %v2268_v27 = vpop.f32.mrb[7].mxu0  ;;  %v2309_v28 = vpop.f32.mrb[7].mxu1  ;;  %v2492_v21 = vrot.slane %v4808_v29, %v4745_v34  ;;  %v4208_v29 = vld [vmem:[#allocation13 + $0x80] sm:$0xff]  }
 0x26e   :  { %v2307_v40 = vadd.f32 %v2306_v23, %v2266_v57  ;;  %v2590_v28 = vrot.slane %v4812_v51, %v4745_v34  ;;  %v4213_v34 = vld [vmem:[#allocation13 + $0xd8] sm:$0xff]  }
 0x27a   :  { %v2345_v45 = vpop.f32.mrb[8].mxu0 }
 0x27b   :  { %v2346_v32 = vadd.f32 %v2345_v45, %v2305_v26  ;;  %v2347_v33 = vpop.f32.mrb[9].mxu0  ;;  %v2586_v26 = vrot.slane %v4812_v51, %v4753_v16  ;;  %v4211_v16 = vld [vmem:[#allocation13 + $0xd0] sm:$0xff]   ;;  %v4214_v51 = vld [vmem:[#allocation13 + $0x98] sm:$0xff]  }
 0x27c   :  { %v2348_v7 = vadd.f32 %v2347_v33, %v2307_v40  ;;  %v2349_v35 = vpop.f32.mrb[10].mxu0 }
 0x27d   :  { %v2497_v42 = vadd.f32 %v2480_v30, %v2346_v32  ;;  %v2350_v37 = vpop.f32.mrb[11].mxu0 }
 0x27e   :  { %v2498_v38 = vadd.f32 %v2484_v31, %v2348_v7  ;;  %v4209_v7 = vld [vmem:[#allocation13 + $0xc8] sm:$0xff]   ;;  %v4215_v37 = vld [vmem:[#allocation13 + $0xe0] sm:$0xff]  }
 0x27f   :  { %v2501_v39 = vmax.f32 %v2497_v42, 0.0  ;;  %v4210_v42 = vld [vmem:[#allocation13 + $0x88] sm:$0xff]  }
 0x280   :  { %v2502_v41 = vmax.f32 %v2498_v38, 0.0  ;;  %v4216_v38 = vld [vmem:[#allocation13 + $0xa0] sm:$0xff]  }
 0x281   :  { %v2595_v43 = vmul.f32 %v2578_v36, %v2501_v39  ;;  %v2505_v5 = vpack.c.bf16 %v2501_v39, %v2501_v39  ;;  %v4212_v36 = vld [vmem:[#allocation13 + $0x90] sm:$0xff]   ;;  %v4218_v39 = vld [vmem:[#allocation13 + $0xa8] sm:$0xff]  }
 0x282   :  { %v2596_v46 = vmul.f32 %v2582_v62, %v2502_v41  ;;  %v2506_v55 = vpack.c.bf16 %v2502_v41, %v2502_v41  ;;  %v4217_v62 = vld [vmem:[#allocation13 + $0xe8] sm:$0xff]   ;;  %v4219_v41 = vld [vmem:[#allocation13 + $0xf0] sm:$0xff]  }
 0x283   :  { %v2599_v52 = vpack.c.bf16 %v2595_v43, %v2595_v43  ;;  %v4220_v43 = vld [vmem:[#allocation13 + $0xb0] sm:$0xff]  }
 0x284   :  { %v2600_v48 = vpack.c.bf16 %v2596_v46, %v2596_v46  ;;  %v4221_v46 = vld [vmem:[#allocation13 + $0xf8] sm:$0xff]  }
 0x286   :  { %2891 = vmatprep.mubr.bf16.mxu0 %v2600_v48  ;;  %v4222_v48 = vld [vmem:[#allocation13 + $0xb8] sm:$0xff]  }
 0x287   :  { %2892 = vmatmul.mubr.bf16.vlgmr.msra.gmra.mrb[16].mxu0 %v2599_v52 }
 0x288   :  { %3651 = vmatpush3.bf16.msra.mxu0 %v4176_v49  ;;  %3171 = vmatprep.mubr.bf16.mxu0 %v2506_v55 }
 0x289   :  { %3652 = vmatprep.subr.bf16.mxu0 %v4177_v54 }
 0x28c   :  { %3653 = vmatpush3.bf16.msra.mxu0 %v4178_v56 }
 0x28d   :  { %3654 = vmatprep.subr.bf16.mxu0 %v4179_v1 }
 0x290   :  { %3655 = vmatpush3.bf16.msra.mxu0 %v4180_v59 }
 0x291   :  { %3656 = vmatprep.subr.bf16.mxu0 %v4181_v47 }
 0x294   :  { %3657 = vmatpush3.bf16.msra.mxu0 %v4182_v60 }
 0x295   :  { %3658 = vmatprep.subr.bf16.mxu0 %v4183_v61 }
 0x298   :  { %3659 = vmatpush3.bf16.msra.mxu0 %v4184_v63 }
 0x299   :  { %3660 = vmatprep.subr.bf16.mxu0 %v4185_v0 }
 0x29c   :  { %3661 = vmatpush3.bf16.msra.mxu0 %v4186_v2 }
 0x29d   :  { %3662 = vmatprep.subr.bf16.mxu0 %v4187_v3 }
 0x2a0   :  { %3663 = vmatpush3.bf16.msra.mxu0 %v4188_v50 }
 0x2a1   :  { %3664 = vmatprep.subr.bf16.mxu0 %v4189_v44  ;;  %v3572_v44 = vld [vmem:[#allocation17] ss:$0 sm:$0xff] }
 0x2a4   :  { %3665 = vmatpush3.bf16.msra.mxu0 %v4190_v4 }
 0x2a7   :  { %3172 = vmatmul.mubr.bf16.vlgmr.msra.gmra.mrb[20].mxu0 %v2505_v5 }
 0x2aa   :  { %v2386_v8 = vpop.f32.mrb[8].mxu1 }
 0x2ab   :  { %v2387_v9 = vadd.f32 %v2386_v8, %v4802_v53  ;;  %v2388_v10 = vpop.f32.mrb[9].mxu1 }
 0x2ac   :  { %v2389_v11 = vadd.f32 %v2388_v10, %v4804_v58  ;;  %v2390_v12 = vpop.f32.mrb[10].mxu1 }
 0x2ad   :  { %v2391_v13 = vpop.f32.mrb[11].mxu1 }
 0x2ba   :  { %v2427_v24 = vpop.f32.mrb[12].mxu0  ;;  %v2468_v14 = vpop.f32.mrb[12].mxu1 }
 0x2bb   :  { %v2428_v15 = vadd.f32 %v2427_v24, %v2387_v9  ;;  %v2429_v18 = vpop.f32.mrb[13].mxu0  ;;  %v2470_v19 = vpop.f32.mrb[13].mxu1 }
 0x2bc   :  { %v2430_v20 = vadd.f32 %v2429_v18, %v2389_v11  ;;  %v2431_v22 = vpop.f32.mrb[14].mxu0  ;;  %v2472_v23 = vpop.f32.mrb[14].mxu1 }
 0x2bd   :  { %v2469_v53 = vadd.f32 %v2468_v14, %v2428_v15  ;;  %v2432_v57 = vpop.f32.mrb[15].mxu0  ;;  %v2473_v25 = vpop.f32.mrb[15].mxu1  ;;  %v3605_v14 = vld [vmem:[#allocation19] ss:$0 sm:$0xff] }
 0x2be   :  { %v2471_v58 = vadd.f32 %v2470_v19, %v2430_v20 }
 0x2bf   :  { %v2499_v6 = vadd.f32 %v2488_v17, %v2469_v53 }
 0x2c0   :  { %v2500_v27 = vadd.f32 %v2492_v21, %v2471_v58 }
 0x2c1   :  { %v2503_v40 = vmax.f32 %v2499_v6, 0.0 }
 0x2c2   :  { %v2504_v30 = vmax.f32 %v2500_v27, 0.0 }
 0x2c3   :  { %v2597_v45 = vmul.f32 %v2586_v26, %v2503_v40  ;;  %v2507_v49 = vpack.c.bf16 %v2503_v40, %v2503_v40 }
 0x2c4   :  { %v2598_v31 = vmul.f32 %v2590_v28, %v2504_v30  ;;  %v2508_v35 = vpack.c.bf16 %v2504_v30, %v2504_v30 }
 0x2c5   :  { %v2601_v33 = vpack.c.bf16 %v2597_v45, %v2597_v45 }
 0x2c6   :  { %v2602_v32 = vpack.c.bf16 %v2598_v31, %v2598_v31 }
 0x2c8   :  { %2931 = vmatprep.mubr.bf16.mxu1 %v2602_v32 }
 0x2c9   :  { %2932 = vmatmul.mubr.bf16.vlgmr.msra.gmra.mrb[16].mxu1 %v2601_v33 }
 0x2ca   :  { %3673 = vmatpush3.bf16.msra.mxu1 %v4208_v29  ;;  %3211 = vmatprep.mubr.bf16.mxu1 %v2508_v35 }
 0x2cb   :  { %3674 = vmatprep.subr.bf16.mxu1 %v4209_v7 }
 0x2ce   :  { %3675 = vmatpush3.bf16.msra.mxu1 %v4210_v42 }
 0x2cf   :  { %3676 = vmatprep.subr.bf16.mxu1 %v4211_v16 }
 0x2d2   :  { %3677 = vmatpush3.bf16.msra.mxu1 %v4212_v36 }
 0x2d3   :  { %3678 = vmatprep.subr.bf16.mxu1 %v4213_v34 }
 0x2d6   :  { %3679 = vmatpush3.bf16.msra.mxu1 %v4214_v51 }
 0x2d7   :  { %3680 = vmatprep.subr.bf16.mxu1 %v4215_v37 }
 0x2da   :  { %3681 = vmatpush3.bf16.msra.mxu1 %v4216_v38 }
 0x2db   :  { %3682 = vmatprep.subr.bf16.mxu1 %v4217_v62 }
 0x2de   :  { %3683 = vmatpush3.bf16.msra.mxu1 %v4218_v39 }
 0x2df   :  { %3684 = vmatprep.subr.bf16.mxu1 %v4219_v41 }
 0x2e2   :  { %3685 = vmatpush3.bf16.msra.mxu1 %v4220_v43 }
 0x2e3   :  { %3686 = vmatprep.subr.bf16.mxu1 %v4221_v46 }
 0x2e6   :  { %3687 = vmatpush3.bf16.msra.mxu1 %v4222_v48 }
 0x2e9   :  { %3212 = vmatmul.mubr.bf16.vlgmr.msra.gmra.mrb[20].mxu1 %v2507_v49 }
 0x35a   :  { %v3622_v52 = vpop.f32.mrb[16].mxu0 }
 0x35b   :  { %v3623_v54 = vpop.f32.mrb[17].mxu0 }
 0x35c   :  { %v3624_v55 = vadd.f32 %v3623_v54, %v3622_v52  ;;  %v3625_v56 = vpop.f32.mrb[18].mxu0 }
 0x35d   :  { %v3626_v1 = vpop.f32.mrb[19].mxu0 }
 0x37a   :  { %v3666_v59 = vpop.f32.mrb[20].mxu0 }
 0x37b   :  { %v3667_v47 = vpop.f32.mrb[21].mxu0 }
 0x37c   :  { %v3668_v60 = vadd.f32 %v3667_v47, %v3666_v59  ;;  %v3669_v61 = vpop.f32.mrb[22].mxu0 }
 0x37d   :  { %v3670_v63 = vpop.f32.mrb[23].mxu0 }
 0x39c   :  { %v3644_v0 = vpop.f32.mrb[16].mxu1 }
 0x39d   :  { %v3645_v2 = vpop.f32.mrb[17].mxu1 }
 0x39e   :  { %v3646_v3 = vadd.f32 %v3645_v2, %v3644_v0  ;;  %v3647_v50 = vpop.f32.mrb[18].mxu1 }
 0x39f   :  { %v3648_v4 = vpop.f32.mrb[19].mxu1 }
 0x3a0   :  { %v2934_v5 = vadd.f32 %v3646_v3, %v3624_v55 }
 0x3a2   :  { %v2946_v8 = vmul.f32 %v3572_v44, %v2934_v5 }
 0x3a4   :  { %v3174_v9 = vadd.f32 %v3668_v60, %v2946_v8 }
 0x3bc   :  { %v3688_v10 = vpop.f32.mrb[20].mxu1 }
 0x3bd   :  { %v3689_v11 = vpop.f32.mrb[21].mxu1 }
 0x3be   :  { %v3690_v12 = vadd.f32 %v3689_v11, %v3688_v10  ;;  %v3691_v13 = vpop.f32.mrb[22].mxu1 }
 0x3bf   :  { %v3692_v24 = vpop.f32.mrb[23].mxu1 }
 0x3c0   :  { %v3214_v15 = vadd.f32 %v3690_v12, %v3174_v9 }
 0x3c2   :  { %v3226_v17 = vadd.f32 %v3605_v14, %v3214_v15 }
 0x3c4   :  { %3227 = vst [vmem:[#allocation20] sm:$0xff] %v3226_v17 }
 0x3c5   :  { %4477 = shalt.err (!%p4474_p8)
}
 0x3c6   :  { %s4478_s26 = scalar_lea.hbm %s4853_s11, 128 }
 0x3c7   :  { %p4479_p9 = scmp.ne.s32.totalorder %s4853_s11, %s4478_s26  ;;  %p4482_p10 = scmp.lt.u32.totalorder %s4478_s26, %s4853_s11 }
 0x3c9   :  { %p4484_p11 = pnand %p4482_p10, %p4479_p9 }
 0x3cb   :  { %4487 = shalt.err (!%p4484_p11)
}
 0x3cc   :  { %3237 = dma.vmem_to_hbm [thread:$0]  %s3235_s25, 128, %s4853_s11, [#allocation4]  }
 0x3cd   :  { %4500 = dma.done.wait [#allocation4], 128  }
 0x3ce   :  { %4501 = vsyncadd [#allocation4], 4294967168 }
 0x3cf   :  { %3241 = vsyncpa [#allocation3], 1 }
 0x3d0   :  { %3242 = vsyncpa [#allocation6], 1 }
 0x3d1   :  { %3243 = vsyncpa [#allocation9], 1 }
 0x3d2   :  { %3244 = vsyncpa [#allocation12], 1 }
 0x3d3   :  { %3245 = vsyncpa [#allocation15], 1 }
 0x3d4   :  { %3246 = vsyncpa [#allocation18], 1 }
 0x3d5   :  { %3247 = vsyncpa [#allocation4], 1 }

</bundles_post_ra>
